<compile_context>
chip_gen: v7x
topology: tpu7x:2x2x1
jax: 0.10.0
libtpu: 0.0.40
codegen_flags: <defaults>
</compile_context>

<pallas_src>
import jax
import jax.numpy as jnp
import numpy as np
from jax import lax
from jax.experimental import pallas as pl
from jax.experimental.pallas import tpu as pltpu

KSIZE = 3
PAD = 1
LANES = 128


def _pick_row_tile(hh, wh, cp, budget_bytes=20 * 1024 * 1024, target=32):
    """Largest divisor of hh (<= target) whose per-step VMEM footprint fits the budget."""
    def est(th):
        halo = (th + 2) * (wh + 2) * cp
        inner = th * wh * cp
        return (2 * halo * 4            # double-buffered pooled tile (f32)
                + halo * 2              # binarized activation scratch (bf16)
                + inner * 9 * 2         # im2col LHS (bf16)
                + inner * 4             # conv result (f32)
                + 2 * inner * 4         # double-buffered output block (f32)
                + 2 * 9 * cp * cp * 2)  # binary weights, both branches (bf16)
    th = min(hh, target)
    while th > 1 and (hh % th != 0 or est(th) > budget_bytes):
        th -= 1
    return th


def _bbcu_down_kernel(p_hbm, vec_ref, w_ref, out_ref, p_buf, a_buf, sem):
    TH, Wh, Cp = out_ref.shape
    b = pl.program_id(0)
    i = pl.program_id(1)
    nT = pl.num_programs(1)

    def tile_copy(bb, ii, slot):
        row0 = pl.multiple_of(ii * TH, TH)
        return pltpu.make_async_copy(
            p_hbm.at[bb, pl.ds(row0, TH + 2)], p_buf.at[slot], sem.at[slot])

    slot = i % 2

    @pl.when(i == 0)
    def _():
        # Zero the activation scratch once per row sweep; only its interior
        # (all rows, cols 1..Wh) is overwritten below, so the zero ring that
        # implements the conv's padding=1 survives for the whole sweep.
        a_buf[...] = jnp.zeros_like(a_buf)
        tile_copy(b, i, slot).start()            # prime this batch's pipeline

    @pl.when(i + 1 < nT)
    def _():
        tile_copy(b, i + 1, 1 - slot).start()    # prefetch next row tile

    tile_copy(b, i, slot).wait()

    p_tile = p_buf[slot]                         # (TH+2, Wh+2, Cp) pooled tile + halo, f32
    identity = p_tile[1:TH + 1, 1:Wh + 1, :]     # residual / identity path

    def branch(br):
        vb = vec_ref[br]                         # (5, Cp): mb, scale, b0, alpha, b1
        mb, scale, b0, alpha, b1 = (vb[j:j + 1] for j in range(5))

        # BinaryActivation of (pooled + learnable bias) over the halo'd tile
        # (torch.sign semantics: sign(0) == 0).  Exact in bf16 (+-1 / 0).
        v = p_tile[:, 1:Wh + 1, :] + mb
        sgn = jnp.where(v > 0.0, 1.0, jnp.where(v < 0.0, -1.0, 0.0))
        a_buf[:, 1:Wh + 1, :] = sgn.astype(a_buf.dtype)

        # Halo rows outside the image are conv zero-padding, not data.
        @pl.when(i == 0)
        def _():
            a_buf[0, 1:Wh + 1, :] = jnp.zeros((Wh, Cp), a_buf.dtype)

        @pl.when(i == nT - 1)
        def _():
            a_buf[TH + 1, 1:Wh + 1, :] = jnp.zeros((Wh, Cp), a_buf.dtype)

        a = a_buf[...]
        # im2col over the 9 taps -> one (TH*Wh, 9*Cp) x (9*Cp, Cp) MXU matmul.
        cols = [a[ky:ky + TH, kx:kx + Wh, :]
                for ky in range(KSIZE) for kx in range(KSIZE)]
        lhs = jnp.concatenate(cols, axis=-1).reshape(TH * Wh, KSIZE * KSIZE * Cp)
        conv = jnp.dot(lhs, w_ref[br], preferred_element_type=jnp.float32)
        conv = conv.reshape(TH, Wh, Cp)

        z = conv * scale + b0                        # weight scale applied in epilogue
        y = jnp.where(z >= 0.0, z, alpha * z) + b1   # RPReLU
        return y + identity

    out_ref[...] = branch(0) + branch(1)


def _prep_branch(pr, C, Cp):
    # HardBinaryConv parameter setup (plain JAX, done once):
    #   scale = mean_{cin,kh,kw} |W| per output channel; binary part = sign(W).
    # The +-1 sign part (exact in bf16) feeds the MXU; scale is applied in the
    # kernel epilogue so the result matches the f32 reference.
    w = pr["weight"].astype(jnp.float32)                  # (C, C, 3, 3) OIHW
    scale = jnp.mean(jnp.abs(w), axis=(1, 2, 3))          # (C,)
    wsgn = jnp.sign(w)
    wsgn = jnp.pad(wsgn, ((0, Cp - C), (0, Cp - C), (0, 0), (0, 0)))
    # -> (ky, kx, cin, cout) stacked to (9*Cp, Cp), tap-major, matching the
    # in-kernel im2col concatenation order.
    wmat = jnp.transpose(wsgn, (2, 3, 1, 0)).reshape(KSIZE * KSIZE * Cp, Cp)
    wmat = wmat.astype(jnp.bfloat16)

    def vec(v):
        return jnp.pad(v.reshape(-1).astype(jnp.float32), (0, Cp - C))

    vecs = jnp.stack([vec(pr["move_bias"]), vec(scale), vec(pr["rp_bias0"]),
                      vec(pr["prelu_alpha"]), vec(pr["rp_bias1"])], axis=0)  # (5, Cp)
    return vecs, wmat


def bbcu_down_constant(x_nchw, params, *, row_tile_target=32):
    """Pallas implementation. x_nchw: (B, C, H, W) float32 -> (B, C, H/2, W/2)."""
    B, C, H, W = x_nchw.shape
    assert H % 2 == 0 and W % 2 == 0
    Hh, Wh = H // 2, W // 2
    Cp = ((C + LANES - 1) // LANES) * LANES   # lane-dense channel axis

    # JAX glue (parameter setup + pool/pad; one fused XLA pass each):
    pooled = x_nchw.astype(jnp.float32).reshape(B, C, Hh, 2, Wh, 2).mean(axis=(3, 5))
    p = jnp.transpose(pooled, (0, 2, 3, 1))                                # NHWC
    p_pad = jnp.pad(p, ((0, 0), (PAD, PAD), (PAD, PAD), (0, Cp - C)))      # (B,Hh+2,Wh+2,Cp)

    v1, w1 = _prep_branch(params["b1"], C, Cp)
    v2, w2 = _prep_branch(params["b2"], C, Cp)
    vecs = jnp.stack([v1, v2], axis=0)                                     # (2, 5, Cp)
    wmat = jnp.stack([w1, w2], axis=0)                                     # (2, 9*Cp, Cp)

    TH = _pick_row_tile(Hh, Wh, Cp, target=row_tile_target)
    nT = Hh // TH

    out_nhwc = pl.pallas_call(
        _bbcu_down_kernel,
        out_shape=jax.ShapeDtypeStruct((B, Hh, Wh, Cp), jnp.float32),
        grid_spec=pltpu.PrefetchScalarGridSpec(
            num_scalar_prefetch=0,
            grid=(B, nT),
            in_specs=[
                pl.BlockSpec(memory_space=pl.ANY),                      # padded pooled (HBM)
                pl.BlockSpec((2, 5, Cp), lambda b, i: (0, 0, 0)),       # per-branch vectors
                pl.BlockSpec((2, KSIZE * KSIZE * Cp, Cp),
                             lambda b, i: (0, 0, 0)),                   # binary weights
            ],
            out_specs=pl.BlockSpec((None, TH, Wh, Cp), lambda b, i: (b, i, 0, 0)),
            scratch_shapes=[
                pltpu.VMEM((2, TH + 2, Wh + 2, Cp), jnp.float32),       # double-buffered tile
                pltpu.VMEM((TH + 2, Wh + 2, Cp), jnp.bfloat16),         # padded activation
                pltpu.SemaphoreType.DMA((2,)),
            ]),
        compiler_params=pltpu.CompilerParams(
            dimension_semantics=("parallel", "arbitrary"),
            vmem_limit_bytes=48 * 1024 * 1024),
    )(p_pad, vecs, wmat)

    return jnp.transpose(out_nhwc[..., :C], (0, 3, 1, 2))                  # back to NCHW


# ---------------- pure-JAX reference (mirrors the PyTorch module) -------------
def _ref_branch(p_nchw, pr):
    C = p_nchw.shape[1]
    a = jnp.sign(p_nchw + pr["move_bias"].reshape(1, C, 1, 1))
    scale = jnp.mean(jnp.abs(pr["weight"]), axis=(1, 2, 3), keepdims=True)
    wb = scale * jnp.sign(pr["weight"])
    conv = lax.conv_general_dilated(a, wb, window_strides=(1, 1),
                                    padding=((PAD, PAD), (PAD, PAD)),
                                    dimension_numbers=("NCHW", "OIHW", "NCHW"))
    z = conv + pr["rp_bias0"].reshape(1, C, 1, 1)
    al = pr["prelu_alpha"].reshape(1, C, 1, 1)
    y = jnp.where(z >= 0.0, z, al * z) + pr["rp_bias1"].reshape(1, C, 1, 1)
    return y + p_nchw


def ref_forward(x_nchw, params):
    B, C, H, W = x_nchw.shape
    pooled = x_nchw.reshape(B, C, H // 2, 2, W // 2, 2).mean(axis=(3, 5))
    return _ref_branch(pooled, params["b1"]) + _ref_branch(pooled, params["b2"])


if __name__ == "__main__":
    key = jax.random.PRNGKey(0)
    B, C, H, W = 2, 8, 16, 16
    keys = jax.random.split(key, 11)
    x = jax.random.normal(keys[0], (B, C, H, W), jnp.float32)

    # Deterministic synthetic parameters (PyTorch init would be zeros / 0.25;
    # small random values are used so every op path is exercised).
    def branch_params(ks):
        return dict(
            move_bias=0.1 * jax.random.normal(ks[0], (C,), jnp.float32),
            weight=0.2 * jax.random.normal(ks[1], (C, C, KSIZE, KSIZE), jnp.float32),
            rp_bias0=0.1 * jax.random.normal(ks[2], (C,), jnp.float32),
            prelu_alpha=0.25 * jnp.ones((C,), jnp.float32)
                        + 0.05 * jax.random.normal(ks[3], (C,), jnp.float32),
            rp_bias1=0.1 * jax.random.normal(ks[4], (C,), jnp.float32),
        )

    params = dict(b1=branch_params(keys[1:6]), b2=branch_params(keys[6:11]))

    out = jax.block_until_ready(bbcu_down_constant(x, params))
    ref = jax.block_until_ready(ref_forward(x, params))
    assert out.shape == (B, C, H // 2, W // 2)
    np.testing.assert_allclose(np.asarray(out), np.asarray(ref), rtol=1e-4, atol=1e-4)
    print("KERNEL_OK")
</pallas_src>

<mosaic_0001>
module attributes {stable_mosaic.version = 11 : i64} {
  func.func @_bbcu_down_kernel(%arg0: i32, %arg1: i32, %arg2: memref<2x10x10x128xf32, #tpu.memory_space<any>>, %arg3: memref<2x5x128xf32, #tpu.memory_space<vmem>>, %arg4: memref<2x1152x128xbf16, #tpu.memory_space<vmem>>, %arg5: memref<1x8x8x128xf32, #tpu.memory_space<vmem>>, %arg6: memref<2x10x10x128xf32, #tpu.memory_space<vmem>>, %arg7: memref<10x10x128xbf16, #tpu.memory_space<vmem>>, %arg8: memref<2x!tpu.dma_semaphore, #tpu.memory_space<semaphore_mem>>) attributes {dimension_semantics = [#tpu.dimension_semantics<parallel>, #tpu.dimension_semantics<arbitrary>], iteration_bounds = array<i64: 2, 1>, scalar_prefetch = 0 : i64, scratch_operands = 3 : i64, tpu.core_type = #tpu.core_type<tc>, window_params = [{}, {pipeline_mode = #tpu.pipeline_mode<synchronous>, transform_indices = @transform_1, window_bounds = array<i64: 2, 5, 128>}, {pipeline_mode = #tpu.pipeline_mode<synchronous>, transform_indices = @transform_2, window_bounds = array<i64: 2, 1152, 128>}, {transform_indices = @transform_3, window_bounds = array<i64: 1, 8, 8, 128>}]} {
    %c2_i32 = arith.constant 2 : i32
    %c0_i32 = arith.constant 0 : i32
    %0 = arith.cmpi eq, %c2_i32, %c0_i32 : i32
    %c1_i32 = arith.constant 1 : i32
    %1 = arith.select %0, %c1_i32, %c2_i32 : i32
    %2 = arith.remsi %arg1, %1 : i32
    %c0_i32_0 = arith.constant 0 : i32
    %3 = arith.cmpi ne, %2, %c0_i32_0 : i32
    %c0_i32_1 = arith.constant 0 : i32
    %4 = arith.cmpi slt, %2, %c0_i32_1 : i32
    %c0_i32_2 = arith.constant 0 : i32
    %5 = arith.cmpi slt, %1, %c0_i32_2 : i32
    %6 = arith.xori %4, %5 : i1
    %7 = arith.andi %6, %3 : i1
    %8 = arith.addi %2, %1 : i32
    %9 = arith.select %7, %8, %2 : i32
    %c0_i32_3 = arith.constant 0 : i32
    %10 = arith.cmpi eq, %arg1, %c0_i32_3 : i32
    %11 = arith.extui %10 : i1 to i32
    %c0_i32_4 = arith.constant 0 : i32
    %12 = arith.cmpi ne, %11, %c0_i32_4 : i32
    scf.if %12 {
      %cst_63 = arith.constant 0.000000e+00 : bf16
      %153 = vector.broadcast %cst_63 : bf16 to vector<10x10x128xbf16>
      %c0_64 = arith.constant 0 : index
      %c0_65 = arith.constant 0 : index
      %c0_66 = arith.constant 0 : index
      %154 = vector.load %arg7[%c0_64, %c0_65, %c0_66] : memref<10x10x128xbf16, #tpu.memory_space<vmem>>, vector<10x10x128xbf16>
      tpu.vector_store %arg7[%c0_64, %c0_65, %c0_66], %153 {strides = array<i32>} : memref<10x10x128xbf16, #tpu.memory_space<vmem>>, vector<10x10x128xbf16>,
      %c8_i32_67 = arith.constant 8 : i32
      %155 = arith.muli %arg1, %c8_i32_67 : i32
      %156 = tpu.assume_multiple %155, 8 : i32
      %c0_i32_68 = arith.constant 0 : i32
      %c0_i32_69 = arith.constant 0 : i32
      %157 = tpu.memref_slice %arg2[%arg0, %156, %c0_i32_68, %c0_i32_69] : memref<2x10x10x128xf32, #tpu.memory_space<any>> -> memref<1x10x10x128xf32, #tpu.memory_space<any>>
      %158 = tpu.memref_squeeze %157 : memref<1x10x10x128xf32, #tpu.memory_space<any>> -> memref<10x10x128xf32, #tpu.memory_space<any>>
      %c0_i32_70 = arith.constant 0 : i32
      %c0_i32_71 = arith.constant 0 : i32
      %c0_i32_72 = arith.constant 0 : i32
      %159 = tpu.memref_slice %arg6[%9, %c0_i32_70, %c0_i32_71, %c0_i32_72] : memref<2x10x10x128xf32, #tpu.memory_space<vmem>> -> memref<1x10x10x128xf32, #tpu.memory_space<vmem>>
      %160 = tpu.memref_squeeze %159 : memref<1x10x10x128xf32, #tpu.memory_space<vmem>> -> memref<10x10x128xf32, #tpu.memory_space<vmem>>
      %161 = tpu.memref_slice %arg8[%9] : memref<2x!tpu.dma_semaphore, #tpu.memory_space<semaphore_mem>> -> memref<1x!tpu.dma_semaphore, #tpu.memory_space<semaphore_mem>>
      %162 = tpu.memref_squeeze %161 : memref<1x!tpu.dma_semaphore, #tpu.memory_space<semaphore_mem>> -> memref<!tpu.dma_semaphore, #tpu.memory_space<semaphore_mem>>
      tpu.enqueue_dma source(%158 : memref<10x10x128xf32, #tpu.memory_space<any>>) target(%160 : memref<10x10x128xf32, #tpu.memory_space<vmem>>) target_semaphore(%162 : memref<!tpu.dma_semaphore, #tpu.memory_space<semaphore_mem>>)
    } else {
    }
    %c1_i32_5 = arith.constant 1 : i32
    %13 = arith.addi %arg1, %c1_i32_5 : i32
    %c1_i32_6 = arith.constant 1 : i32
    %14 = arith.cmpi slt, %13, %c1_i32_6 : i32
    %15 = arith.extui %14 : i1 to i32
    %c0_i32_7 = arith.constant 0 : i32
    %16 = arith.cmpi ne, %15, %c0_i32_7 : i32
    scf.if %16 {
      %c1_i32_63 = arith.constant 1 : i32
      %153 = arith.addi %arg1, %c1_i32_63 : i32
      %c1_i32_64 = arith.constant 1 : i32
      %154 = arith.subi %c1_i32_64, %9 : i32
      %c8_i32_65 = arith.constant 8 : i32
      %155 = arith.muli %153, %c8_i32_65 : i32
      %156 = tpu.assume_multiple %155, 8 : i32
      %c0_i32_66 = arith.constant 0 : i32
      %c0_i32_67 = arith.constant 0 : i32
      %157 = tpu.memref_slice %arg2[%arg0, %156, %c0_i32_66, %c0_i32_67] : memref<2x10x10x128xf32, #tpu.memory_space<any>> -> memref<1x10x10x128xf32, #tpu.memory_space<any>>
      %158 = tpu.memref_squeeze %157 : memref<1x10x10x128xf32, #tpu.memory_space<any>> -> memref<10x10x128xf32, #tpu.memory_space<any>>
      %c0_i32_68 = arith.constant 0 : i32
      %c0_i32_69 = arith.constant 0 : i32
      %c0_i32_70 = arith.constant 0 : i32
      %159 = tpu.memref_slice %arg6[%154, %c0_i32_68, %c0_i32_69, %c0_i32_70] : memref<2x10x10x128xf32, #tpu.memory_space<vmem>> -> memref<1x10x10x128xf32, #tpu.memory_space<vmem>>
      %160 = tpu.memref_squeeze %159 : memref<1x10x10x128xf32, #tpu.memory_space<vmem>> -> memref<10x10x128xf32, #tpu.memory_space<vmem>>
      %161 = tpu.memref_slice %arg8[%154] : memref<2x!tpu.dma_semaphore, #tpu.memory_space<semaphore_mem>> -> memref<1x!tpu.dma_semaphore, #tpu.memory_space<semaphore_mem>>
      %162 = tpu.memref_squeeze %161 : memref<1x!tpu.dma_semaphore, #tpu.memory_space<semaphore_mem>> -> memref<!tpu.dma_semaphore, #tpu.memory_space<semaphore_mem>>
      tpu.enqueue_dma source(%158 : memref<10x10x128xf32, #tpu.memory_space<any>>) target(%160 : memref<10x10x128xf32, #tpu.memory_space<vmem>>) target_semaphore(%162 : memref<!tpu.dma_semaphore, #tpu.memory_space<semaphore_mem>>)
    } else {
    }
    %c8_i32 = arith.constant 8 : i32
    %17 = arith.muli %arg1, %c8_i32 : i32
    %18 = tpu.assume_multiple %17, 8 : i32
    %c0_i32_8 = arith.constant 0 : i32
    %c0_i32_9 = arith.constant 0 : i32
    %19 = tpu.memref_slice %arg2[%arg0, %18, %c0_i32_8, %c0_i32_9] : memref<2x10x10x128xf32, #tpu.memory_space<any>> -> memref<1x10x10x128xf32, #tpu.memory_space<any>>
    %20 = tpu.memref_squeeze %19 : memref<1x10x10x128xf32, #tpu.memory_space<any>> -> memref<10x10x128xf32, #tpu.memory_space<any>>
    %c0_i32_10 = arith.constant 0 : i32
    %c0_i32_11 = arith.constant 0 : i32
    %c0_i32_12 = arith.constant 0 : i32
    %21 = tpu.memref_slice %arg6[%9, %c0_i32_10, %c0_i32_11, %c0_i32_12] : memref<2x10x10x128xf32, #tpu.memory_space<vmem>> -> memref<1x10x10x128xf32, #tpu.memory_space<vmem>>
    %22 = tpu.memref_squeeze %21 : memref<1x10x10x128xf32, #tpu.memory_space<vmem>> -> memref<10x10x128xf32, #tpu.memory_space<vmem>>
    %23 = tpu.memref_slice %arg8[%9] : memref<2x!tpu.dma_semaphore, #tpu.memory_space<semaphore_mem>> -> memref<1x!tpu.dma_semaphore, #tpu.memory_space<semaphore_mem>>
    %24 = tpu.memref_squeeze %23 : memref<1x!tpu.dma_semaphore, #tpu.memory_space<semaphore_mem>> -> memref<!tpu.dma_semaphore, #tpu.memory_space<semaphore_mem>>
    tpu.wait_dma2 semaphore(%24 : memref<!tpu.dma_semaphore, #tpu.memory_space<semaphore_mem>>) src(%20 : memref<10x10x128xf32, #tpu.memory_space<any>>) dst(%22 : memref<10x10x128xf32, #tpu.memory_space<vmem>>)
    %25 = arith.index_cast %9 : i32 to index
    %c0 = arith.constant 0 : index
    %c0_13 = arith.constant 0 : index
    %c0_14 = arith.constant 0 : index
    %26 = vector.load %arg6[%25, %c0, %c0_13, %c0_14] : memref<2x10x10x128xf32, #tpu.memory_space<vmem>>, vector<1x10x10x128xf32>
    %27 = vector.shape_cast %26 : vector<1x10x10x128xf32> to vector<10x10x128xf32>
    %28 = vector.extract_strided_slice %27 {offsets = [1, 1, 0], sizes = [8, 8, 128], strides = [1, 1, 1]} : vector<10x10x128xf32> to vector<8x8x128xf32>
    %c0_15 = arith.constant 0 : index
    %c0_16 = arith.constant 0 : index
    %c0_17 = arith.constant 0 : index
    %29 = vector.load %arg3[%c0_15, %c0_16, %c0_17] : memref<2x5x128xf32, #tpu.memory_space<vmem>>, vector<1x5x128xf32>
    %30 = vector.shape_cast %29 : vector<1x5x128xf32> to vector<5x128xf32>
    %31 = vector.extract_strided_slice %30 {offsets = [0, 0], sizes = [1, 128], strides = [1, 1]} : vector<5x128xf32> to vector<1x128xf32>
    %32 = vector.extract_strided_slice %30 {offsets = [1, 0], sizes = [1, 128], strides = [1, 1]} : vector<5x128xf32> to vector<1x128xf32>
    %33 = vector.extract_strided_slice %30 {offsets = [2, 0], sizes = [1, 128], strides = [1, 1]} : vector<5x128xf32> to vector<1x128xf32>
    %34 = vector.extract_strided_slice %30 {offsets = [3, 0], sizes = [1, 128], strides = [1, 1]} : vector<5x128xf32> to vector<1x128xf32>
    %35 = vector.extract_strided_slice %30 {offsets = [4, 0], sizes = [1, 128], strides = [1, 1]} : vector<5x128xf32> to vector<1x128xf32>
    %36 = vector.extract_strided_slice %27 {offsets = [0, 1, 0], sizes = [10, 8, 128], strides = [1, 1, 1]} : vector<10x10x128xf32> to vector<10x8x128xf32>
    %37 = vector.shape_cast %31 : vector<1x128xf32> to vector<1x1x128xf32>
    %38 = vector.broadcast %37 : vector<1x1x128xf32> to vector<10x8x128xf32>
    %39 = arith.addf %36, %38 : vector<10x8x128xf32>
    %cst = arith.constant 0.000000e+00 : f32
    %40 = vector.broadcast %cst : f32 to vector<10x8x128xf32>
    %41 = arith.cmpf ogt, %39, %40 : vector<10x8x128xf32>
    %cst_18 = arith.constant 0.000000e+00 : f32
    %42 = vector.broadcast %cst_18 : f32 to vector<10x8x128xf32>
    %43 = arith.cmpf olt, %39, %42 : vector<10x8x128xf32>
    %cst_19 = arith.constant -1.000000e+00 : f32
    %cst_20 = arith.constant 0.000000e+00 : f32
    %44 = vector.broadcast %cst_19 : f32 to vector<10x8x128xf32>
    %45 = vector.broadcast %cst_20 : f32 to vector<10x8x128xf32>
    %46 = arith.select %43, %44, %45 : vector<10x8x128xi1>, vector<10x8x128xf32>
    %cst_21 = arith.constant 1.000000e+00 : f32
    %47 = vector.broadcast %cst_21 : f32 to vector<10x8x128xf32>
    %48 = arith.select %41, %47, %46 : vector<10x8x128xi1>, vector<10x8x128xf32>
    %49 = arith.truncf %48 : vector<10x8x128xf32> to vector<10x8x128xbf16>
    %c0_22 = arith.constant 0 : index
    %c1 = arith.constant 1 : index
    %c0_23 = arith.constant 0 : index
    %50 = vector.load %arg7[%c0_22, %c1, %c0_23] : memref<10x10x128xbf16, #tpu.memory_space<vmem>>, vector<10x8x128xbf16>
    tpu.vector_store %arg7[%c0_22, %c1, %c0_23], %49 {strides = array<i32>} : memref<10x10x128xbf16, #tpu.memory_space<vmem>>, vector<10x8x128xbf16>,
    %c0_i32_24 = arith.constant 0 : i32
    %51 = arith.cmpi eq, %arg1, %c0_i32_24 : i32
    %52 = arith.extui %51 : i1 to i32
    %c0_i32_25 = arith.constant 0 : i32
    %53 = arith.cmpi ne, %52, %c0_i32_25 : i32
    scf.if %53 {
      %cst_63 = arith.constant 0.000000e+00 : bf16
      %153 = vector.broadcast %cst_63 : bf16 to vector<8x128xbf16>
      %c0_64 = arith.constant 0 : index
      %c1_65 = arith.constant 1 : index
      %c0_66 = arith.constant 0 : index
      %154 = vector.load %arg7[%c0_64, %c1_65, %c0_66] : memref<10x10x128xbf16, #tpu.memory_space<vmem>>, vector<1x8x128xbf16>
      %155 = vector.shape_cast %154 : vector<1x8x128xbf16> to vector<8x128xbf16>
      %156 = vector.shape_cast %153 : vector<8x128xbf16> to vector<1x8x128xbf16>
      tpu.vector_store %arg7[%c0_64, %c1_65, %c0_66], %156 {strides = array<i32>} : memref<10x10x128xbf16, #tpu.memory_space<vmem>>, vector<1x8x128xbf16>,
    } else {
    }
    %c0_i32_26 = arith.constant 0 : i32
    %54 = arith.cmpi eq, %arg1, %c0_i32_26 : i32
    %55 = arith.extui %54 : i1 to i32
    %c0_i32_27 = arith.constant 0 : i32
    %56 = arith.cmpi ne, %55, %c0_i32_27 : i32
    scf.if %56 {
      %cst_63 = arith.constant 0.000000e+00 : bf16
      %153 = vector.broadcast %cst_63 : bf16 to vector<8x128xbf16>
      %c9 = arith.constant 9 : index
      %c1_64 = arith.constant 1 : index
      %c0_65 = arith.constant 0 : index
      %154 = vector.load %arg7[%c9, %c1_64, %c0_65] : memref<10x10x128xbf16, #tpu.memory_space<vmem>>, vector<1x8x128xbf16>
      %155 = vector.shape_cast %154 : vector<1x8x128xbf16> to vector<8x128xbf16>
      %156 = vector.shape_cast %153 : vector<8x128xbf16> to vector<1x8x128xbf16>
      tpu.vector_store %arg7[%c9, %c1_64, %c0_65], %156 {strides = array<i32>} : memref<10x10x128xbf16, #tpu.memory_space<vmem>>, vector<1x8x128xbf16>,
    } else {
    }
    %c0_28 = arith.constant 0 : index
    %c0_29 = arith.constant 0 : index
    %c0_30 = arith.constant 0 : index
    %57 = vector.load %arg7[%c0_28, %c0_29, %c0_30] : memref<10x10x128xbf16, #tpu.memory_space<vmem>>, vector<10x10x128xbf16>
    %58 = vector.extract_strided_slice %57 {offsets = [0, 0, 0], sizes = [8, 8, 128], strides = [1, 1, 1]} : vector<10x10x128xbf16> to vector<8x8x128xbf16>
    %59 = vector.extract_strided_slice %57 {offsets = [0, 1, 0], sizes = [8, 8, 128], strides = [1, 1, 1]} : vector<10x10x128xbf16> to vector<8x8x128xbf16>
    %60 = vector.extract_strided_slice %57 {offsets = [0, 2, 0], sizes = [8, 8, 128], strides = [1, 1, 1]} : vector<10x10x128xbf16> to vector<8x8x128xbf16>
    %61 = vector.extract_strided_slice %57 {offsets = [1, 0, 0], sizes = [8, 8, 128], strides = [1, 1, 1]} : vector<10x10x128xbf16> to vector<8x8x128xbf16>
    %62 = vector.extract_strided_slice %57 {offsets = [1, 1, 0], sizes = [8, 8, 128], strides = [1, 1, 1]} : vector<10x10x128xbf16> to vector<8x8x128xbf16>
    %63 = vector.extract_strided_slice %57 {offsets = [1, 2, 0], sizes = [8, 8, 128], strides = [1, 1, 1]} : vector<10x10x128xbf16> to vector<8x8x128xbf16>
    %64 = vector.extract_strided_slice %57 {offsets = [2, 0, 0], sizes = [8, 8, 128], strides = [1, 1, 1]} : vector<10x10x128xbf16> to vector<8x8x128xbf16>
    %65 = vector.extract_strided_slice %57 {offsets = [2, 1, 0], sizes = [8, 8, 128], strides = [1, 1, 1]} : vector<10x10x128xbf16> to vector<8x8x128xbf16>
    %66 = vector.extract_strided_slice %57 {offsets = [2, 2, 0], sizes = [8, 8, 128], strides = [1, 1, 1]} : vector<10x10x128xbf16> to vector<8x8x128xbf16>
    %67 = tpu.concatenate %58, %59, %60, %61, %62, %63, %64, %65, %66 in 2 : vector<8x8x128xbf16>, vector<8x8x128xbf16>, vector<8x8x128xbf16>, vector<8x8x128xbf16>, vector<8x8x128xbf16>, vector<8x8x128xbf16>, vector<8x8x128xbf16>, vector<8x8x128xbf16>, vector<8x8x128xbf16> -> vector<8x8x1152xbf16>
    %68 = vector.shape_cast %67 : vector<8x8x1152xbf16> to vector<64x1152xbf16>
    %c0_31 = arith.constant 0 : index
    %c0_32 = arith.constant 0 : index
    %c0_33 = arith.constant 0 : index
    %69 = vector.load %arg4[%c0_31, %c0_32, %c0_33] : memref<2x1152x128xbf16, #tpu.memory_space<vmem>>, vector<1x1152x128xbf16>
    %70 = vector.shape_cast %69 : vector<1x1152x128xbf16> to vector<1152x128xbf16>
    %cst_34 = arith.constant dense<0.000000e+00> : vector<64x128xf32>
    %71 = tpu.matmul %68, %70, %cst_34 {dimension_numbers = #tpu.dot_dimension_numbers<[1], [0], [0], [1], [0, 0, 1, 1], [], []>} : vector<64x1152xbf16>, vector<1152x128xbf16>, vector<64x128xf32> -> vector<64x128xf32>
    %72 = vector.shape_cast %71 : vector<64x128xf32> to vector<8x8x128xf32>
    %73 = vector.shape_cast %32 : vector<1x128xf32> to vector<1x1x128xf32>
    %74 = vector.broadcast %73 : vector<1x1x128xf32> to vector<8x8x128xf32>
    %75 = arith.mulf %72, %74 : vector<8x8x128xf32>
    %76 = vector.shape_cast %33 : vector<1x128xf32> to vector<1x1x128xf32>
    %77 = vector.broadcast %76 : vector<1x1x128xf32> to vector<8x8x128xf32>
    %78 = arith.addf %75, %77 : vector<8x8x128xf32>
    %cst_35 = arith.constant 0.000000e+00 : f32
    %79 = vector.broadcast %cst_35 : f32 to vector<8x8x128xf32>
    %80 = arith.cmpf oge, %78, %79 : vector<8x8x128xf32>
    %81 = vector.shape_cast %34 : vector<1x128xf32> to vector<1x1x128xf32>
    %82 = vector.broadcast %81 : vector<1x1x128xf32> to vector<8x8x128xf32>
    %83 = arith.mulf %82, %78 : vector<8x8x128xf32>
    %84 = arith.select %80, %78, %83 : vector<8x8x128xi1>, vector<8x8x128xf32>
    %85 = vector.shape_cast %35 : vector<1x128xf32> to vector<1x1x128xf32>
    %86 = vector.broadcast %85 : vector<1x1x128xf32> to vector<8x8x128xf32>
    %87 = arith.addf %84, %86 : vector<8x8x128xf32>
    %88 = arith.addf %87, %28 : vector<8x8x128xf32>
    %c1_36 = arith.constant 1 : index
    %c0_37 = arith.constant 0 : index
    %c0_38 = arith.constant 0 : index
    %89 = vector.load %arg3[%c1_36, %c0_37, %c0_38] : memref<2x5x128xf32, #tpu.memory_space<vmem>>, vector<1x5x128xf32>
    %90 = vector.shape_cast %89 : vector<1x5x128xf32> to vector<5x128xf32>
    %91 = vector.extract_strided_slice %90 {offsets = [0, 0], sizes = [1, 128], strides = [1, 1]} : vector<5x128xf32> to vector<1x128xf32>
    %92 = vector.extract_strided_slice %90 {offsets = [1, 0], sizes = [1, 128], strides = [1, 1]} : vector<5x128xf32> to vector<1x128xf32>
    %93 = vector.extract_strided_slice %90 {offsets = [2, 0], sizes = [1, 128], strides = [1, 1]} : vector<5x128xf32> to vector<1x128xf32>
    %94 = vector.extract_strided_slice %90 {offsets = [3, 0], sizes = [1, 128], strides = [1, 1]} : vector<5x128xf32> to vector<1x128xf32>
    %95 = vector.extract_strided_slice %90 {offsets = [4, 0], sizes = [1, 128], strides = [1, 1]} : vector<5x128xf32> to vector<1x128xf32>
    %96 = vector.extract_strided_slice %27 {offsets = [0, 1, 0], sizes = [10, 8, 128], strides = [1, 1, 1]} : vector<10x10x128xf32> to vector<10x8x128xf32>
    %97 = vector.shape_cast %91 : vector<1x128xf32> to vector<1x1x128xf32>
    %98 = vector.broadcast %97 : vector<1x1x128xf32> to vector<10x8x128xf32>
    %99 = arith.addf %96, %98 : vector<10x8x128xf32>
    %cst_39 = arith.constant 0.000000e+00 : f32
    %100 = vector.broadcast %cst_39 : f32 to vector<10x8x128xf32>
    %101 = arith.cmpf ogt, %99, %100 : vector<10x8x128xf32>
    %cst_40 = arith.constant 0.000000e+00 : f32
    %102 = vector.broadcast %cst_40 : f32 to vector<10x8x128xf32>
    %103 = arith.cmpf olt, %99, %102 : vector<10x8x128xf32>
    %cst_41 = arith.constant -1.000000e+00 : f32
    %cst_42 = arith.constant 0.000000e+00 : f32
    %104 = vector.broadcast %cst_41 : f32 to vector<10x8x128xf32>
    %105 = vector.broadcast %cst_42 : f32 to vector<10x8x128xf32>
    %106 = arith.select %103, %104, %105 : vector<10x8x128xi1>, vector<10x8x128xf32>
    %cst_43 = arith.constant 1.000000e+00 : f32
    %107 = vector.broadcast %cst_43 : f32 to vector<10x8x128xf32>
    %108 = arith.select %101, %107, %106 : vector<10x8x128xi1>, vector<10x8x128xf32>
    %109 = arith.truncf %108 : vector<10x8x128xf32> to vector<10x8x128xbf16>
    %c0_44 = arith.constant 0 : index
    %c1_45 = arith.constant 1 : index
    %c0_46 = arith.constant 0 : index
    %110 = vector.load %arg7[%c0_44, %c1_45, %c0_46] : memref<10x10x128xbf16, #tpu.memory_space<vmem>>, vector<10x8x128xbf16>
    tpu.vector_store %arg7[%c0_44, %c1_45, %c0_46], %109 {strides = array<i32>} : memref<10x10x128xbf16, #tpu.memory_space<vmem>>, vector<10x8x128xbf16>,
    %c0_i32_47 = arith.constant 0 : i32
    %111 = arith.cmpi eq, %arg1, %c0_i32_47 : i32
    %112 = arith.extui %111 : i1 to i32
    %c0_i32_48 = arith.constant 0 : i32
    %113 = arith.cmpi ne, %112, %c0_i32_48 : i32
    scf.if %113 {
      %cst_63 = arith.constant 0.000000e+00 : bf16
      %153 = vector.broadcast %cst_63 : bf16 to vector<8x128xbf16>
      %c0_64 = arith.constant 0 : index
      %c1_65 = arith.constant 1 : index
      %c0_66 = arith.constant 0 : index
      %154 = vector.load %arg7[%c0_64, %c1_65, %c0_66] : memref<10x10x128xbf16, #tpu.memory_space<vmem>>, vector<1x8x128xbf16>
      %155 = vector.shape_cast %154 : vector<1x8x128xbf16> to vector<8x128xbf16>
      %156 = vector.shape_cast %153 : vector<8x128xbf16> to vector<1x8x128xbf16>
      tpu.vector_store %arg7[%c0_64, %c1_65, %c0_66], %156 {strides = array<i32>} : memref<10x10x128xbf16, #tpu.memory_space<vmem>>, vector<1x8x128xbf16>,
    } else {
    }
    %c0_i32_49 = arith.constant 0 : i32
    %114 = arith.cmpi eq, %arg1, %c0_i32_49 : i32
    %115 = arith.extui %114 : i1 to i32
    %c0_i32_50 = arith.constant 0 : i32
    %116 = arith.cmpi ne, %115, %c0_i32_50 : i32
    scf.if %116 {
      %cst_63 = arith.constant 0.000000e+00 : bf16
      %153 = vector.broadcast %cst_63 : bf16 to vector<8x128xbf16>
      %c9 = arith.constant 9 : index
      %c1_64 = arith.constant 1 : index
      %c0_65 = arith.constant 0 : index
      %154 = vector.load %arg7[%c9, %c1_64, %c0_65] : memref<10x10x128xbf16, #tpu.memory_space<vmem>>, vector<1x8x128xbf16>
      %155 = vector.shape_cast %154 : vector<1x8x128xbf16> to vector<8x128xbf16>
      %156 = vector.shape_cast %153 : vector<8x128xbf16> to vector<1x8x128xbf16>
      tpu.vector_store %arg7[%c9, %c1_64, %c0_65], %156 {strides = array<i32>} : memref<10x10x128xbf16, #tpu.memory_space<vmem>>, vector<1x8x128xbf16>,
    } else {
    }
    %c0_51 = arith.constant 0 : index
    %c0_52 = arith.constant 0 : index
    %c0_53 = arith.constant 0 : index
    %117 = vector.load %arg7[%c0_51, %c0_52, %c0_53] : memref<10x10x128xbf16, #tpu.memory_space<vmem>>, vector<10x10x128xbf16>
    %118 = vector.extract_strided_slice %117 {offsets = [0, 0, 0], sizes = [8, 8, 128], strides = [1, 1, 1]} : vector<10x10x128xbf16> to vector<8x8x128xbf16>
    %119 = vector.extract_strided_slice %117 {offsets = [0, 1, 0], sizes = [8, 8, 128], strides = [1, 1, 1]} : vector<10x10x128xbf16> to vector<8x8x128xbf16>
    %120 = vector.extract_strided_slice %117 {offsets = [0, 2, 0], sizes = [8, 8, 128], strides = [1, 1, 1]} : vector<10x10x128xbf16> to vector<8x8x128xbf16>
    %121 = vector.extract_strided_slice %117 {offsets = [1, 0, 0], sizes = [8, 8, 128], strides = [1, 1, 1]} : vector<10x10x128xbf16> to vector<8x8x128xbf16>
    %122 = vector.extract_strided_slice %117 {offsets = [1, 1, 0], sizes = [8, 8, 128], strides = [1, 1, 1]} : vector<10x10x128xbf16> to vector<8x8x128xbf16>
    %123 = vector.extract_strided_slice %117 {offsets = [1, 2, 0], sizes = [8, 8, 128], strides = [1, 1, 1]} : vector<10x10x128xbf16> to vector<8x8x128xbf16>
    %124 = vector.extract_strided_slice %117 {offsets = [2, 0, 0], sizes = [8, 8, 128], strides = [1, 1, 1]} : vector<10x10x128xbf16> to vector<8x8x128xbf16>
    %125 = vector.extract_strided_slice %117 {offsets = [2, 1, 0], sizes = [8, 8, 128], strides = [1, 1, 1]} : vector<10x10x128xbf16> to vector<8x8x128xbf16>
    %126 = vector.extract_strided_slice %117 {offsets = [2, 2, 0], sizes = [8, 8, 128], strides = [1, 1, 1]} : vector<10x10x128xbf16> to vector<8x8x128xbf16>
    %127 = tpu.concatenate %118, %119, %120, %121, %122, %123, %124, %125, %126 in 2 : vector<8x8x128xbf16>, vector<8x8x128xbf16>, vector<8x8x128xbf16>, vector<8x8x128xbf16>, vector<8x8x128xbf16>, vector<8x8x128xbf16>, vector<8x8x128xbf16>, vector<8x8x128xbf16>, vector<8x8x128xbf16> -> vector<8x8x1152xbf16>
    %128 = vector.shape_cast %127 : vector<8x8x1152xbf16> to vector<64x1152xbf16>
    %c1_54 = arith.constant 1 : index
    %c0_55 = arith.constant 0 : index
    %c0_56 = arith.constant 0 : index
    %129 = vector.load %arg4[%c1_54, %c0_55, %c0_56] : memref<2x1152x128xbf16, #tpu.memory_space<vmem>>, vector<1x1152x128xbf16>
    %130 = vector.shape_cast %129 : vector<1x1152x128xbf16> to vector<1152x128xbf16>
    %cst_57 = arith.constant dense<0.000000e+00> : vector<64x128xf32>
    %131 = tpu.matmul %128, %130, %cst_57 {dimension_numbers = #tpu.dot_dimension_numbers<[1], [0], [0], [1], [0, 0, 1, 1], [], []>} : vector<64x1152xbf16>, vector<1152x128xbf16>, vector<64x128xf32> -> vector<64x128xf32>
    %132 = vector.shape_cast %131 : vector<64x128xf32> to vector<8x8x128xf32>
    %133 = vector.shape_cast %92 : vector<1x128xf32> to vector<1x1x128xf32>
    %134 = vector.broadcast %133 : vector<1x1x128xf32> to vector<8x8x128xf32>
    %135 = arith.mulf %132, %134 : vector<8x8x128xf32>
    %136 = vector.shape_cast %93 : vector<1x128xf32> to vector<1x1x128xf32>
    %137 = vector.broadcast %136 : vector<1x1x128xf32> to vector<8x8x128xf32>
    %138 = arith.addf %135, %137 : vector<8x8x128xf32>
    %cst_58 = arith.constant 0.000000e+00 : f32
    %139 = vector.broadcast %cst_58 : f32 to vector<8x8x128xf32>
    %140 = arith.cmpf oge, %138, %139 : vector<8x8x128xf32>
    %141 = vector.shape_cast %94 : vector<1x128xf32> to vector<1x1x128xf32>
    %142 = vector.broadcast %141 : vector<1x1x128xf32> to vector<8x8x128xf32>
    %143 = arith.mulf %142, %138 : vector<8x8x128xf32>
    %144 = arith.select %140, %138, %143 : vector<8x8x128xi1>, vector<8x8x128xf32>
    %145 = vector.shape_cast %95 : vector<1x128xf32> to vector<1x1x128xf32>
    %146 = vector.broadcast %145 : vector<1x1x128xf32> to vector<8x8x128xf32>
    %147 = arith.addf %144, %146 : vector<8x8x128xf32>
    %148 = arith.addf %147, %28 : vector<8x8x128xf32>
    %149 = arith.addf %88, %148 : vector<8x8x128xf32>
    %c0_59 = arith.constant 0 : index
    %c0_60 = arith.constant 0 : index
    %c0_61 = arith.constant 0 : index
    %c0_62 = arith.constant 0 : index
    %150 = vector.load %arg5[%c0_59, %c0_60, %c0_61, %c0_62] : memref<1x8x8x128xf32, #tpu.memory_space<vmem>>, vector<1x8x8x128xf32>
    %151 = vector.shape_cast %150 : vector<1x8x8x128xf32> to vector<8x8x128xf32>
    %152 = vector.shape_cast %149 : vector<8x8x128xf32> to vector<1x8x8x128xf32>
    tpu.vector_store %arg5[%c0_59, %c0_60, %c0_61, %c0_62], %152 {strides = array<i32>} : memref<1x8x8x128xf32, #tpu.memory_space<vmem>>, vector<1x8x8x128xf32>,
    return
  }
  func.func @transform_1(%arg0: i32, %arg1: i32) -> (i32, i32, i32) {
    %c0_i32 = arith.constant 0 : i32
    %c0_i32_0 = arith.constant 0 : i32
    %c0_i32_1 = arith.constant 0 : i32
    %c0_i32_2 = arith.constant 0 : i32
    return %c0_i32, %c0_i32_0, %c0_i32_1 : i32, i32, i32
  }
  func.func @transform_2(%arg0: i32, %arg1: i32) -> (i32, i32, i32) {
    %c0_i32 = arith.constant 0 : i32
    %c0_i32_0 = arith.constant 0 : i32
    %c0_i32_1 = arith.constant 0 : i32
    %c0_i32_2 = arith.constant 0 : i32
    return %c0_i32, %c0_i32_0, %c0_i32_1 : i32, i32, i32
  }
  func.func @transform_3(%arg0: i32, %arg1: i32) -> (i32, i32, i32, i32) {
    %c0_i32 = arith.constant 0 : i32
    %c0_i32_0 = arith.constant 0 : i32
    %c0_i32_1 = arith.constant 0 : i32
    return %arg0, %arg1, %c0_i32, %c0_i32_0 : i32, i32, i32, i32
  }
}

</mosaic_0001>

<bundles_post_ra>
// kernel: tpu_custom_call.1
= control target key start
LH: loop header
LB: loop body
LE: loop exit
PB: predicated region body
PF: predicated region fallthrough
CT: control target
= control target key end

     0   :  { %8 = vsyncpa [#allocation6], 0  ;;  %s5871_s0 = inlined_call_operand.vmem [shape: f32[2,10,10,128], index: 0, kind: input, shape index: {}]   ;;  %s5872_s1 = inlined_call_operand.vmem [shape: f32[2,5,128], index: 1, kind: input, shape index: {}]   ;;  %s5873_s2 = inlined_call_operand.hbm [shape: bf16[2,1152,128], index: 2, kind: input, shape index: {}]   ;;  %s5874_s3 = inlined_call_operand.hbm [shape: f32[2,8,8,128], index: 3, kind: output, shape index: {}]  }
   0x1   :  { %9 = vsyncpa [#allocation7], 0 }
   0x2   :  { %11 = vsyncpa [#allocation7 + $0x1], 0  ;;  %s4785_s12 = smov 0   ;;  %s4787_s13 = smov 0  }
   0x3   :  { %s4789_s14 = smov 0   ;;  %s4791_s15 = smov 0  }
   0x4   :  { %s4793_s16 = smov 0   ;;  %s4795_s17 = smov 0  }
   0x5 LB: > { %s3593_s18 = sadd.s32 4294967295, %s4755_s17   ;;  %s3594_s19 = sadd.s32 4294967294, %s4755_s17   ;;  %s4755_s17 = sphi %s4795_s17, %s17_s17   ;;  %s4751_s16 = sphi %s4793_s16, %s5896_s16   ;;  %s4747_s15 = sphi %s4791_s15, %s5895_s15   ;;  %s4743_s14 = sphi %s4789_s14, %s5894_s14   ;;  %s4739_s13 = sphi %s4787_s13, %s5893_s13   ;;  %s4735_s12 = sphi %s4785_s12, %s5892_s12  }
   0x6   : > { %s29_s20 = sadd.s32 1, %s4751_s16  ;;  %s80_s21 = sadd.s32 1, %s4743_s14 }
   0x7   : > { %p31_p0 = scmp.ge.s32.totalorder %s29_s20, 2  ;;  %p90_p1 = scmp.ne.s32.totalorder %s4743_s14, %s4739_s13 }
   0x8   : > { %p91_p2 = scmp.eq.s32.totalorder %s3593_s18, 1  ;;  %p96_p3 = scmp.ne.s32.totalorder %s4739_s13, %s4735_s12 }
   0x9   : > { %s5898_s20 = smov (%p31_p0, %s29_s20), 0  ;;  %p97_p5 = scmp.eq.s32.totalorder %s3594_s19, 1 }
   0xa   : > { %p4825_p4 = por %p91_p2, %p90_p1  ;;  %s75_s23 = ssub.s32 %s4751_s16, %s5898_s20 }
   0xb   : > { %p3595_p6 = scmp.ge.s32.totalorder %s4755_s17, 1  ;;  %p78_p7 = scmp.eq.s32.totalorder %s75_s23, 0 }
   0xc   : > { %s5879_s22 = scalar_select %p4825_p4, 1, 0 }
   0xd   : > { %p4832_p8 = por %p97_p5, %p96_p3  ;;  %p104_p9 = scmp.lt.s32.totalorder %s4755_s17, 3 }
   0xe   : > { %s4838_s25 = scalar_select %p78_p7, %s4743_s14, %s80_s21  }
   0xf   : > { %s5880_s24 = scalar_select %p4832_p8, 1, 0 }
  0x10   : > { %p4840_p10 = pnand %p3595_p6, %p104_p9  ;;  %p4844_p11 = scmp.eq.s32.totalorder %s3593_s18, 0 }
  0x11   : > { %s4757_s28 = smov [#allocation5]   ;;  %s4643_s6 = scalar_lea.hbm %s5873_s2, 18432 }
  0x12   : > { %s5881_s26 = scalar_select %p4840_p10, 1, 0 }
  0x13   : > { %s5882_s27 = scalar_select %p4844_p11, 1, 0 }
  0x14   : > { %p4387_p12 = pneg %p4840_p10  ;;  %s119_s29 = sshll.u32 %s4757_s28, 4  ;;  %s120_s29 = int_to_ptr.vmem [resolvable:$true] %s119_s29 }
  0x15   : > { %p4644_p0 = scmp.ne.s32.totalorder %s5873_s2, %s4643_s6  ;;  %p4650_p5 = scmp.lt.u32.totalorder %s4643_s6, %s5873_s2 }
  0x16   : > { %p4852_p13 = pnand %p4844_p11, %p4387_p12 }
  0x18   : > { %p4645_p1 = pneg %p4852_p13 }
  0x1a   : > { %p4646_p2 = pnand %p4645_p1, %p4644_p0 }
  0x1c   : > { %p4647_p3 = pneg %p4646_p2 }
  0x1e   : > { %p4652_p6 = pnand %p4650_p5, %p4647_p3 }
  0x20   : > { %4655 = shalt.err (!%p4652_p6)
}
  0x21   : > { %s4656_s11 = scalar_lea.vmem %s120_s29, 18432  ;;  %p4664_p8 = scmp.lt.s32.totalorder %s120_s29, %s120_s29 }
  0x22   : > { %p4657_p7 = scmp.ne.s32.totalorder %s120_s29, %s4656_s11  ;;  %p4665_p4 = scmp.lt.s32.totalorder %s4656_s11, %s4656_s11 }
  0x24   : > { %p4659_p9 = pnand %p4657_p7, %p4645_p1  ;;  %p4666_p11 = por %p4665_p4, %p4664_p8 }
  0x26   : > { %p4660_p12 = pneg %p4659_p9 }
  0x28   : > { %p4667_p10 = pnand %p4666_p11, %p4660_p12 }
  0x2a   : > { %4670 = shalt.err (!%p4667_p10)
}
  0x2b   : > { %s4758_s18 = smov 64   ;;  %s4759_s19 = smov 4  }
  0x2c   : > { %4390 = dma.hbm_to_vmem [thread:$0]  (!%p4852_p13), %s5873_s2, 18432, %s120_s29, [#allocation6], %s4758_s18, %s4758_s18, %s4759_s19  }
  0x2d   : > { %p5884_p0 = scmp.ne.s32.totalorder %s5881_s26, 0 }
  0x2e   : > { %p5885_p2 = scmp.ne.s32.totalorder (!%p5884_p0), %s5882_s27, 0 }
  0x2f   : > { %135 = sbr.rel (%p5884_p0) target bundleno = 559 (0x22f), region = 28 }
  0x36   : > { %4724 = dma.done.wait (%p5885_p2), [#allocation6], 18432  }
  0x37   : > { %4726 = vsyncadd (%p5885_p2), [#allocation6], 4294948864  ;;  %s149_s28 = sand.u32 1, %s4739_s13   ;;  %s192_s4 = smul.u32 160, %s4747_s15  ;;  %v4760_v0 = vmov 0  }
  0x38   : > { %s4882_s30 = sshll.u32 %s149_s28, 6  ;;  %170 = vst [vmem:[#allocation3] sm:$0xf] %v4760_v0  ;;  %171 = vst [vmem:[#allocation3 + $0x4] sm:$0x1] %v4760_v0 }
  0x39   : > { %172 = vst [vmem:[#allocation3 + $0x8] sm:$0xf] %v4760_v0  ;;  %173 = vst [vmem:[#allocation3 + $0xc] sm:$0x1] %v4760_v0  ;;  %s4887_s29 = scalar_lea.vmem %s5871_s0, %s192_s4  ;;  %s4910_s5 = scalar_lea.vmem [#allocation8], %s4882_s30 }
  0x3a   : > { %174 = vst [vmem:[#allocation3 + $0x10] sm:$0xf] %v4760_v0  ;;  %175 = vst [vmem:[#allocation3 + $0x14] sm:$0x1] %v4760_v0  ;;  %v253_v1 = vld [vmem:[%s4887_s29] sm:$0xff]  ;;  %v255_v2 = vld [vmem:[%s4887_s29 + $0x10] sm:$0xff] }
  0x3b   : > { %176 = vst [vmem:[#allocation3 + $0x18] sm:$0xf] %v4760_v0  ;;  %177 = vst [vmem:[#allocation3 + $0x1c] sm:$0x1] %v4760_v0  ;;  %v257_v3 = vld [vmem:[%s4887_s29 + $0x20] sm:$0xff]  ;;  %v259_v4 = vld [vmem:[%s4887_s29 + $0x30] sm:$0xff] }
  0x3c   : > { %178 = vst [vmem:[#allocation3 + $0x20] sm:$0xf] %v4760_v0  ;;  %179 = vst [vmem:[#allocation3 + $0x24] sm:$0x1] %v4760_v0  ;;  %v261_v5 = vld [vmem:[%s4887_s29 + $0x40] sm:$0xff]  ;;  %v263_v6 = vld [vmem:[%s4887_s29 + $0x50] sm:$0xff] }
  0x3d   : > { %180 = vst [vmem:[#allocation3 + $0x28] sm:$0xf] %v4760_v0  ;;  %181 = vst [vmem:[#allocation3 + $0x2c] sm:$0x1] %v4760_v0  ;;  %v265_v7 = vld [vmem:[%s4887_s29 + $0x60] sm:$0xff]  ;;  %v267_v8 = vld [vmem:[%s4887_s29 + $0x70] sm:$0xff] }
  0x3e   : > { %182 = vst [vmem:[#allocation3 + $0x30] sm:$0xf] %v4760_v0  ;;  %183 = vst [vmem:[#allocation3 + $0x34] sm:$0x1] %v4760_v0  ;;  %v269_v9 = vld [vmem:[%s4887_s29 + $0x80] sm:$0xff]  ;;  %v271_v10 = vld [vmem:[%s4887_s29 + $0x90] sm:$0xff] }
  0x3f   : > { %184 = vst [vmem:[#allocation3 + $0x38] sm:$0xf] %v4760_v0  ;;  %185 = vst [vmem:[#allocation3 + $0x3c] sm:$0x1] %v4760_v0  ;;  %v3600_v11 = vld [vmem:[%s4887_s29 + $0x8] sm:$0x3] }
  0x40   : > { %186 = vst [vmem:[#allocation3 + $0x40] sm:$0xf] %v4760_v0  ;;  %187 = vst [vmem:[#allocation3 + $0x44] sm:$0x1] %v4760_v0  ;;  %v3602_v12 = vld [vmem:[%s4887_s29 + $0x18] sm:$0x3] }
  0x41   : > { %188 = vst [vmem:[#allocation3 + $0x48] sm:$0xf] %v4760_v0  ;;  %189 = vst [vmem:[#allocation3 + $0x4c] sm:$0x1] %v4760_v0  ;;  %v3604_v13 = vld [vmem:[%s4887_s29 + $0x28] sm:$0x3] }
  0x42   : > { %254 = vst [vmem:[#allocation2] sm:$0xff] %v253_v1  ;;  %256 = vst [vmem:[#allocation2 + $0x10] sm:$0xff] %v255_v2  ;;  %v3606_v14 = vld [vmem:[%s4887_s29 + $0x38] sm:$0x3]  ;;  %v3608_v15 = vld [vmem:[%s4887_s29 + $0x48] sm:$0x3] }
  0x43   : > { %258 = vst [vmem:[#allocation2 + $0x20] sm:$0xff] %v257_v3  ;;  %260 = vst [vmem:[#allocation2 + $0x30] sm:$0xff] %v259_v4  ;;  %v3610_v16 = vld [vmem:[%s4887_s29 + $0x58] sm:$0x3]  ;;  %v3612_v17 = vld [vmem:[%s4887_s29 + $0x68] sm:$0x3] }
  0x44   : > { %262 = vst [vmem:[#allocation2 + $0x40] sm:$0xff] %v261_v5  ;;  %264 = vst [vmem:[#allocation2 + $0x50] sm:$0xff] %v263_v6  ;;  %v3614_v18 = vld [vmem:[%s4887_s29 + $0x78] sm:$0x3]  ;;  %v3616_v19 = vld [vmem:[%s4887_s29 + $0x88] sm:$0x3] }
  0x45   : > { %266 = vst [vmem:[#allocation2 + $0x60] sm:$0xff] %v265_v7  ;;  %268 = vst [vmem:[#allocation2 + $0x70] sm:$0xff] %v267_v8  ;;  %v3618_v20 = vld [vmem:[%s4887_s29 + $0x98] sm:$0x3] }
  0x46   : > { %270 = vst [vmem:[#allocation2 + $0x80] sm:$0xff] %v269_v9  ;;  %272 = vst [vmem:[#allocation2 + $0x90] sm:$0xff] %v271_v10 }
  0x47   : > { %3601 = vst [vmem:[#allocation2 + $0x8] sm:$0x3] %v3600_v11  ;;  %3603 = vst [vmem:[#allocation2 + $0x18] sm:$0x3] %v3602_v12 }
  0x48   : > { %3605 = vst [vmem:[#allocation2 + $0x28] sm:$0x3] %v3604_v13  ;;  %3607 = vst [vmem:[#allocation2 + $0x38] sm:$0x3] %v3606_v14 }
  0x49   : > { %3609 = vst [vmem:[#allocation2 + $0x48] sm:$0x3] %v3608_v15  ;;  %3611 = vst [vmem:[#allocation2 + $0x58] sm:$0x3] %v3610_v16 }
  0x4a   : > { %3613 = vst [vmem:[#allocation2 + $0x68] sm:$0x3] %v3612_v17  ;;  %3615 = vst [vmem:[#allocation2 + $0x78] sm:$0x3] %v3614_v18 }
  0x4b   : > { %3617 = vst [vmem:[#allocation2 + $0x88] sm:$0x3] %v3616_v19  ;;  %3619 = vst [vmem:[#allocation2 + $0x98] sm:$0x3] %v3618_v20 }
  0x4c   : > { %305 = vsyncadd [#allocation4], 1600 }
  0x4d   : > { %4727 = dma.done.wait [#allocation4], 1600 }
  0x4e   : > { %4728 = vsyncadd [#allocation4], 4294965696  ;;  %v4453_v21 = vld [vmem:[#allocation5 + $0x40] sm:$0xff]   ;;  %v4457_v25 = vld [vmem:[#allocation5 + $0x48] sm:$0xff]   ;;  %v457_v45 = vlaneseq  ;;  %vm642_vm0 = vsmask.f32 7938 }
  0x4f   : > { %v4454_v22 = vld [vmem:[#allocation5] sm:$0xff]   ;;  %3989 = vmatprep.subr.bf16.mxu0 %v4453_v21  ;;  %v4458_v26 = vld [vmem:[#allocation5 + $0x8] sm:$0xff]   ;;  %v4461_v29 = vld [vmem:[#allocation5 + $0x50] sm:$0xff]   ;;  %vm641_vm1 = vcmask 1043456   ;;  %vm647_vm2 = vcmask 1040384   ;;  %v4761_v10 = vmov 0.0  }
  0x50   : > { %v4455_v23 = vld [vmem:[#allocation5 + $0xc0] sm:$0xff]   ;;  %3990 = vmatpush3.bf16.msra.mxu0 %v4454_v22  ;;  %v4459_v27 = vld [vmem:[#allocation5 + $0xc8] sm:$0xff]   ;;  %v4462_v30 = vld [vmem:[#allocation5 + $0x10] sm:$0xff]   ;;  %v4912_v50 = vshrl.u32 %v457_v45, 7  ;;  %vm648_vm3 = vsmask.f32 256 }
  0x51   : > { %v4456_v24 = vld [vmem:[#allocation5 + $0x80] sm:$0xff]   ;;  %4029 = vmatprep.subr.bf16.mxu1 %v4455_v23  ;;  %3991 = vmatprep.subr.bf16.mxu0 %v4457_v25  ;;  %v4460_v28 = vld [vmem:[#allocation5 + $0x88] sm:$0xff]   ;;  %v4463_v31 = vld [vmem:[#allocation5 + $0xd0] sm:$0xff]   ;;  %s3988_s21 = sshll.u32 %s4747_s15, 10  ;;  %s3460_s23 = sshll.u32 %s4910_s5, 4  ;;  %s5819_s23 = int_to_ptr.vmem [resolvable:$true] %s3460_s23 }
  0x52   : > { %4030 = vmatpush3.bf16.msra.mxu1 %v4456_v24  ;;  %v4464_v32 = vld [vmem:[#allocation5 + $0x90] sm:$0xff]   ;;  %v4465_v33 = vld [vmem:[#allocation5 + $0x58] sm:$0xff]   ;;  %v4469_v37 = vld [vmem:[#allocation5 + $0x60] sm:$0xff]   ;;  %v459_v55 = vsub.s32 0, %v4912_v50  ;;  %s5817_s26 = scalar_lea.hbm %s5874_s3, %s3988_s21  ;;  %s5825_s15 = scalar_lea.sflag [#allocation7], %s149_s28 }
  0x53   : > { %4031 = vmatprep.subr.bf16.mxu1 %v4459_v27  ;;  %v4466_v34 = vld [vmem:[#allocation5 + $0x18] sm:$0xff]   ;;  %v4470_v38 = vld [vmem:[#allocation5 + $0x20] sm:$0xff]   ;;  %v4473_v41 = vld [vmem:[#allocation5 + $0x68] sm:$0xff]   ;;  %s4671_s27 = scalar_lea.vmem %s5819_s23, 1024  ;;  %p5890_p8 = scmp.ne.s32.totalorder %s5879_s22, 0 }
  0x54   : > { %3992 = vmatpush3.bf16.msra.mxu0 %v4458_v26  ;;  %v4467_v35 = vld [vmem:[#allocation5 + $0xd8] sm:$0xff]   ;;  %v4471_v39 = vld [vmem:[#allocation5 + $0xe0] sm:$0xff]   ;;  %v4474_v42 = vld [vmem:[#allocation5 + $0x28] sm:$0xff]   ;;  %p4672_p4 = scmp.ne.s32.totalorder %s5819_s23, %s4671_s27  ;;  %s4762_s29 = smov [#allocation8]  }
  0x55   : > { %3993 = vmatprep.subr.bf16.mxu0 %v4461_v29  ;;  %v4468_v36 = vld [vmem:[#allocation5 + $0x98] sm:$0xff]   ;;  %v4472_v40 = vld [vmem:[#allocation5 + $0xa0] sm:$0xff]   ;;  %v4475_v43 = vld [vmem:[#allocation5 + $0xe8] sm:$0xff]   ;;  %s4675_s6 = sshll.u32 %s4762_s29, 4  ;;  %s4676_s6 = int_to_ptr.vmem [resolvable:$false] %s4675_s6 }
  0x56   : > { %4032 = vmatpush3.bf16.msra.mxu1 %v4460_v28  ;;  %v4476_v44 = vld [vmem:[#allocation5 + $0xa8] sm:$0xff]   ;;  %v4477_v46 = vld [vmem:[#allocation5 + $0x70] sm:$0xff]   ;;  %v4481_v51 = vld [vmem:[#allocation5 + $0x78] sm:$0xff]   ;;  %p4673_p10 = pnand %p4672_p4, %p5890_p8  ;;  %s4677_s7 = scalar_lea.vmem %s4676_s6, 2048 }
  0x57   : > { %4033 = vmatprep.subr.bf16.mxu1 %v4463_v31  ;;  %v4478_v47 = vld [vmem:[#allocation5 + $0x30] sm:$0xff]   ;;  %v4482_v52 = vld [vmem:[#allocation5 + $0x38] sm:$0xff]   ;;  %v4919_v58 = vld [vmem:[#allocation2 + $0x10] sm:$0xff]  ;;  %p4678_p13 = scmp.lt.s32.totalorder %s5819_s23, %s4676_s6  ;;  %p4679_p1 = scmp.lt.s32.totalorder %s4677_s7, %s4671_s27 }
  0x58   : > { %3994 = vmatpush3.bf16.msra.mxu0 %v4462_v30  ;;  %v4479_v48 = vld [vmem:[#allocation5 + $0xf0] sm:$0xff]   ;;  %v4483_v53 = vld [vmem:[#allocation5 + $0xf8] sm:$0xff]   ;;  %v4921_v59 = vld [vmem:[#allocation2 + $0x18] sm:$0x3]  ;;  %p4674_p11 = pneg %p4673_p10 }
  0x59   : > { %3995 = vmatprep.subr.bf16.mxu0 %v4465_v33  ;;  %v4480_v49 = vld [vmem:[#allocation5 + $0xb0] sm:$0xff]   ;;  %v4484_v54 = vld [vmem:[#allocation5 + $0xb8] sm:$0xff]   ;;  %v4488_v5 = vld [vmem:[#allocation5 + $0x140] sm:$0xff]   ;;  %p4680_p3 = por %p4679_p1, %p4678_p13 }
  0x5a   : > { %4034 = vmatpush3.bf16.msra.mxu1 %v4464_v32  ;;  %v4915_v56 = vld [vmem:[#allocation2] sm:$0xff]  ;;  %v4917_v57 = vld [vmem:[#allocation2 + $0x8] sm:$0x3]  ;;  %v4490_v9 = vld [vmem:[#allocation5 + $0x1c0] sm:$0xff]  }
  0x5b   : > { %4035 = vmatprep.subr.bf16.mxu1 %v4467_v35  ;;  %v456_v60 = vld [vmem:[%s5872_s1] sm:$0x1f]  ;;  %v4928_v62 = vld [vmem:[#allocation2 + $0x28] sm:$0x3]  ;;  %v656_v18 = vld [vmem:[#allocation3 + $0xc] sm:$0x1]  ;;  %p4681_p5 = pnand %p4680_p3, %p4674_p11 }
  0x5c   : > { %3996 = vmatpush3.bf16.msra.mxu0 %v4466_v34  ;;  %v4926_v61 = vld [vmem:[#allocation2 + $0x20] sm:$0xff]  ;;  %v4930_v63 = vrot.slane %v456_v60, %v459_v55  ;;  %v3811_v0 = vld [vmem:[%s5872_s1 + $0x8] sm:$0x1f]  ;;  %v659_v24 = vld [vmem:[#allocation3 + $0x10] sm:$0xf] }
  0x5d   : > { %3997 = vmatprep.subr.bf16.mxu0 %v4469_v37  ;;  %v4947_v8 = vrot.slane %v3811_v0, %v459_v55  ;;  %v644_v15 = vld [vmem:[#allocation3] sm:$0xf]  ;;  %v650_v16 = vld [vmem:[#allocation3 + $0x4] sm:$0x1]  ;;  %v653_v17 = vld [vmem:[#allocation3 + $0x8] sm:$0xf] }
  0x5e   : > { %4036 = vmatpush3.bf16.msra.mxu1 %v4468_v36  ;;  %v461_v1 = vadd.f32 %v4930_v63, %v4915_v56  ;;  %v462_v2 = vadd.f32 %v4930_v63, %v4917_v57  ;;  %v463_v3 = vadd.f32 %v4930_v63, %v4919_v58  ;;  %v464_v4 = vadd.f32 %v4930_v63, %v4921_v59  ;;  %v662_v34 = vld [vmem:[#allocation3 + $0x14] sm:$0x1]  ;;  %v4569_v29 = vld [vmem:[#allocation5 + $0x2d8] sm:$0xff]  }
  0x5f   : > { %4037 = vmatprep.subr.bf16.mxu1 %v4471_v39  ;;  %v465_v6 = vadd.f32 %v4930_v63, %v4926_v61  ;;  %v466_v7 = vadd.f32 %v4930_v63, %v4928_v62  ;;  %v1975_v37 = vadd.f32 %v4947_v8, %v4915_v56  ;;  %v1977_v45 = vadd.f32 %v4947_v8, %v4919_v58 }
  0x60   : > { %3998 = vmatpush3.bf16.msra.mxu0 %v4470_v38  ;;  %vm481_vm4 = vcmp.gt.f32.partialorder %v461_v1, 0.0  ;;  %vm482_vm5 = vcmp.gt.f32.partialorder %v462_v2, 0.0  ;;  %vm483_vm6 = vcmp.gt.f32.partialorder %v463_v3, 0.0  ;;  %vm484_vm7 = vcmp.gt.f32.partialorder %v464_v4, 0.0 }
  0x61   : > { %3999 = vmatprep.subr.bf16.mxu0 %v4473_v41  ;;  %vm485_vm8 = vcmp.gt.f32.partialorder %v465_v6, 0.0  ;;  %vm486_vm9 = vcmp.gt.f32.partialorder %v466_v7, 0.0  ;;  %vm501_vm10 = vcmp.lt.f32.partialorder %v461_v1, 0.0  ;;  %vm502_vm11 = vcmp.lt.f32.partialorder %v462_v2, 0.0 }
  0x62   : > { %4038 = vmatpush3.bf16.msra.mxu1 %v4472_v40  ;;  %vm503_vm12 = vcmp.lt.f32.partialorder %v463_v3, 0.0  ;;  %vm504_vm13 = vcmp.lt.f32.partialorder %v464_v4, 0.0  ;;  %vm505_vm14 = vcmp.lt.f32.partialorder %v465_v6, 0.0  ;;  %vm506_vm15 = vcmp.lt.f32.partialorder %v466_v7, 0.0 }
  0x63   : > { %4039 = vmatprep.subr.bf16.mxu1 %v4475_v43  ;;  %v521_v11 = vsel %vm501_vm10, -1.0, %v4761_v10  ;;  %v522_v12 = vsel %vm502_vm11, -1.0, %v4761_v10  ;;  %v523_v13 = vsel %vm503_vm12, -1.0, %v4761_v10  ;;  %v524_v14 = vsel %vm504_vm13, -1.0, %v4761_v10  ;;  %vm4959_vm10 = vmand %vm641_vm1, %vm642_vm0 }
  0x64   : > { %4000 = vmatpush3.bf16.msra.mxu0 %v4474_v42  ;;  %v525_v19 = vsel %vm505_vm14, -1.0, %v4761_v10  ;;  %v526_v20 = vsel %vm506_vm15, -1.0, %v4761_v10  ;;  %v541_v21 = vsel %vm481_vm4, 1.0, %v521_v11  ;;  %v542_v22 = vsel %vm482_vm5, 1.0, %v522_v12  ;;  %vm4969_vm4 = vmand %vm647_vm2, %vm648_vm3 }
  0x65   : > { %4001 = vmatprep.subr.bf16.mxu0 %v4477_v46  ;;  %v543_v25 = vsel %vm483_vm6, 1.0, %v523_v13  ;;  %v544_v26 = vsel %vm484_vm7, 1.0, %v524_v14  ;;  %v545_v27 = vsel %vm485_vm8, 1.0, %v525_v19  ;;  %v546_v28 = vsel %vm486_vm9, 1.0, %v526_v20 }
  0x66   : > { %4040 = vmatpush3.bf16.msra.mxu1 %v4476_v44  ;;  %v3948_v30 = vpack.c.bf16 %v541_v21, %v541_v21  ;;  %v3949_v31 = vpack.c.bf16 %v542_v22, %v542_v22  ;;  %v3950_v32 = vpack.c.bf16 %v543_v25, %v543_v25  ;;  %v3951_v33 = vpack.c.bf16 %v544_v26, %v544_v26 }
  0x67   : > { %4041 = vmatprep.subr.bf16.mxu1 %v4479_v48  ;;  %v3952_v35 = vpack.c.bf16 %v545_v27, %v545_v27  ;;  %v3953_v36 = vpack.c.bf16 %v546_v28, %v546_v28  ;;  %v1976_v38 = vadd.f32 %v4947_v8, %v4917_v57  ;;  %v1978_v46 = vadd.f32 %v4947_v8, %v4921_v59  ;;  %v5003_v57 = vld [vmem:[#allocation2 + $0x38] sm:$0x3] }
  0x68   : > { %4002 = vmatpush3.bf16.msra.mxu0 %v4478_v47  ;;  %v645_v39 = vsel %vm4959_vm10, %v3948_v30, %v644_v15  ;;  %v651_v40 = vsel %vm4969_vm4, %v3949_v31, %v650_v16  ;;  %v654_v41 = vsel %vm4959_vm10, %v3950_v32, %v653_v17  ;;  %v657_v42 = vsel %vm4969_vm4, %v3951_v33, %v656_v18  ;;  %v5045_v33 = vld [vmem:[#allocation2 + $0x40] sm:$0xff] }
  0x69   : > { %4003 = vmatprep.subr.bf16.mxu0 %v4481_v51  ;;  %646 = vst [vmem:[#allocation3] sm:$0xf] %v645_v39  ;;  %652 = vst [vmem:[#allocation3 + $0x4] sm:$0x1] %v651_v40  ;;  %v660_v43 = vsel %vm4959_vm10, %v3952_v35, %v659_v24  ;;  %v663_v44 = vsel %vm4969_vm4, %v3953_v36, %v662_v34  ;;  %v1979_v47 = vadd.f32 %v4947_v8, %v4926_v61  ;;  %v665_v40 = vld [vmem:[#allocation3 + $0x18] sm:$0xf] }
  0x6a   : > { %4042 = vmatpush3.bf16.msra.mxu1 %v4480_v49  ;;  %655 = vst [vmem:[#allocation3 + $0x8] sm:$0xf] %v654_v41  ;;  %658 = vst [vmem:[#allocation3 + $0xc] sm:$0x1] %v657_v42  ;;  %v1980_v48 = vadd.f32 %v4947_v8, %v4928_v62  ;;  %vm1995_vm0 = vcmp.gt.f32.partialorder %v1975_v37, 0.0  ;;  %vm1996_vm1 = vcmp.gt.f32.partialorder %v1976_v38, 0.0  ;;  %v468_v13 = vadd.f32 %v4930_v63, %v5003_v57 }
  0x6b   : > { %4043 = vmatprep.subr.bf16.mxu1 %v4483_v53  ;;  %661 = vst [vmem:[#allocation3 + $0x10] sm:$0xf] %v660_v43  ;;  %664 = vst [vmem:[#allocation3 + $0x14] sm:$0x1] %v663_v44  ;;  %vm1997_vm2 = vcmp.gt.f32.partialorder %v1977_v45, 0.0  ;;  %vm1998_vm3 = vcmp.gt.f32.partialorder %v1978_v46, 0.0 }
  0x6c   : > { %4004 = vmatpush3.bf16.msra.mxu0 %v4482_v52  ;;  %vm2015_vm5 = vcmp.lt.f32.partialorder %v1975_v37, 0.0  ;;  %vm2016_vm6 = vcmp.lt.f32.partialorder %v1976_v38, 0.0  ;;  %vm1999_vm7 = vcmp.gt.f32.partialorder %v1979_v47, 0.0  ;;  %vm2000_vm8 = vcmp.gt.f32.partialorder %v1980_v48, 0.0  ;;  %v442_v52 = vld [vmem:[#allocation2 + $0x30] sm:$0xff] }
  0x6d   : > { %4069 = vmatprep.subr.bf16.mxu0 %v4488_v5  ;;  %vm2017_vm9 = vcmp.lt.f32.partialorder %v1977_v45, 0.0  ;;  %vm2018_vm11 = vcmp.lt.f32.partialorder %v1978_v46, 0.0  ;;  %vm2019_vm12 = vcmp.lt.f32.partialorder %v1979_v47, 0.0  ;;  %vm2020_vm13 = vcmp.lt.f32.partialorder %v1980_v48, 0.0  ;;  %v5053_v38 = vld [vmem:[#allocation2 + $0x48] sm:$0x3] }
  0x6e   : > { %4044 = vmatpush3.bf16.msra.mxu1 %v4484_v54  ;;  %v2035_v49 = vsel %vm2015_vm5, -1.0, %v4761_v10  ;;  %v2036_v51 = vsel %vm2016_vm6, -1.0, %v4761_v10  ;;  %v2037_v53 = vsel %vm2017_vm9, -1.0, %v4761_v10  ;;  %v2038_v54 = vsel %vm2018_vm11, -1.0, %v4761_v10 }
  0x6f   : > { %4109 = vmatprep.subr.bf16.mxu1 %v4490_v9  ;;  %v2039_v55 = vsel %vm2019_vm12, -1.0, %v4761_v10  ;;  %v2040_v56 = vsel %vm2020_vm13, -1.0, %v4761_v10  ;;  %v5006_v58 = vsel %vm1995_vm0, 1.0, %v2035_v49  ;;  %v5009_v59 = vsel %vm1996_vm1, 1.0, %v2036_v51 }
  0x70   : > { %v2057_v60 = vsel %vm1997_vm2, 1.0, %v2037_v53  ;;  %v2058_v61 = vsel %vm1998_vm3, 1.0, %v2038_v54  ;;  %v710_v62 = vld [vmem:[#allocation3] sm:$0xf]  ;;  %v713_v0 = vld [vmem:[#allocation3 + $0x4] sm:$0x1]  ;;  %v3968_v2 = vpack.c.bf16 %v5006_v58, %v5006_v58  ;;  %v3969_v3 = vpack.c.bf16 %v5009_v59, %v5009_v59 }
  0x71   : > { %v5013_v1 = vld [vmem:[#allocation3 + $0x8] sm:$0xf]  ;;  %v3970_v4 = vpack.c.bf16 %v2057_v60, %v2057_v60  ;;  %v3971_v5 = vpack.c.bf16 %v2058_v61, %v2058_v61  ;;  %v711_v6 = vsel %vm4959_vm10, 0, %v710_v62  ;;  %v714_v7 = vsel %vm4969_vm4, 0, %v713_v0  ;;  %v726_v9 = vld [vmem:[#allocation3 + $0xc] sm:$0x1] }
  0x72   : > { %v5023_v11 = vld [vmem:[#allocation3 + $0x10] sm:$0xf]  ;;  %v467_v12 = vadd.f32 %v4930_v63, %v442_v52  ;;  %712 = vst [vmem:[#allocation3] sm:$0xf] %v711_v6  ;;  %715 = vst [vmem:[#allocation3 + $0x4] sm:$0x1] %v714_v7  ;;  %v5029_v15 = vcombine.low %v5013_v1, %v726_v9  ;;  %v1981_v43 = vadd.f32 %v4947_v8, %v442_v52 }
  0x73   : > { %v728_v14 = vld [vmem:[#allocation3 + $0x14] sm:$0x1]  ;;  %v2059_v16 = vsel %vm1999_vm7, 1.0, %v2039_v55  ;;  %v2060_v17 = vsel %vm2000_vm8, 1.0, %v2040_v56  ;;  %v2160_v18 = vld [vmem:[#allocation3 + $0x8] sm:$0xf]  ;;  %v3715_v19 = vcombine.low %v5013_v1, %v5023_v11  ;;  %v1982_v54 = vadd.f32 %v4947_v8, %v5003_v57 }
  0x74   : > { %v5036_v20 = vcombine.low %v5023_v11, %v728_v14  ;;  %v3972_v21 = vpack.c.bf16 %v2059_v16, %v2059_v16  ;;  %v3973_v22 = vpack.c.bf16 %v2060_v17, %v2060_v17  ;;  %v2161_v24 = vsel %vm4959_vm10, %v3970_v4, %v2160_v18  ;;  %v2163_v25 = vld [vmem:[#allocation3 + $0xc] sm:$0x1]  ;;  %v2166_v26 = vld [vmem:[#allocation3 + $0x10] sm:$0xf]  ;;  %v2169_v27 = vld [vmem:[#allocation3 + $0x14] sm:$0x1] }
  0x75   : > { %v791_v28 = vshrl.u32 %v5029_v15, 16  ;;  %v793_v30 = vshll.u32 %v5029_v15, 16  ;;  %2162 = vst [vmem:[#allocation3 + $0x8] sm:$0xf] %v2161_v24  ;;  %v2164_v31 = vsel %vm4969_vm4, %v3971_v5, %v2163_v25  ;;  %1620 = vmatprep.mubr.bf16.mxu1 %v3715_v19  ;;  %v840_v32 = vrot.slane %v5029_v15, 1  ;;  %v4491_v60 = vld [vmem:[#allocation5 + $0x180] sm:$0xff]  }
  0x76   : > { %v798_v34 = vshrl.u32 %v5036_v20, 16  ;;  %v800_v35 = vshll.u32 %v5036_v20, 16  ;;  %2165 = vst [vmem:[#allocation3 + $0xc] sm:$0x1] %v2164_v31  ;;  %v2167_v36 = vsel %vm4959_vm10, %v3972_v21, %v2166_v26  ;;  %v2170_v37 = vsel %vm4969_vm4, %v3973_v22, %v2169_v27  ;;  %v668_v0 = vld [vmem:[#allocation3 + $0x1c] sm:$0x1] }
  0x77   : > { %v795_v39 = vrot.slane %v793_v30, 1  ;;  %2168 = vst [vmem:[#allocation3 + $0x10] sm:$0xf] %v2167_v36  ;;  %2171 = vst [vmem:[#allocation3 + $0x14] sm:$0x1] %v2170_v37  ;;  %vm487_vm14 = vcmp.gt.f32.partialorder %v467_v12, 0.0  ;;  %v469_v55 = vadd.f32 %v4930_v63, %v5045_v33  ;;  %v470_v59 = vadd.f32 %v4930_v63, %v5053_v38 }
  0x78   : > { %vm488_vm15 = vcmp.gt.f32.partialorder %v468_v13, 0.0  ;;  %vm507_vm0 = vcmp.lt.f32.partialorder %v467_v12, 0.0  ;;  %v802_v41 = vrot.slane %v800_v35, 1  ;;  %vm508_vm1 = vcmp.lt.f32.partialorder %v468_v13, 0.0  ;;  %v4489_v17 = vld [vmem:[#allocation5 + $0x100] sm:$0xff]   ;;  %v4495_v22 = vld [vmem:[#allocation5 + $0x188] sm:$0xff]  }
  0x79   : > { %v527_v42 = vsel %vm507_vm0, -1.0, %v4761_v10  ;;  %v5057_v44 = vor.u32 %v795_v39, %v791_v28  ;;  %v528_v45 = vsel %vm508_vm1, -1.0, %v4761_v10  ;;  %v5060_v47 = vld [vmem:[#allocation3] sm:$0xf]  ;;  %v724_v48 = vld [vmem:[#allocation3 + $0x4] sm:$0x1]  ;;  %v1983_v28 = vadd.f32 %v4947_v8, %v5045_v33 }
  0x7a   : > { %v547_v46 = vsel %vm487_vm14, 1.0, %v527_v42  ;;  %v5062_v49 = vor.u32 %v802_v41, %v798_v34  ;;  %v2157_v51 = vld [vmem:[#allocation3 + $0x4] sm:$0x1]  ;;  %v3702_v52 = vcombine.low %v5060_v47, %v724_v48  ;;  %v2155_v56 = vsel %vm4959_vm10, %v3968_v2, %v5060_v47  ;;  %v671_v21 = vld [vmem:[#allocation3 + $0x20] sm:$0xf]  ;;  %v4492_v33 = vld [vmem:[#allocation5 + $0x148] sm:$0xff]  }
  0x7b   : > { %v3954_v53 = vpack.c.bf16 %v547_v46, %v547_v46  ;;  %v2158_v58 = vsel %vm4969_vm4, %v3969_v3, %v2157_v51  ;;  %2156 = vst [vmem:[#allocation3] sm:$0xf] %v2155_v56  ;;  %v3712_v57 = vcombine.low %v5060_v47, %v5013_v1  ;;  %v548_v61 = vsel %vm488_vm15, 1.0, %v528_v45  ;;  %v4494_v3 = vld [vmem:[#allocation5 + $0x1c8] sm:$0xff]   ;;  %v674_v27 = vld [vmem:[#allocation3 + $0x24] sm:$0x1] }
  0x7c   : > { %2159 = vst [vmem:[#allocation3 + $0x4] sm:$0x1] %v2158_v58  ;;  %vm2001_vm2 = vcmp.gt.f32.partialorder %v1981_v43, 0.0  ;;  %v784_v2 = vshrl.u32 %v3702_v52, 16  ;;  %v786_v4 = vshll.u32 %v3702_v52, 16  ;;  %v839_v5 = vrot.slane %v3702_v52, 1 }
  0x7d   : > { %v666_v62 = vsel %vm4959_vm10, %v3954_v53, %v665_v40  ;;  %v3955_v6 = vpack.c.bf16 %v548_v61, %v548_v61  ;;  %vm2002_vm3 = vcmp.gt.f32.partialorder %v1982_v54, 0.0  ;;  %vm2021_vm5 = vcmp.lt.f32.partialorder %v1981_v43, 0.0  ;;  %v4500_v30 = vld [vmem:[#allocation5 + $0x1d0] sm:$0xff]   ;;  %v446_v46 = vld [vmem:[#allocation2 + $0x50] sm:$0xff]  ;;  %v4493_v47 = vld [vmem:[#allocation5 + $0x108] sm:$0xff]  }
  0x7e   : > { %667 = vst [vmem:[#allocation3 + $0x18] sm:$0xf] %v666_v62  ;;  %vm2022_vm6 = vcmp.lt.f32.partialorder %v1982_v54, 0.0  ;;  %vm489_vm7 = vcmp.gt.f32.partialorder %v469_v55, 0.0  ;;  %v788_v7 = vrot.slane %v786_v4, 1  ;;  %v3714_v1 = vcombine.low %v839_v5, %v840_v32  ;;  %v4501_v52 = vld [vmem:[#allocation5 + $0x190] sm:$0xff]  }
  0x7f   : > { %v669_v9 = vsel %vm4969_vm4, %v3955_v6, %v668_v0  ;;  %v2041_v12 = vsel %vm2021_vm5, -1.0, %v4761_v10  ;;  %v2042_v13 = vsel %vm2022_vm6, -1.0, %v4761_v10  ;;  %vm490_vm8 = vcmp.gt.f32.partialorder %v470_v59, 0.0  ;;  %v4504_v56 = vld [vmem:[#allocation5 + $0x1d8] sm:$0xff]   ;;  %v447_v58 = vld [vmem:[#allocation2 + $0x58] sm:$0x3] }
  0x80   : > { %670 = vst [vmem:[#allocation3 + $0x1c] sm:$0x1] %v669_v9  ;;  %v2061_v14 = vsel %vm2001_vm2, 1.0, %v2041_v12  ;;  %vm509_vm9 = vcmp.lt.f32.partialorder %v469_v55, 0.0  ;;  %v789_v16 = vor.u32 %v788_v7, %v784_v2  ;;  %1621 = vmatmul.mubr.bf16.vlgmr.msra.gmra.mrb[0].mxu1 %v3714_v1  ;;  %v2062_v18 = vsel %vm2002_vm3, 1.0, %v2042_v13  ;;  %v4498_v55 = vld [vmem:[#allocation5 + $0x150] sm:$0xff]  }
  0x81   : > { %v3974_v19 = vpack.c.bf16 %v2061_v14, %v2061_v14  ;;  %vm510_vm11 = vcmp.lt.f32.partialorder %v470_v59, 0.0  ;;  %4110 = vmatpush3.bf16.msra.mxu1 %v4491_v60  ;;  %v3975_v24 = vpack.c.bf16 %v2062_v18, %v2062_v18  ;;  %v529_v25 = vsel %vm509_vm9, -1.0, %v4761_v10  ;;  %v4505_v6 = vld [vmem:[#allocation5 + $0x198] sm:$0xff]  }
  0x82   : > { %v530_v26 = vsel %vm510_vm11, -1.0, %v4761_v10  ;;  %v3713_v31 = vcombine.low %v789_v16, %v5057_v44  ;;  %v2217_v34 = vld [vmem:[#allocation3] sm:$0xf]  ;;  %4111 = vmatprep.subr.bf16.mxu1 %v4494_v3  ;;  %v549_v36 = vsel %vm489_vm7, 1.0, %v529_v25  ;;  %v1984_v39 = vadd.f32 %v4947_v8, %v5053_v38  ;;  %v4502_v16 = vld [vmem:[#allocation5 + $0x158] sm:$0xff]  }
  0x83   : > { %v2220_v35 = vld [vmem:[#allocation3 + $0x4] sm:$0x1]  ;;  %v550_v37 = vsel %vm490_vm8, 1.0, %v530_v26  ;;  %v2218_v40 = vsel %vm4959_vm10, 0, %v2217_v34  ;;  %v3956_v43 = vpack.c.bf16 %v549_v36, %v549_v36  ;;  %vm2003_vm12 = vcmp.gt.f32.partialorder %v1983_v28, 0.0  ;;  %v4511_v36 = vld [vmem:[#allocation5 + $0x1a0] sm:$0xff]  }
  0x84   : > { %v2221_v41 = vsel %vm4969_vm4, 0, %v2220_v35  ;;  %v3957_v45 = vpack.c.bf16 %v550_v37, %v550_v37  ;;  %1555 = vmatprep.mubr.bf16.mxu0 %v3713_v31  ;;  %2219 = vst [vmem:[#allocation3] sm:$0xf] %v2218_v40  ;;  %vm2004_vm13 = vcmp.gt.f32.partialorder %v1984_v39, 0.0  ;;  %vm2023_vm14 = vcmp.lt.f32.partialorder %v1983_v28, 0.0 }
  0x85   : > { %v2172_v42 = vld [vmem:[#allocation3 + $0x18] sm:$0xf]  ;;  %2222 = vst [vmem:[#allocation3 + $0x4] sm:$0x1] %v2221_v41  ;;  %1556 = vmatmul.mubr.bf16.vlgmr.msra.gmra.mrb[0].mxu0 %v3712_v57  ;;  %4112 = vmatpush3.bf16.msra.mxu1 %v4495_v22  ;;  %v672_v51 = vsel %vm4959_vm10, %v3956_v43, %v671_v21  ;;  %vm2024_vm15 = vcmp.lt.f32.partialorder %v1984_v39, 0.0  ;;  %v2043_v54 = vsel %vm2023_vm14, -1.0, %v4761_v10  ;;  %v471_v0 = vadd.f32 %v4930_v63, %v446_v46 }
  0x86   : > { %v5102_v48 = vld [vmem:[#allocation3 + $0x18] sm:$0xf]  ;;  %v2173_v38 = vsel %vm4959_vm10, %v3974_v19, %v2172_v42  ;;  %v675_v53 = vsel %vm4969_vm4, %v3957_v45, %v674_v27  ;;  %4070 = vmatpush3.bf16.msra.mxu0 %v4489_v17  ;;  %673 = vst [vmem:[#allocation3 + $0x20] sm:$0xf] %v672_v51  ;;  %v2044_v57 = vsel %vm2024_vm15, -1.0, %v4761_v10  ;;  %v2063_v61 = vsel %vm2003_vm12, 1.0, %v2043_v54  ;;  %4113 = vmatprep.subr.bf16.mxu1 %v4500_v30 }
  0x87   : > { %2174 = vst [vmem:[#allocation3 + $0x18] sm:$0xf] %v2173_v38  ;;  %v730_v59 = vld [vmem:[#allocation3 + $0x1c] sm:$0x1]  ;;  %676 = vst [vmem:[#allocation3 + $0x24] sm:$0x1] %v675_v53  ;;  %v5115_v62 = vcombine.low %v5023_v11, %v5102_v48  ;;  %4071 = vmatprep.subr.bf16.mxu0 %v4492_v33  ;;  %v3976_v3 = vpack.c.bf16 %v2063_v61, %v2063_v61  ;;  %v472_v9 = vadd.f32 %v4930_v63, %v447_v58 }
  0x88   : > { %v2175_v60 = vld [vmem:[#allocation3 + $0x1c] sm:$0x1]  ;;  %v5119_v2 = vcombine.low %v5102_v48, %v730_v59  ;;  %v2064_v5 = vsel %vm2004_vm13, 1.0, %v2044_v57  ;;  %v841_v1 = vrot.slane %v5036_v20, 1  ;;  %v4499_v11 = vld [vmem:[#allocation5 + $0x110] sm:$0xff]   ;;  %vm491_vm0 = vcmp.gt.f32.partialorder %v471_v0, 0.0 }
  0x89   : > { %v2176_v4 = vsel %vm4969_vm4, %v3975_v24, %v2175_v60  ;;  %v3977_v7 = vpack.c.bf16 %v2064_v5, %v2064_v5  ;;  %4114 = vmatpush3.bf16.msra.mxu1 %v4501_v52  ;;  %vm511_vm1 = vcmp.lt.f32.partialorder %v471_v0, 0.0  ;;  %v677_v17 = vld [vmem:[#allocation3 + $0x28] sm:$0xf]  ;;  %vm492_vm2 = vcmp.gt.f32.partialorder %v472_v9, 0.0  ;;  %v680_v21 = vld [vmem:[#allocation3 + $0x2c] sm:$0x1] }
  0x8a   : > { %2177 = vst [vmem:[#allocation3 + $0x1c] sm:$0x1] %v2176_v4  ;;  %v805_v12 = vshrl.u32 %v5119_v2, 16  ;;  %v807_v13 = vshll.u32 %v5119_v2, 16  ;;  %v842_v14 = vrot.slane %v5119_v2, 1  ;;  %4072 = vmatpush3.bf16.msra.mxu0 %v4493_v47  ;;  %4115 = vmatprep.subr.bf16.mxu1 %v4504_v56  ;;  %vm512_vm3 = vcmp.lt.f32.partialorder %v472_v9, 0.0 }
  0x8b   : > { %v5129_v18 = vld [vmem:[#allocation2 + $0x68] sm:$0x3]  ;;  %v531_v19 = vsel %vm511_vm1, -1.0, %v4761_v10  ;;  %v1985_v22 = vadd.f32 %v4947_v8, %v446_v46  ;;  %v5133_v24 = vld [vmem:[#allocation2 + $0x60] sm:$0xff]  ;;  %4073 = vmatprep.subr.bf16.mxu0 %v4498_v55  ;;  %v532_v27 = vsel %vm512_vm3, -1.0, %v4761_v10  ;;  %v4510_v30 = vld [vmem:[#allocation5 + $0x1e0] sm:$0xff]   ;;  %v1986_v35 = vadd.f32 %v4947_v8, %v447_v58 }
  0x8c   : > { %v809_v25 = vrot.slane %v807_v13, 1  ;;  %v5139_v26 = vcombine.low %v841_v1, %v842_v14  ;;  %v551_v28 = vsel %vm491_vm0, 1.0, %v531_v19  ;;  %v552_v31 = vsel %vm492_vm2, 1.0, %v532_v27  ;;  %v4503_v33 = vld [vmem:[#allocation5 + $0x118] sm:$0xff]   ;;  %v4508_v52 = vld [vmem:[#allocation5 + $0x160] sm:$0xff]   ;;  %v4532_v2 = vld [vmem:[#allocation5 + $0x290] sm:$0xff]  }
  0x8d   : > { %v3958_v34 = vpack.c.bf16 %v551_v28, %v551_v28  ;;  %vm2005_vm5 = vcmp.gt.f32.partialorder %v1985_v22, 0.0  ;;  %v5146_v39 = vld [vmem:[#allocation3 + $0x20] sm:$0xf]  ;;  %4116 = vmatpush3.bf16.msra.mxu1 %v4505_v6  ;;  %v3959_v42 = vpack.c.bf16 %v552_v31, %v552_v31  ;;  %v473_v43 = vadd.f32 %v4930_v63, %v5133_v24  ;;  %v4509_v57 = vld [vmem:[#allocation5 + $0x120] sm:$0xff]   ;;  %v4515_v6 = vld [vmem:[#allocation5 + $0x1a8] sm:$0xff]  }
  0x8e   : > { %v5144_v37 = vor.u32 %v809_v25, %v805_v12  ;;  %v732_v40 = vld [vmem:[#allocation3 + $0x24] sm:$0x1]  ;;  %v2178_v41 = vld [vmem:[#allocation3 + $0x20] sm:$0xf]  ;;  %v474_v45 = vadd.f32 %v4930_v63, %v5129_v18  ;;  %v3721_v47 = vcombine.low %v5102_v48, %v5146_v39  ;;  %4074 = vmatpush3.bf16.msra.mxu0 %v4499_v11  ;;  %vm2006_vm6 = vcmp.gt.f32.partialorder %v1986_v35, 0.0  ;;  %4117 = vmatprep.subr.bf16.mxu1 %v4510_v30  ;;  %v4513_v31 = vld [vmem:[#allocation5 + $0x128] sm:$0xff]  }
  0x8f   : > { %v5153_v46 = vcombine.low %v5146_v39, %v732_v40  ;;  %v2179_v38 = vsel %vm4959_vm10, %v3976_v3, %v2178_v41  ;;  %v2181_v51 = vld [vmem:[#allocation3 + $0x24] sm:$0x1]  ;;  %v678_v53 = vsel %vm4959_vm10, %v3958_v34, %v677_v17  ;;  %4075 = vmatprep.subr.bf16.mxu0 %v4502_v16  ;;  %v681_v48 = vsel %vm4969_vm4, %v3959_v42, %v680_v21  ;;  %v683_v5 = vld [vmem:[#allocation3 + $0x30] sm:$0xf]  ;;  %v4514_v3 = vld [vmem:[#allocation5 + $0x1e8] sm:$0xff]  }
  0x90   : > { %v5163_v54 = vcombine.low %v5062_v49, %v5144_v37  ;;  %2180 = vst [vmem:[#allocation3 + $0x20] sm:$0xf] %v2179_v38  ;;  %v2182_v55 = vsel %vm4969_vm4, %v3977_v7, %v2181_v51  ;;  %679 = vst [vmem:[#allocation3 + $0x28] sm:$0xf] %v678_v53  ;;  %1628 = vmatprep.mubr.bf16.mxu1 %v3721_v47  ;;  %vm2025_vm7 = vcmp.lt.f32.partialorder %v1985_v22, 0.0  ;;  %vm2026_vm8 = vcmp.lt.f32.partialorder %v1986_v35, 0.0 }
  0x91   : > { %2183 = vst [vmem:[#allocation3 + $0x24] sm:$0x1] %v2182_v55  ;;  %682 = vst [vmem:[#allocation3 + $0x2c] sm:$0x1] %v681_v48  ;;  %v812_v56 = vshrl.u32 %v5153_v46, 16  ;;  %v814_v58 = vshll.u32 %v5153_v46, 16  ;;  %1629 = vmatmul.mubr.bf16.gmra.mrb[4].mxu1 %v5139_v26  ;;  %v1987_v19 = vadd.f32 %v4947_v8, %v5133_v24  ;;  %v1988_v28 = vadd.f32 %v4947_v8, %v5129_v18 }
  0x92   : > { %1563 = vmatprep.mubr.bf16.mxu0 %v5163_v54  ;;  %v2045_v59 = vsel %vm2025_vm7, -1.0, %v4761_v10  ;;  %v2046_v60 = vsel %vm2026_vm8, -1.0, %v4761_v10  ;;  %vm493_vm9 = vcmp.gt.f32.partialorder %v473_v43, 0.0  ;;  %vm494_vm11 = vcmp.gt.f32.partialorder %v474_v45, 0.0  ;;  %4118 = vmatpush3.bf16.msra.mxu1 %v4511_v36  ;;  %v686_v17 = vld [vmem:[#allocation3 + $0x34] sm:$0x1] }
  0x93   : > { %1564 = vmatmul.mubr.bf16.gmra.mrb[4].mxu0 %v5115_v62  ;;  %v816_v61 = vrot.slane %v814_v58, 1  ;;  %v2065_v0 = vsel %vm2005_vm5, 1.0, %v2045_v59  ;;  %v2066_v4 = vsel %vm2006_vm6, 1.0, %v2046_v60  ;;  %vm513_vm12 = vcmp.lt.f32.partialorder %v473_v43, 0.0  ;;  %v4512_v21 = vld [vmem:[#allocation5 + $0x168] sm:$0xff]   ;;  %4119 = vmatprep.subr.bf16.mxu1 %v4514_v3  ;;  %v450_v22 = vld [vmem:[#allocation2 + $0x70] sm:$0xff] }
  0x94   : > { %4076 = vmatpush3.bf16.msra.mxu0 %v4503_v33  ;;  %v3978_v7 = vpack.c.bf16 %v2065_v0, %v2065_v0  ;;  %v3979_v11 = vpack.c.bf16 %v2066_v4, %v2066_v4  ;;  %vm514_vm13 = vcmp.lt.f32.partialorder %v474_v45, 0.0  ;;  %v533_v9 = vsel %vm513_vm12, -1.0, %v4761_v10  ;;  %v451_v34 = vld [vmem:[#allocation2 + $0x78] sm:$0x3]  ;;  %v4517_v51 = vld [vmem:[#allocation5 + $0x170] sm:$0xff]  }
  0x95   : > { %v5179_v12 = vor.u32 %v816_v61, %v812_v56  ;;  %v534_v13 = vsel %vm514_vm13, -1.0, %v4761_v10  ;;  %v553_v16 = vsel %vm493_vm9, 1.0, %v533_v9  ;;  %4077 = vmatprep.subr.bf16.mxu0 %v4508_v52  ;;  %v843_v30 = vrot.slane %v5153_v46, 1  ;;  %v4519_v4 = vld [vmem:[#allocation5 + $0x1f0] sm:$0xff]   ;;  %v692_v3 = vld [vmem:[#allocation3 + $0x3c] sm:$0x1] }
  0x96   : > { %v554_v25 = vsel %vm494_vm11, 1.0, %v534_v13  ;;  %v3960_v27 = vpack.c.bf16 %v553_v16, %v553_v16  ;;  %vm2007_vm14 = vcmp.gt.f32.partialorder %v1987_v19, 0.0  ;;  %vm2027_vm15 = vcmp.lt.f32.partialorder %v1987_v19, 0.0  ;;  %4120 = vmatpush3.bf16.msra.mxu1 %v4515_v6  ;;  %v453_v20 = vld [vmem:[#allocation2 + $0x88] sm:$0x3] }
  0x97   : > { %v5189_v35 = vld [vmem:[#allocation3 + $0x28] sm:$0xf]  ;;  %v3961_v40 = vpack.c.bf16 %v554_v25, %v554_v25  ;;  %v475_v24 = vadd.f32 %v4930_v63, %v450_v22  ;;  %vm2008_vm0 = vcmp.gt.f32.partialorder %v1988_v28, 0.0  ;;  %vm2028_vm1 = vcmp.lt.f32.partialorder %v1988_v28, 0.0  ;;  %4121 = vmatprep.subr.bf16.mxu1 %v4519_v4 }
  0x98   : > { %v2184_v36 = vld [vmem:[#allocation3 + $0x28] sm:$0xf]  ;;  %v734_v41 = vld [vmem:[#allocation3 + $0x2c] sm:$0x1]  ;;  %v684_v18 = vsel %vm4959_vm10, %v3960_v27, %v683_v5  ;;  %4078 = vmatpush3.bf16.msra.mxu0 %v4509_v57  ;;  %v2047_v38 = vsel %vm2027_vm15, -1.0, %v4761_v10  ;;  %v2048_v53 = vsel %vm2028_vm1, -1.0, %v4761_v10  ;;  %v5208_v48 = vcombine.low %v5146_v39, %v5189_v35 }
  0x99   : > { %v2185_v33 = vsel %vm4959_vm10, %v3978_v7, %v2184_v36  ;;  %v2187_v42 = vld [vmem:[#allocation3 + $0x2c] sm:$0x1]  ;;  %v5197_v43 = vcombine.low %v5189_v35, %v734_v41  ;;  %685 = vst [vmem:[#allocation3 + $0x30] sm:$0xf] %v684_v18  ;;  %v687_v47 = vsel %vm4969_vm4, %v3961_v40, %v686_v17  ;;  %4079 = vmatprep.subr.bf16.mxu0 %v4512_v21  ;;  %v2067_v55 = vsel %vm2007_vm14, 1.0, %v2047_v38  ;;  %v4518_v57 = vld [vmem:[#allocation5 + $0x130] sm:$0xff]  }
  0x9a   : > { %2186 = vst [vmem:[#allocation3 + $0x28] sm:$0xf] %v2185_v33  ;;  %v2188_v45 = vsel %vm4969_vm4, %v3979_v11, %v2187_v42  ;;  %688 = vst [vmem:[#allocation3 + $0x34] sm:$0x1] %v687_v47  ;;  %v476_v52 = vadd.f32 %v4930_v63, %v451_v34  ;;  %v2068_v59 = vsel %vm2008_vm0, 1.0, %v2048_v53  ;;  %v3980_v60 = vpack.c.bf16 %v2067_v55, %v2067_v55  ;;  %v4520_v7 = vld [vmem:[#allocation5 + $0x1b0] sm:$0xff]  }
  0x9b   : > { %2189 = vst [vmem:[#allocation3 + $0x2c] sm:$0x1] %v2188_v45  ;;  %v819_v56 = vshrl.u32 %v5197_v43, 16  ;;  %v821_v58 = vshll.u32 %v5197_v43, 16  ;;  %v3981_v61 = vpack.c.bf16 %v2068_v59, %v2068_v59  ;;  %v844_v0 = vrot.slane %v5197_v43, 1  ;;  %v452_v17 = vld [vmem:[#allocation2 + $0x80] sm:$0xff]  ;;  %4122 = vmatpush3.bf16.msra.mxu1 %v4520_v7 }
  0x9c   : > { %4080 = vmatpush3.bf16.msra.mxu0 %v4513_v31  ;;  %vm495_vm2 = vcmp.gt.f32.partialorder %v475_v24, 0.0  ;;  %vm496_vm3 = vcmp.gt.f32.partialorder %v476_v52, 0.0  ;;  %vm515_vm5 = vcmp.lt.f32.partialorder %v475_v24, 0.0  ;;  %vm516_vm6 = vcmp.lt.f32.partialorder %v476_v52, 0.0  ;;  %v689_v39 = vld [vmem:[#allocation3 + $0x38] sm:$0xf] }
  0x9d   : > { %v823_v5 = vrot.slane %v821_v58, 1  ;;  %v1989_v6 = vadd.f32 %v4947_v8, %v450_v22  ;;  %4081 = vmatprep.subr.bf16.mxu0 %v4517_v51  ;;  %v5220_v11 = vcombine.low %v843_v30, %v844_v0  ;;  %v535_v9 = vsel %vm515_vm5, -1.0, %v4761_v10  ;;  %v4521_v25 = vld [vmem:[#allocation5 + $0x178] sm:$0xff]  }
  0x9e   : > { %v536_v13 = vsel %vm516_vm6, -1.0, %v4761_v10  ;;  %v1990_v16 = vadd.f32 %v4947_v8, %v451_v34  ;;  %v555_v21 = vsel %vm495_vm2, 1.0, %v535_v9  ;;  %v4522_v42 = vld [vmem:[#allocation5 + $0x138] sm:$0xff]   ;;  %v477_v53 = vadd.f32 %v4930_v63, %v452_v17 }
  0x9f   : > { %v5225_v19 = vor.u32 %v823_v5, %v819_v56  ;;  %v556_v22 = vsel %vm496_vm3, 1.0, %v536_v13  ;;  %vm2009_vm7 = vcmp.gt.f32.partialorder %v1989_v6, 0.0  ;;  %v3962_v31 = vpack.c.bf16 %v555_v21, %v555_v21  ;;  %v4523_v59 = vld [vmem:[#allocation5 + $0x1f8] sm:$0xff]   ;;  %v4526_v13 = vld [vmem:[#allocation5 + $0x280] sm:$0xff]  }
  0xa0   : > { %v5229_v27 = vld [vmem:[#allocation3 + $0x30] sm:$0xf]  ;;  %v3963_v36 = vpack.c.bf16 %v556_v22, %v556_v22  ;;  %vm2010_vm8 = vcmp.gt.f32.partialorder %v1990_v16, 0.0  ;;  %vm2029_vm9 = vcmp.lt.f32.partialorder %v1989_v6, 0.0  ;;  %4082 = vmatpush3.bf16.msra.mxu0 %v4518_v57  ;;  %vm2030_vm11 = vcmp.lt.f32.partialorder %v1990_v16, 0.0  ;;  %4123 = vmatprep.subr.bf16.mxu1 %v4523_v59  ;;  %v4536_v43 = vld [vmem:[#allocation5 + $0x258] sm:$0xff]  }
  0xa1   : > { %v2190_v28 = vld [vmem:[#allocation3 + $0x30] sm:$0xf]  ;;  %v5233_v34 = vcombine.low %v5179_v12, %v5225_v19  ;;  %v736_v40 = vld [vmem:[#allocation3 + $0x34] sm:$0x1]  ;;  %v3727_v24 = vcombine.low %v5189_v35, %v5229_v27  ;;  %4083 = vmatprep.subr.bf16.mxu0 %v4521_v25  ;;  %v690_v47 = vsel %vm4959_vm10, %v3962_v31, %v689_v39  ;;  %v2049_v38 = vsel %vm2029_vm9, -1.0, %v4761_v10 }
  0xa2   : > { %v2191_v41 = vsel %vm4959_vm10, %v3980_v60, %v2190_v28  ;;  %v2193_v33 = vld [vmem:[#allocation3 + $0x34] sm:$0x1]  ;;  %v5240_v18 = vcombine.low %v5229_v27, %v736_v40  ;;  %v693_v35 = vsel %vm4969_vm4, %v3963_v36, %v692_v3  ;;  %691 = vst [vmem:[#allocation3 + $0x38] sm:$0xf] %v690_v47  ;;  %v2050_v51 = vsel %vm2030_vm11, -1.0, %v4761_v10  ;;  %v4524_v60 = vld [vmem:[#allocation5 + $0x1b8] sm:$0xff]  }
  0xa3   : > { %2192 = vst [vmem:[#allocation3 + $0x30] sm:$0xf] %v2191_v41  ;;  %v2194_v45 = vsel %vm4969_vm4, %v3981_v61, %v2193_v33  ;;  %1571 = vmatprep.mubr.bf16.mxu0 %v5233_v34  ;;  %1636 = vmatprep.mubr.bf16.mxu1 %v3727_v24  ;;  %694 = vst [vmem:[#allocation3 + $0x3c] sm:$0x1] %v693_v35  ;;  %v1991_v55 = vadd.f32 %v4947_v8, %v452_v17  ;;  %v2069_v56 = vsel %vm2009_vm7, 1.0, %v2049_v38  ;;  %v4525_v3 = vld [vmem:[#allocation5 + $0x200] sm:$0xff]  }
  0xa4   : > { %2195 = vst [vmem:[#allocation3 + $0x34] sm:$0x1] %v2194_v45  ;;  %1572 = vmatmul.mubr.bf16.gmra.mrb[8].mxu0 %v5208_v48  ;;  %1637 = vmatmul.mubr.bf16.gmra.mrb[8].mxu1 %v5220_v11  ;;  %v828_v52 = vshll.u32 %v5240_v18, 16  ;;  %v2070_v58 = vsel %vm2010_vm8, 1.0, %v2050_v51  ;;  %vm497_vm12 = vcmp.gt.f32.partialorder %v477_v53, 0.0  ;;  %vm517_vm13 = vcmp.lt.f32.partialorder %v477_v53, 0.0 }
  0xa5   : > { %4084 = vmatpush3.bf16.msra.mxu0 %v4522_v42  ;;  %v537_v57 = vsel %vm517_vm13, -1.0, %v4761_v10  ;;  %v695_v61 = vld [vmem:[#allocation3 + $0x40] sm:$0xf]  ;;  %vm2031_vm14 = vcmp.lt.f32.partialorder %v1991_v55, 0.0  ;;  %v826_v4 = vshrl.u32 %v5240_v18, 16  ;;  %v3982_v5 = vpack.c.bf16 %v2069_v56, %v2069_v56  ;;  %4124 = vmatpush3.bf16.msra.mxu1 %v4524_v60 }
  0xa6   : > { %v557_v39 = vsel %vm497_vm12, 1.0, %v537_v57  ;;  %v830_v6 = vrot.slane %v828_v52, 1  ;;  %v3983_v7 = vpack.c.bf16 %v2070_v58, %v2070_v58  ;;  %vm2011_vm15 = vcmp.gt.f32.partialorder %v1991_v55, 0.0  ;;  %4333 = vmatprep.subr.bf16.mxu0 %v4525_v3  ;;  %4161 = vmatprep.subr.bf16.mxu1 %v4526_v13  ;;  %v4534_v13 = vld [vmem:[#allocation5 + $0x218] sm:$0xff]  }
  0xa7   : > { %v3964_v9 = vpack.c.bf16 %v557_v39, %v557_v39  ;;  %v2051_v16 = vsel %vm2031_vm14, -1.0, %v4761_v10  ;;  %v845_v42 = vrot.slane %v5240_v18, 1  ;;  %v3716_v57 = vcombine.low %v5057_v44, %v5062_v49  ;;  %v454_v39 = vld [vmem:[#allocation2 + $0x90] sm:$0xff]  ;;  %v4531_v44 = vld [vmem:[#allocation5 + $0x210] sm:$0xff]  }
  0xa8   : > { %v2071_v24 = vsel %vm2011_vm15, 1.0, %v2051_v16  ;;  %v5274_v47 = vor.u32 %v830_v6, %v826_v4  ;;  %v4528_v4 = vld [vmem:[#allocation5 + $0x208] sm:$0xff]   ;;  %v478_v15 = vadd.f32 %v4930_v63, %v453_v20  ;;  %v4535_v16 = vld [vmem:[#allocation5 + $0x298] sm:$0xff]  }
  0xa9   : > { %v737_v17 = vld [vmem:[#allocation3 + $0x38] sm:$0xf]  ;;  %v696_v25 = vsel %vm4959_vm10, %v3964_v9, %v695_v61  ;;  %v3984_v38 = vpack.c.bf16 %v2071_v24, %v2071_v24  ;;  %v4527_v61 = vld [vmem:[#allocation5 + $0x240] sm:$0xff]  }
  0xaa   : > { %v738_v21 = vld [vmem:[#allocation3 + $0x3c] sm:$0x1]  ;;  %v2196_v22 = vld [vmem:[#allocation3 + $0x38] sm:$0xf]  ;;  %697 = vst [vmem:[#allocation3 + $0x40] sm:$0xf] %v696_v25  ;;  %v5281_v52 = vcombine.low %v5229_v27, %v737_v17  ;;  %v3717_v27 = vcombine.low %v840_v32, %v841_v1  ;;  %v1992_v32 = vadd.f32 %v4947_v8, %v453_v20  ;;  %v3723_v1 = vcombine.low %v842_v14, %v843_v30 }
  0xab   : > { %v5264_v28 = vcombine.low %v737_v17, %v738_v21  ;;  %v2197_v31 = vsel %vm4959_vm10, %v3982_v5, %v2196_v22  ;;  %v2199_v36 = vld [vmem:[#allocation3 + $0x3c] sm:$0x1]  ;;  %v455_v6 = vld [vmem:[#allocation2 + $0x98] sm:$0x3]  ;;  %vm498_vm0 = vcmp.gt.f32.partialorder %v478_v15, 0.0  ;;  %vm518_vm1 = vcmp.lt.f32.partialorder %v478_v15, 0.0 }
  0xac   : > { %2198 = vst [vmem:[#allocation3 + $0x38] sm:$0xf] %v2197_v31  ;;  %v2200_v40 = vsel %vm4969_vm4, %v3983_v7, %v2199_v36  ;;  %v4529_v5 = vld [vmem:[#allocation5 + $0x288] sm:$0xff]   ;;  %v538_v49 = vsel %vm518_vm1, -1.0, %v4761_v10  ;;  %vm2032_vm2 = vcmp.lt.f32.partialorder %v1992_v32, 0.0  ;;  %v479_v7 = vadd.f32 %v4930_v63, %v454_v39 }
  0xad   : > { %v833_v41 = vshrl.u32 %v5264_v28, 16  ;;  %v835_v33 = vshll.u32 %v5264_v28, 16  ;;  %2201 = vst [vmem:[#allocation3 + $0x3c] sm:$0x1] %v2200_v40  ;;  %v846_v45 = vrot.slane %v5264_v28, 1  ;;  %v480_v46 = vadd.f32 %v4930_v63, %v455_v6 }
  0xae   : > { %v558_v14 = vsel %vm498_vm0, 1.0, %v538_v49  ;;  %v698_v30 = vld [vmem:[#allocation3 + $0x44] sm:$0x1]  ;;  %vm499_vm3 = vcmp.gt.f32.partialorder %v479_v7, 0.0  ;;  %vm2012_vm6 = vcmp.gt.f32.partialorder %v1992_v32, 0.0  ;;  %v2052_v63 = vsel %vm2032_vm2, -1.0, %v4761_v10 }
  0xaf   : > { %v837_v35 = vrot.slane %v835_v33, 1  ;;  %v5287_v56 = vcombine.low %v845_v42, %v846_v45  ;;  %v3965_v9 = vpack.c.bf16 %v558_v14, %v558_v14  ;;  %vm500_vm5 = vcmp.gt.f32.partialorder %v480_v46, 0.0  ;;  %v704_v31 = vld [vmem:[#allocation3 + $0x4c] sm:$0x1]  ;;  %v4543_v32 = vld [vmem:[#allocation5 + $0x230] sm:$0xff]  }
  0xb0   : > { %vm519_vm7 = vcmp.lt.f32.partialorder %v479_v7, 0.0  ;;  %vm520_vm8 = vcmp.lt.f32.partialorder %v480_v46, 0.0  ;;  %v3729_v21 = vcombine.low %v844_v0, %v845_v42  ;;  %v5332_v36 = vadd.f32 %v4947_v8, %v454_v39  ;;  %v4537_v42 = vld [vmem:[#allocation5 + $0x220] sm:$0xff]   ;;  %v4545_v14 = vld [vmem:[#allocation5 + $0x2b0] sm:$0xff]  }
  0xb1   : > { %v5276_v51 = vor.u32 %v837_v35, %v833_v41  ;;  %v5278_v53 = vld [vmem:[#allocation3 + $0x40] sm:$0xf]  ;;  %v2072_v40 = vsel %vm2012_vm6, 1.0, %v2052_v63  ;;  %v5336_v33 = vadd.f32 %v4947_v8, %v455_v6  ;;  %v4538_v35 = vld [vmem:[#allocation5 + $0x2a0] sm:$0xff]  }
  0xb2   : > { %v2202_v55 = vld [vmem:[#allocation3 + $0x40] sm:$0xf]  ;;  %v3733_v59 = vcombine.low %v737_v17, %v5278_v53  ;;  %v699_v17 = vsel %vm4969_vm4, %v3965_v9, %v698_v30  ;;  %vm2013_vm9 = vcmp.gt.f32.partialorder %v5332_v36, 0.0  ;;  %v4539_v8 = vld [vmem:[#allocation5 + $0x260] sm:$0xff]   ;;  %vm2033_vm11 = vcmp.lt.f32.partialorder %v5332_v36, 0.0  ;;  %v4547_v9 = vld [vmem:[#allocation5 + $0x238] sm:$0xff]  }
  0xb3   : > { %v5291_v58 = vcombine.low %v5274_v47, %v5276_v51  ;;  %v2203_v60 = vsel %vm4959_vm10, %v3984_v38, %v2202_v55  ;;  %700 = vst [vmem:[#allocation3 + $0x44] sm:$0x1] %v699_v17  ;;  %v3985_v38 = vpack.c.bf16 %v2072_v40, %v2072_v40  ;;  %vm2034_vm12 = vcmp.lt.f32.partialorder %v5336_v33, 0.0  ;;  %v4540_v55 = vld [vmem:[#allocation5 + $0x228] sm:$0xff]   ;;  %v4546_v30 = vld [vmem:[#allocation5 + $0x270] sm:$0xff]   ;;  %v4555_v36 = vld [vmem:[#allocation5 + $0x380] sm:$0xff]  }
  0xb4   : > { %2204 = vst [vmem:[#allocation3 + $0x40] sm:$0xf] %v2203_v60  ;;  %1644 = vmatprep.mubr.bf16.mxu1 %v3733_v59  ;;  %v4541_v59 = vld [vmem:[#allocation5 + $0x2a8] sm:$0xff]   ;;  %v5349_v60 = vld [vmem:[#allocation3] sm:$0xf]  ;;  %vm2014_vm13 = vcmp.gt.f32.partialorder %v5336_v33, 0.0 }
  0xb5   : > { %1579 = vmatprep.mubr.bf16.mxu0 %v5291_v58  ;;  %1645 = vmatmul.mubr.bf16.gmra.mrb[12].mxu1 %v5287_v56  ;;  %v2054_v6 = vsel %vm2034_vm12, -1.0, %v4761_v10  ;;  %v5391_v63 = vld [vmem:[#allocation3 + $0x10] sm:$0xf]  ;;  %v5397_v40 = vld [vmem:[#allocation3 + $0x18] sm:$0xf] }
  0xb6   : > { %1580 = vmatmul.mubr.bf16.gmra.mrb[12].mxu0 %v5281_v52  ;;  %1750 = vmatprep.mubr.bf16.mxu1 %v5163_v54  ;;  %v4530_v54 = vld [vmem:[#allocation5 + $0x248] sm:$0xff]   ;;  %v2074_v28 = vsel %vm2014_vm13, 1.0, %v2054_v6  ;;  %v5416_v6 = vld [vmem:[#allocation3 + $0x20] sm:$0xf] }
  0xb7   : > { %1685 = vmatprep.mubr.bf16.mxu0 %v3717_v27  ;;  %v2231_v27 = vld [vmem:[#allocation3 + $0x4] sm:$0x1] }
  0xb8   : > { %v5370_v49 = vcombine.low %v5349_v60, %v2231_v27 }
  0xbd   : > { %1751 = vmatmul.mubr.bf16.vlgmr.msra.gmra.mrb[16].mxu1 %v5115_v62  ;;  %v3722_v62 = vcombine.low %v5144_v37, %v5179_v12  ;;  %v539_v37 = vsel %vm519_vm7, -1.0, %v4761_v10  ;;  %v540_v12 = vsel %vm520_vm8, -1.0, %v4761_v10 }
  0xbe   : > { %1686 = vmatmul.mubr.bf16.vlgmr.msra.gmra.mrb[16].mxu0 %v3716_v57  ;;  %4162 = vmatpush3.bf16.msra.mxu1 %v4527_v61  ;;  %v559_v22 = vsel %vm499_vm3, 1.0, %v539_v37  ;;  %v560_v25 = vsel %vm500_vm5, 1.0, %v540_v12  ;;  %v740_v57 = vld [vmem:[#allocation3 + $0x44] sm:$0x1]  ;;  %v2235_v37 = vld [vmem:[#allocation3 + $0x14] sm:$0x1] }
  0xbf   : > { %4334 = vmatpush3.bf16.msra.mxu0 %v4525_v3  ;;  %4163 = vmatprep.subr.bf16.mxu1 %v4529_v5  ;;  %v4533_v3 = vld [vmem:[#allocation5 + $0x250] sm:$0xff]   ;;  %v3966_v24 = vpack.c.bf16 %v559_v22, %v559_v22  ;;  %v3967_v41 = vpack.c.bf16 %v560_v25, %v560_v25  ;;  %v2053_v5 = vsel %vm2033_vm11, -1.0, %v4761_v10  ;;  %v3987_v25 = vpack.c.bf16 %v2074_v28, %v2074_v28 }
  0xc0   : > { %4335 = vmatprep.subr.bf16.mxu0 %v4528_v4  ;;  %1693 = vmatprep.mubr.bf16.mxu0 %v3723_v1  ;;  %v2205_v61 = vld [vmem:[#allocation3 + $0x44] sm:$0x1] }
  0xc1   : > { %1758 = vmatprep.mubr.bf16.mxu1 %v5233_v34  ;;  %v701_v34 = vld [vmem:[#allocation3 + $0x48] sm:$0xf]  ;;  %v705_v18 = vsel %vm4969_vm4, %v3967_v41, %v704_v31  ;;  %v2206_v20 = vsel %vm4969_vm4, %v3985_v38, %v2205_v61  ;;  %v4550_v31 = vld [vmem:[#allocation5 + $0x300] sm:$0xff]  }
  0xc2   : > { %4164 = vmatpush3.bf16.msra.mxu1 %v4530_v54  ;;  %v702_v0 = vsel %vm4959_vm10, %v3966_v24, %v701_v34  ;;  %706 = vst [vmem:[#allocation3 + $0x4c] sm:$0x1] %v705_v18  ;;  %2207 = vst [vmem:[#allocation3 + $0x44] sm:$0x1] %v2206_v20  ;;  %v4549_v34 = vld [vmem:[#allocation5 + $0x278] sm:$0xff]  }
  0xc3   : > { %4336 = vmatpush3.bf16.msra.mxu0 %v4528_v4  ;;  %4165 = vmatprep.subr.bf16.mxu1 %v4532_v2  ;;  %703 = vst [vmem:[#allocation3 + $0x48] sm:$0xf] %v702_v0  ;;  %v5351_v4 = vld [vmem:[#allocation3 + $0x8] sm:$0xf]  ;;  %v2237_v24 = vld [vmem:[#allocation3 + $0x1c] sm:$0x1] }
  0xc4   : > { %4337 = vmatprep.subr.bf16.mxu0 %v4531_v44 }
  0xc5   : > { %1759 = vmatmul.mubr.bf16.gmra.mrb[20].mxu1 %v5208_v48  ;;  %v3728_v48 = vcombine.low %v5225_v19, %v5274_v47  ;;  %v2233_v19 = vld [vmem:[#allocation3 + $0xc] sm:$0x1]  ;;  %v4542_v47 = vld [vmem:[#allocation5 + $0x268] sm:$0xff]  }
  0xc6   : > { %1694 = vmatmul.mubr.bf16.gmra.mrb[20].mxu0 %v3722_v62  ;;  %4166 = vmatpush3.bf16.msra.mxu1 %v4533_v3  ;;  %v2073_v3 = vsel %vm2013_vm9, 1.0, %v2053_v5 }
  0xc7   : > { %4338 = vmatpush3.bf16.msra.mxu0 %v4531_v44  ;;  %4167 = vmatprep.subr.bf16.mxu1 %v4535_v16  ;;  %v3986_v12 = vpack.c.bf16 %v2073_v3, %v2073_v3 }
  0xc8   : > { %4339 = vmatprep.subr.bf16.mxu0 %v4534_v13  ;;  %1701 = vmatprep.mubr.bf16.mxu0 %v3729_v21  ;;  %v2291_v21 = vshrl.u32 %v5370_v49, 16 }
  0xc9   : > { %1766 = vmatprep.mubr.bf16.mxu1 %v5291_v58  ;;  %v5354_v58 = vcombine.low %v5278_v53, %v740_v57  ;;  %v720_v44 = vld [vmem:[#allocation3 + $0x4c] sm:$0x1]  ;;  %v4557_v57 = vld [vmem:[#allocation5 + $0x308] sm:$0xff]  }
  0xca   : > { %4168 = vmatpush3.bf16.msra.mxu1 %v4536_v43  ;;  %v717_v54 = vld [vmem:[#allocation3 + $0x48] sm:$0xf]  ;;  %v721_v2 = vsel %vm4969_vm4, 0, %v720_v44 }
  0xcb   : > { %4340 = vmatpush3.bf16.msra.mxu0 %v4534_v13  ;;  %4169 = vmatprep.subr.bf16.mxu1 %v4538_v35  ;;  %v859_v15 = vrot.slane %v5354_v58, 1  ;;  %v853_v1 = vshrl.u32 %v5354_v58, 16  ;;  %v855_v39 = vshll.u32 %v5354_v58, 16  ;;  %v718_v10 = vsel %vm4959_vm10, 0, %v717_v54  ;;  %722 = vst [vmem:[#allocation3 + $0x4c] sm:$0x1] %v721_v2 }
  0xcc   : > { %4341 = vmatprep.subr.bf16.mxu0 %v4537_v42  ;;  %719 = vst [vmem:[#allocation3 + $0x48] sm:$0xf] %v718_v10  ;;  %v2293_v13 = vshll.u32 %v5370_v49, 16  ;;  %v2239_v54 = vld [vmem:[#allocation3 + $0x24] sm:$0x1] }
  0xcd   : > { %1767 = vmatmul.mubr.bf16.gmra.mrb[24].mxu1 %v5281_v52  ;;  %v5373_v52 = vcombine.low %v5351_v4, %v2233_v19  ;;  %v3735_v7 = vcombine.low %v846_v45, %v859_v15  ;;  %v857_v46 = vrot.slane %v855_v39, 1  ;;  %v4548_v45 = vld [vmem:[#allocation5 + $0x2b8] sm:$0xff]   ;;  %v5426_v28 = vcombine.low %v5416_v6, %v2239_v54 }
  0xce   : > { %1702 = vmatmul.mubr.bf16.gmra.mrb[24].mxu0 %v3728_v48  ;;  %4170 = vmatpush3.bf16.msra.mxu1 %v4539_v8  ;;  %v2295_v41 = vrot.slane %v2293_v13, 1  ;;  %v5406_v8 = vcombine.low %v5397_v40, %v2237_v24 }
  0xcf   : > { %4342 = vmatpush3.bf16.msra.mxu0 %v4537_v42  ;;  %4171 = vmatprep.subr.bf16.mxu1 %v4541_v59  ;;  %v5383_v62 = vor.u32 %v857_v46, %v853_v1  ;;  %v2300_v16 = vshll.u32 %v5373_v52, 16  ;;  %v2298_v22 = vshrl.u32 %v5373_v52, 16  ;;  %v2241_v46 = vld [vmem:[#allocation3 + $0x2c] sm:$0x1]  ;;  %v2321_v58 = vshll.u32 %v5426_v28, 16 }
  0xd0   : > { %4343 = vmatprep.subr.bf16.mxu0 %v4540_v55  ;;  %1709 = vmatprep.mubr.bf16.mxu0 %v3735_v7  ;;  %v2296_v20 = vor.u32 %v2295_v41, %v2291_v21  ;;  %v2314_v5 = vshll.u32 %v5406_v8, 16  ;;  %v5419_v7 = vld [vmem:[#allocation3 + $0x28] sm:$0xf]  ;;  %v4572_v21 = vld [vmem:[#allocation5 + $0x320] sm:$0xff]  }
  0xd1   : > { %v3734_v17 = vcombine.low %v5276_v51, %v5383_v62  ;;  %v2302_v33 = vrot.slane %v2300_v16, 1  ;;  %v5400_v51 = vcombine.low %v5391_v63, %v2235_v37  ;;  %v4564_v16 = vld [vmem:[#allocation5 + $0x2d0] sm:$0xff]   ;;  %v4568_v37 = vld [vmem:[#allocation5 + $0x318] sm:$0xff]   ;;  %v2323_v41 = vrot.slane %v2321_v58, 1  ;;  %v4597_v58 = vld [vmem:[#allocation5 + $0x408] sm:$0xff]  }
  0xd2   : > { %4172 = vmatpush3.bf16.msra.mxu1 %v4542_v47  ;;  %v742_v0 = vld [vmem:[#allocation3 + $0x4c] sm:$0x1]  ;;  %v4558_v47 = vld [vmem:[#allocation5 + $0x2c8] sm:$0xff]  }
  0xd3   : > { %4344 = vmatpush3.bf16.msra.mxu0 %v4540_v55  ;;  %4173 = vmatprep.subr.bf16.mxu1 %v4545_v14  ;;  %v741_v43 = vld [vmem:[#allocation3 + $0x48] sm:$0xf]  ;;  %v2211_v38 = vld [vmem:[#allocation3 + $0x4c] sm:$0x1]  ;;  %v4553_v55 = vld [vmem:[#allocation5 + $0x2c0] sm:$0xff]   ;;  %v2307_v61 = vshll.u32 %v5400_v51, 16  ;;  %v5411_v19 = vor.u32 %v2302_v33, %v2298_v22  ;;  %v3842_v22 = vcombine.low %v5349_v60, %v5351_v4 }
  0xd4   : > { %4345 = vmatprep.subr.bf16.mxu0 %v4543_v32  ;;  %v2208_v18 = vld [vmem:[#allocation3 + $0x48] sm:$0xf]  ;;  %v3711_v42 = vcombine.low %v741_v43, %v742_v0  ;;  %v2212_v48 = vsel %vm4969_vm4, %v3987_v25, %v2211_v38  ;;  %v2305_v39 = vshrl.u32 %v5400_v51, 16  ;;  %v3736_v10 = vcombine.low %v5278_v53, %v741_v43  ;;  %v4559_v25 = vld [vmem:[#allocation5 + $0x388] sm:$0xff]   ;;  %v5453_v43 = vld [vmem:[#allocation3 + $0x30] sm:$0xf] }
  0xd5   : > { %v2209_v35 = vsel %vm4959_vm10, %v3986_v12, %v2208_v18  ;;  %2213 = vst [vmem:[#allocation3 + $0x4c] sm:$0x1] %v2212_v48  ;;  %v3843_v2 = vcombine.low %v2296_v20, %v5411_v19  ;;  %v2312_v14 = vshrl.u32 %v5406_v8, 16  ;;  %v2243_v0 = vld [vmem:[#allocation3 + $0x34] sm:$0x1]  ;;  %v4566_v48 = vld [vmem:[#allocation5 + $0x390] sm:$0xff]  }
  0xd6   : > { %1710 = vmatmul.mubr.bf16.gmra.mrb[28].mxu0 %v3734_v17  ;;  %4174 = vmatpush3.bf16.msra.mxu1 %v4546_v30  ;;  %2210 = vst [vmem:[#allocation3 + $0x48] sm:$0xf] %v2209_v35  ;;  %v866_v59 = vshrl.u32 %v3711_v42, 16  ;;  %v868_v27 = vshll.u32 %v3711_v42, 16  ;;  %v872_v1 = vrot.slane %v3711_v42, 1  ;;  %v3845_v17 = vcombine.low %v5351_v4, %v5391_v63  ;;  %v4560_v4 = vld [vmem:[#allocation5 + $0x348] sm:$0xff]  }
  0xd7   : > { %4346 = vmatpush3.bf16.msra.mxu0 %v4543_v32  ;;  %4175 = vmatprep.subr.bf16.mxu1 %v4548_v45  ;;  %v4561_v32 = vld [vmem:[#allocation5 + $0x310] sm:$0xff]   ;;  %v5455_v18 = vld [vmem:[#allocation3 + $0x38] sm:$0xf]  ;;  %v2245_v42 = vld [vmem:[#allocation3 + $0x3c] sm:$0x1]  ;;  %v5458_v60 = vcombine.low %v5453_v43, %v2243_v0 }
  0xd8   : > { %4347 = vmatprep.subr.bf16.mxu0 %v4547_v9  ;;  %4349 = vmatprep.mubr.bf16.mxu0 %v5139_v26  ;;  %v870_v26 = vrot.slane %v868_v27, 1  ;;  %v3738_v13 = vcombine.low %v859_v15, %v872_v1  ;;  %v4575_v35 = vld [vmem:[#allocation5 + $0x2e0] sm:$0xff]   ;;  %v5461_v38 = vcombine.low %v5455_v18, %v2245_v42  ;;  %v4580_v20 = vld [vmem:[#allocation5 + $0x2e8] sm:$0xff]   ;;  %v4594_v0 = vld [vmem:[#allocation5 + $0x378] sm:$0xff]   ;;  %v2350_v42 = vrot.slane %v5426_v28, 1 }
  0xda   : > { %4176 = vmatpush3.bf16.msra.mxu1 %v4549_v34  ;;  %v871_v44 = vor.u32 %v870_v26, %v866_v59  ;;  %v4556_v34 = vld [vmem:[#allocation5 + $0x340] sm:$0xff]   ;;  %v4567_v26 = vld [vmem:[#allocation5 + $0x350] sm:$0xff]   ;;  %v2340_v1 = vshrl.u32 %v5461_v38, 16 }
  0xdb   : > { %4348 = vmatpush3.bf16.msra.mxu0 %v4547_v9  ;;  %4241 = vmatprep.subr.bf16.mxu1 %v4555_v36  ;;  %v2316_v9 = vrot.slane %v2314_v5, 1  ;;  %v5472_v5 = vcombine.low %v5391_v63, %v5397_v40  ;;  %v4590_v63 = vld [vmem:[#allocation5 + $0x338] sm:$0xff]  }
  0xdc   : > { %4201 = vmatprep.subr.bf16.mxu0 %v4550_v31  ;;  %v3737_v30 = vcombine.low %v5383_v62, %v871_v44  ;;  %v2227_v53 = vld [vmem:[#allocation3 + $0x4c] sm:$0x1]  ;;  %v2319_v31 = vshrl.u32 %v5426_v28, 16  ;;  %v5518_v28 = vld [vmem:[#allocation3 + $0x40] sm:$0xf] }
  0xdd   : > { %v2224_v3 = vld [vmem:[#allocation3 + $0x48] sm:$0xf]  ;;  %v2228_v62 = vsel %vm4969_vm4, 0, %v2227_v53  ;;  %v5441_v12 = vor.u32 %v2316_v9, %v2312_v14  ;;  %v2347_v9 = vrot.slane %v5373_v52, 1  ;;  %v5490_v53 = vcombine.low %v5416_v6, %v5419_v7 }
  0xde   : > { %4350 = vmatmul.mubr.bf16.vlgmr.msra.gmra.mrb[32].mxu0 %v5220_v11  ;;  %v2309_v11 = vrot.slane %v2307_v61, 1  ;;  %v2225_v45 = vsel %vm4959_vm10, 0, %v2224_v3  ;;  %1774 = vmatprep.mubr.bf16.mxu1 %v3737_v30  ;;  %2229 = vst [vmem:[#allocation3 + $0x4c] sm:$0x1] %v2228_v62  ;;  %v5464_v59 = vor.u32 %v2323_v41, %v2319_v31  ;;  %v2342_v61 = vshll.u32 %v5461_v38, 16  ;;  %v4577_v3 = vld [vmem:[#allocation5 + $0x3a0] sm:$0xff]  }
  0xdf   : > { %4202 = vmatpush3.bf16.msra.mxu0 %v4553_v55  ;;  %4353 = vmatprep.mubr.bf16.mxu0 %v5287_v56  ;;  %v5429_v56 = vcombine.low %v5419_v7, %v2241_v46  ;;  %2226 = vst [vmem:[#allocation3 + $0x48] sm:$0xf] %v2225_v45  ;;  %v4579_v55 = vld [vmem:[#allocation5 + $0x328] sm:$0xff]   ;;  %v4570_v46 = vld [vmem:[#allocation5 + $0x398] sm:$0xff]   ;;  %v2346_v30 = vrot.slane %v5370_v49, 1  ;;  %v4578_v62 = vld [vmem:[#allocation5 + $0x360] sm:$0xff]   ;;  %v3851_v52 = vcombine.low %v5397_v40, %v5416_v6 }
  0xe0   : > { %4203 = vmatprep.subr.bf16.mxu0 %v4557_v57  ;;  %1775 = vmatmul.mubr.bf16.gmra.mrb[28].mxu1 %v3736_v10  ;;  %v5439_v23 = vor.u32 %v2309_v11, %v2305_v39  ;;  %v2335_v57 = vshll.u32 %v5458_v60, 16  ;;  %v2344_v44 = vrot.slane %v2342_v61, 1  ;;  %v4586_v10 = vld [vmem:[#allocation5 + $0x2f0] sm:$0xff]   ;;  %v4591_v45 = vld [vmem:[#allocation5 + $0x2f8] sm:$0xff]   ;;  %v4581_v49 = vld [vmem:[#allocation5 + $0x3a8] sm:$0xff]   ;;  %v5504_v40 = vcombine.low %v5453_v43, %v5455_v18 }
  0xe1   : > { %3063 = vmatprep.mubr.bf16.mxu1 %v3843_v2  ;;  %v2328_v15 = vshll.u32 %v5429_v56, 16  ;;  %v2326_v36 = vshrl.u32 %v5429_v56, 16  ;;  %v4571_v2 = vld [vmem:[#allocation5 + $0x358] sm:$0xff]   ;;  %v4601_v6 = vld [vmem:[#allocation5 + $0x410] sm:$0xff]   ;;  %vm1928_vm10 = vcmask 1046528  }
  0xe2   : > { %v5451_v24 = vcombine.low %v5439_v23, %v5441_v12  ;;  %v2337_v54 = vrot.slane %v2335_v57, 1  ;;  %v5484_v14 = vor.u32 %v2344_v44, %v2340_v1  ;;  %v4603_v41 = vld [vmem:[#allocation5 + $0x3d0] sm:$0xff]   ;;  %v4613_v1 = vld [vmem:[#allocation5 + $0x3e8] sm:$0xff]  }
  0xe3   : > { %4204 = vmatpush3.bf16.msra.mxu0 %v4558_v47  ;;  %v2330_v33 = vrot.slane %v2328_v15, 1  ;;  %v4583_v47 = vld [vmem:[#allocation5 + $0x330] sm:$0xff]   ;;  %v4582_v15 = vld [vmem:[#allocation5 + $0x368] sm:$0xff]  }
  0xe4   : > { %4205 = vmatprep.subr.bf16.mxu0 %v4561_v32  ;;  %v2333_v32 = vshrl.u32 %v5458_v60, 16  ;;  %v4616_v44 = vld [vmem:[#allocation5 + $0x430] sm:$0xff]  }
  0xe5   : > { %v5466_v27 = vor.u32 %v2330_v33, %v2326_v36  ;;  %v4592_v36 = vld [vmem:[#allocation5 + $0x3b8] sm:$0xff]  }
  0xe6   : > { %4354 = vmatmul.mubr.bf16.gmra.mrb[36].mxu0 %v3738_v13  ;;  %v5482_v11 = vor.u32 %v2337_v54, %v2333_v32  ;;  %v4595_v13 = vld [vmem:[#allocation5 + $0x400] sm:$0xff]   ;;  %v4604_v33 = vld [vmem:[#allocation5 + $0x418] sm:$0xff]   ;;  %v2353_v32 = vrot.slane %v5461_v38, 1 }
  0xe7   : > { %4206 = vmatpush3.bf16.msra.mxu0 %v4564_v16  ;;  %3128 = vmatprep.mubr.bf16.mxu0 %v3845_v17  ;;  %v5478_v39 = vcombine.low %v5464_v59, %v5466_v27  ;;  %v3844_v17 = vcombine.low %v2346_v30, %v2347_v9  ;;  %v4621_v30 = vld [vmem:[#allocation5 + $0x3f8] sm:$0xff]  }
  0xe8   : > { %4207 = vmatprep.subr.bf16.mxu0 %v4568_v37  ;;  %3064 = vmatmul.mubr.bf16.vlgmr.msra.gmra.mrb[32].mxu1 %v3842_v22  ;;  %v5494_v16 = vcombine.low %v5482_v11, %v5484_v14  ;;  %v4596_v37 = vld [vmem:[#allocation5 + $0x3c0] sm:$0xff]   ;;  %v4599_v22 = vld [vmem:[#allocation5 + $0x3c8] sm:$0xff]  }
  0xe9   : > { %4242 = vmatpush3.bf16.msra.mxu1 %v4556_v34  ;;  %3071 = vmatprep.mubr.bf16.mxu1 %v5451_v24  ;;  %v4588_v34 = vld [vmem:[#allocation5 + $0x3b0] sm:$0xff]  }
  0xea   : > { %4243 = vmatprep.subr.bf16.mxu1 %v4559_v25  ;;  %v4589_v25 = vld [vmem:[#allocation5 + $0x370] sm:$0xff]  }
  0xeb   : > { %4208 = vmatpush3.bf16.msra.mxu0 %v4569_v29  ;;  %v2348_v29 = vrot.slane %v5400_v51, 1 }
  0xec   : > { %4209 = vmatprep.subr.bf16.mxu0 %v4572_v21  ;;  %v2349_v21 = vrot.slane %v5406_v8, 1  ;;  %v3857_v8 = vcombine.low %v5419_v7, %v5453_v43  ;;  %v3846_v7 = vcombine.low %v5411_v19, %v5439_v23  ;;  %v4608_v43 = vld [vmem:[#allocation5 + $0x420] sm:$0xff]   ;;  %v2352_v19 = vrot.slane %v5458_v60, 1  ;;  %v2247_v23 = vld [vmem:[#allocation3 + $0x44] sm:$0x1] }
  0xed   : > { %4244 = vmatpush3.bf16.msra.mxu1 %v4560_v4  ;;  %v3847_v31 = vcombine.low %v2347_v9, %v2348_v29  ;;  %v4598_v4 = vld [vmem:[#allocation5 + $0x440] sm:$0xff]   ;;  %v5528_v54 = vcombine.low %v5518_v28, %v2247_v23 }
  0xee   : > { %4245 = vmatprep.subr.bf16.mxu1 %v4566_v48  ;;  %v5506_v51 = vcombine.low %v2348_v29, %v2349_v21  ;;  %v4606_v48 = vld [vmem:[#allocation5 + $0x3d8] sm:$0xff]   ;;  %v3853_v57 = vcombine.low %v2349_v21, %v2350_v42 }
  0xef   : > { %4210 = vmatpush3.bf16.msra.mxu0 %v4575_v35  ;;  %v2351_v35 = vrot.slane %v5429_v56, 1  ;;  %v3863_v56 = vcombine.low %v5455_v18, %v5518_v28  ;;  %v3852_v18 = vcombine.low %v5441_v12, %v5464_v59  ;;  %v2362_v38 = vshll.u32 %v5528_v54, 16  ;;  %v4612_v59 = vld [vmem:[#allocation5 + $0x460] sm:$0xff]  }
  0xf0   : > { %4211 = vmatprep.subr.bf16.mxu0 %v4579_v55  ;;  %3072 = vmatmul.mubr.bf16.gmra.mrb[36].mxu1 %v5472_v5  ;;  %v4602_v55 = vld [vmem:[#allocation5 + $0x448] sm:$0xff]   ;;  %v2366_v12 = vrot.slane %v5528_v54, 1  ;;  %v2360_v9 = vshrl.u32 %v5528_v54, 16 }
  0xf1   : > { %4246 = vmatpush3.bf16.msra.mxu1 %v4567_v26  ;;  %3079 = vmatprep.mubr.bf16.mxu1 %v5478_v39  ;;  %v5516_v61 = vcombine.low %v2350_v42, %v2351_v35  ;;  %v4611_v26 = vld [vmem:[#allocation5 + $0x428] sm:$0xff]   ;;  %v3859_v60 = vcombine.low %v2351_v35, %v2352_v19 }
  0xf2   : > { %4247 = vmatprep.subr.bf16.mxu1 %v4570_v46  ;;  %v4609_v46 = vld [vmem:[#allocation5 + $0x458] sm:$0xff]  }
  0xf3   : > { %4212 = vmatpush3.bf16.msra.mxu0 %v4580_v20  ;;  %v4610_v20 = vld [vmem:[#allocation5 + $0x3e0] sm:$0xff]  }
  0xf4   : > { %4213 = vmatprep.subr.bf16.mxu0 %v4583_v47  ;;  %v4605_v47 = vld [vmem:[#allocation5 + $0x450] sm:$0xff]  }
  0xf5   : > { %4248 = vmatpush3.bf16.msra.mxu1 %v4571_v2  ;;  %v4619_v2 = vld [vmem:[#allocation5 + $0x438] sm:$0xff]  }
  0xf6   : > { %4249 = vmatprep.subr.bf16.mxu1 %v4577_v3  ;;  %v3858_v3 = vcombine.low %v5466_v27, %v5482_v11 }
  0xf7   : > { %4214 = vmatpush3.bf16.msra.mxu0 %v4586_v10  ;;  %v3862_v10 = vcombine.low %v2352_v19, %v2353_v32 }
  0xf8   : > { %4215 = vmatprep.subr.bf16.mxu0 %v4590_v63  ;;  %3080 = vmatmul.mubr.bf16.gmra.mrb[40].mxu1 %v5490_v53  ;;  %v4618_v63 = vld [vmem:[#allocation5 + $0x3f0] sm:$0xff]  }
  0xf9   : > { %4250 = vmatpush3.bf16.msra.mxu1 %v4578_v62  ;;  %3087 = vmatprep.mubr.bf16.mxu1 %v5494_v16  ;;  %v2249_v62 = vld [vmem:[#allocation3 + $0x4c] sm:$0x1] }
  0xfa   : > { %4251 = vmatprep.subr.bf16.mxu1 %v4581_v49  ;;  %v3865_v49 = vcombine.low %v2353_v32, %v2366_v12 }
  0xfb   : > { %4216 = vmatpush3.bf16.msra.mxu0 %v4591_v45  ;;  %v2364_v45 = vrot.slane %v2362_v38, 1 }
  0xfc   : > { %4281 = vmatprep.subr.bf16.mxu0 %v4595_v13  ;;  %v2248_v13 = vld [vmem:[#allocation3 + $0x48] sm:$0xf] }
  0xfd   : > { %4252 = vmatpush3.bf16.msra.mxu1 %v4582_v15  ;;  %v3866_v21 = vcombine.low %v5518_v28, %v2248_v13 }
  0xfe   : > { %3129 = vmatmul.mubr.bf16.vlgmr.msra.gmra.mrb[40].mxu0 %v3844_v17  ;;  %4253 = vmatprep.subr.bf16.mxu1 %v4588_v34  ;;  %v4617_v17 = vld [vmem:[#allocation5 + $0x468] sm:$0xff]  }
  0xff   : > { %4282 = vmatpush3.bf16.msra.mxu0 %v4596_v37  ;;  %3136 = vmatprep.mubr.bf16.mxu0 %v3851_v52  ;;  %v3841_v37 = vcombine.low %v2248_v13, %v2249_v62  ;;  %v2365_v52 = vor.u32 %v2364_v45, %v2360_v9 }
 0x100   : > { %4283 = vmatprep.subr.bf16.mxu0 %v4597_v58  ;;  %3088 = vmatmul.mubr.bf16.gmra.mrb[44].mxu1 %v5504_v40  ;;  %v4622_v58 = vld [vmem:[#allocation5 + $0x478] sm:$0xff]  }
 0x101   : > { %4254 = vmatpush3.bf16.msra.mxu1 %v4589_v25  ;;  %3193 = vmatprep.mubr.bf16.mxu1 %v3847_v31  ;;  %v2375_v27 = vshll.u32 %v3841_v37, 16  ;;  %v3864_v11 = vcombine.low %v5484_v14, %v2365_v52  ;;  %v2373_v15 = vshrl.u32 %v3841_v37, 16  ;;  %v2379_v14 = vrot.slane %v3841_v37, 1 }
 0x102   : > { %4255 = vmatprep.subr.bf16.mxu1 %v4592_v36 }
 0x103   : > { %4284 = vmatpush3.bf16.msra.mxu0 %v4599_v22  ;;  %v2377_v29 = vrot.slane %v2375_v27, 1  ;;  %v3868_v34 = vcombine.low %v2366_v12, %v2379_v14 }
 0x104   : > { %4285 = vmatprep.subr.bf16.mxu0 %v4601_v6 }
 0x105   : > { %4256 = vmatpush3.bf16.msra.mxu1 %v4594_v0 }
 0x106   : > { %3137 = vmatmul.mubr.bf16.gmra.mrb[44].mxu0 %v5506_v51  ;;  %4357 = vmatprep.subr.bf16.mxu1 %v4598_v4 }
 0x107   : > { %4286 = vmatpush3.bf16.msra.mxu0 %v4603_v41  ;;  %3144 = vmatprep.mubr.bf16.mxu0 %v3857_v8 }
 0x108   : > { %4287 = vmatprep.subr.bf16.mxu0 %v4604_v33  ;;  %3194 = vmatmul.mubr.bf16.vlgmr.msra.gmra.mrb[48].mxu1 %v3846_v7 }
 0x109   : > { %4358 = vmatpush3.bf16.msra.mxu1 %v4598_v4  ;;  %3201 = vmatprep.mubr.bf16.mxu1 %v3853_v57 }
 0x10a   : > { %4359 = vmatprep.subr.bf16.mxu1 %v4602_v55 }
 0x10b   : > { %4288 = vmatpush3.bf16.msra.mxu0 %v4606_v48 }
 0x10c   : > { %4289 = vmatprep.subr.bf16.mxu0 %v4608_v43 }
 0x10d   : > { %4360 = vmatpush3.bf16.msra.mxu1 %v4602_v55 }
 0x10e   : > { %3145 = vmatmul.mubr.bf16.gmra.mrb[48].mxu0 %v5516_v61  ;;  %4361 = vmatprep.subr.bf16.mxu1 %v4605_v47 }
 0x10f   : > { %4290 = vmatpush3.bf16.msra.mxu0 %v4610_v20  ;;  %3152 = vmatprep.mubr.bf16.mxu0 %v3863_v56 }
 0x110   : > { %4291 = vmatprep.subr.bf16.mxu0 %v4611_v26  ;;  %3202 = vmatmul.mubr.bf16.gmra.mrb[52].mxu1 %v3852_v18 }
 0x111   : > { %4362 = vmatpush3.bf16.msra.mxu1 %v4605_v47  ;;  %3209 = vmatprep.mubr.bf16.mxu1 %v3859_v60 }
 0x112   : > { %4363 = vmatprep.subr.bf16.mxu1 %v4609_v46 }
 0x113   : > { %4292 = vmatpush3.bf16.msra.mxu0 %v4613_v1 }
 0x114   : > { %4293 = vmatprep.subr.bf16.mxu0 %v4616_v44 }
 0x115   : > { %4364 = vmatpush3.bf16.msra.mxu1 %v4609_v46 }
 0x116   : > { %3153 = vmatmul.mubr.bf16.gmra.mrb[52].mxu0 %v3862_v10  ;;  %4365 = vmatprep.subr.bf16.mxu1 %v4612_v59 }
 0x117   : > { %4294 = vmatpush3.bf16.msra.mxu0 %v4618_v63  ;;  %3258 = vmatprep.mubr.bf16.mxu0 %v5451_v24  ;;  %v4620_v24 = vld [vmem:[#allocation5 + $0x470] sm:$0xff]  }
 0x118   : > { %4295 = vmatprep.subr.bf16.mxu0 %v4619_v2  ;;  %3210 = vmatmul.mubr.bf16.gmra.mrb[56].mxu1 %v3858_v3 }
 0x119   : > { %4366 = vmatpush3.bf16.msra.mxu1 %v4612_v59  ;;  %3217 = vmatprep.mubr.bf16.mxu1 %v3865_v49 }
 0x11a   : > { %4367 = vmatprep.subr.bf16.mxu1 %v4617_v17 }
 0x11b   : > { %4296 = vmatpush3.bf16.msra.mxu0 %v4621_v30 }
 0x11d   : > { %4368 = vmatpush3.bf16.msra.mxu1 %v4617_v17 }
 0x11e   : > { %3259 = vmatmul.mubr.bf16.vlgmr.msra.gmra.mrb[56].mxu0 %v5472_v5  ;;  %4369 = vmatprep.subr.bf16.mxu1 %v4620_v24  ;;  %v2378_v5 = vor.u32 %v2377_v29, %v2373_v15 }
 0x11f   : > { %3266 = vmatprep.mubr.bf16.mxu0 %v5478_v39 }
 0x120   : > { %3218 = vmatmul.mubr.bf16.gmra.mrb[60].mxu1 %v3864_v11  ;;  %v3867_v39 = vcombine.low %v2365_v52, %v2378_v5 }
 0x121   : > { %4370 = vmatpush3.bf16.msra.mxu1 %v4620_v24  ;;  %4373 = vmatprep.mubr.bf16.mxu1 %v5506_v51 }
 0x122   : > { %4371 = vmatprep.subr.bf16.mxu1 %v4622_v58 }
 0x125   : > { %4372 = vmatpush3.bf16.msra.mxu1 %v4622_v58 }
 0x126   : > { %3267 = vmatmul.mubr.bf16.gmra.mrb[60].mxu0 %v5490_v53 }
 0x127   : > { %3274 = vmatprep.mubr.bf16.mxu0 %v5494_v16 }
 0x128   : > { %4374 = vmatmul.mubr.bf16.vlgmr.msra.gmra.mrb[64].mxu1 %v5516_v61 }
 0x129   : > { %4377 = vmatprep.mubr.bf16.mxu1 %v3862_v10 }
 0x12e   : > { %3275 = vmatmul.mubr.bf16.gmra.mrb[64].mxu0 %v5504_v40 }
 0x12f   : > { %3282 = vmatprep.mubr.bf16.mxu0 %v3867_v39 }
 0x130   : > { %4378 = vmatmul.mubr.bf16.gmra.mrb[68].mxu1 %v3868_v34 }
 0x136   : > { %3283 = vmatmul.mubr.bf16.gmra.mrb[68].mxu0 %v3866_v21 }
 0x153   : > { %v4045_v22 = vpop.f32.mrb[0].mxu1 }
 0x154   : > { %v4046_v6 = vpop.f32.mrb[1].mxu1 }
 0x155   : > { %v4047_v53 = vadd.f32 %v4046_v6, %v4045_v22  ;;  %v4048_v25 = vpop.f32.mrb[2].mxu1 }
 0x156   : > { %v4049_v16 = vpop.f32.mrb[3].mxu1 }
 0x157   : > { %v4050_v31 = vadd.f32 %v4049_v16, %v4048_v25 }
 0x158   : > { %v4005_v36 = vpop.f32.mrb[0].mxu0 }
 0x159   : > { %v4006_v51 = vpop.f32.mrb[1].mxu0 }
 0x15a   : > { %v4007_v41 = vadd.f32 %v4006_v51, %v4005_v36  ;;  %v4008_v8 = vpop.f32.mrb[2].mxu0 }
 0x15b   : > { %v4009_v33 = vpop.f32.mrb[3].mxu0 }
 0x15c   : > { %v1623_v0 = vadd.f32 %v4047_v53, %v4007_v41  ;;  %v4010_v42 = vadd.f32 %v4009_v33, %v4008_v8 }
 0x15e   : > { %v1626_v40 = vadd.f32 %v4050_v31, %v4010_v42 }
 0x164   : > { %v4051_v4 = vpop.f32.mrb[4].mxu1 }
 0x165   : > { %v4052_v48 = vpop.f32.mrb[5].mxu1 }
 0x166   : > { %v4011_v35 = vpop.f32.mrb[4].mxu0  ;;  %v4053_v43 = vadd.f32 %v4052_v48, %v4051_v4  ;;  %v4054_v55 = vpop.f32.mrb[6].mxu1 }
 0x167   : > { %v4012_v7 = vpop.f32.mrb[5].mxu0  ;;  %v4055_v28 = vpop.f32.mrb[7].mxu1 }
 0x168   : > { %v4013_v57 = vadd.f32 %v4012_v7, %v4011_v35  ;;  %v4014_v61 = vpop.f32.mrb[6].mxu0  ;;  %v4056_v56 = vadd.f32 %v4055_v28, %v4054_v55 }
 0x169   : > { %v4015_v20 = vpop.f32.mrb[7].mxu0 }
 0x16a   : > { %v1631_v26 = vadd.f32 %v4053_v43, %v4013_v57  ;;  %v4016_v19 = vadd.f32 %v4015_v20, %v4014_v61 }
 0x16c   : > { %v1634_v23 = vadd.f32 %v4056_v56, %v4016_v19 }
 0x177   : > { %v4017_v47 = vpop.f32.mrb[8].mxu0  ;;  %v4057_v32 = vpop.f32.mrb[8].mxu1 }
 0x178   : > { %v4018_v1 = vpop.f32.mrb[9].mxu0  ;;  %v4058_v18 = vpop.f32.mrb[9].mxu1 }
 0x179   : > { %v4019_v54 = vadd.f32 %v4018_v1, %v4017_v47  ;;  %v4059_v44 = vadd.f32 %v4058_v18, %v4057_v32  ;;  %v4020_v60 = vpop.f32.mrb[10].mxu0  ;;  %v4060_v46 = vpop.f32.mrb[10].mxu1 }
 0x17a   : > { %v4021_v10 = vpop.f32.mrb[11].mxu0  ;;  %v4061_v63 = vpop.f32.mrb[11].mxu1 }
 0x17b   : > { %v1639_v38 = vadd.f32 %v4059_v44, %v4019_v54  ;;  %v4022_v2 = vadd.f32 %v4021_v10, %v4020_v60  ;;  %v4062_v12 = vadd.f32 %v4061_v63, %v4060_v46 }
 0x17d   : > { %v1642_v59 = vadd.f32 %v4062_v12, %v4022_v2 }
 0x188   : > { %v4063_v3 = vpop.f32.mrb[12].mxu1 }
 0x189   : > { %v4023_v30 = vpop.f32.mrb[12].mxu0  ;;  %v4064_v45 = vpop.f32.mrb[13].mxu1 }
 0x18a   : > { %v4024_v9 = vpop.f32.mrb[13].mxu0  ;;  %v4065_v62 = vadd.f32 %v4064_v45, %v4063_v3  ;;  %v4066_v17 = vpop.f32.mrb[14].mxu1 }
 0x18b   : > { %v4025_v13 = vadd.f32 %v4024_v9, %v4023_v30  ;;  %v4026_v49 = vpop.f32.mrb[14].mxu0  ;;  %v4067_v52 = vpop.f32.mrb[15].mxu1 }
 0x18c   : > { %v4027_v37 = vpop.f32.mrb[15].mxu0  ;;  %v4068_v11 = vadd.f32 %v4067_v52, %v4066_v17 }
 0x18d   : > { %v1647_v24 = vadd.f32 %v4065_v62, %v4025_v13  ;;  %v4028_v27 = vadd.f32 %v4027_v37, %v4026_v49 }
 0x18f   : > { %v1650_v58 = vadd.f32 %v4068_v11, %v4028_v27 }
 0x190   : > { %v4125_v29 = vpop.f32.mrb[16].mxu1 }
 0x191   : > { %v4085_v15 = vpop.f32.mrb[16].mxu0  ;;  %v4126_v39 = vpop.f32.mrb[17].mxu1 }
 0x192   : > { %v4086_v5 = vpop.f32.mrb[17].mxu0  ;;  %v4127_v21 = vadd.f32 %v4126_v39, %v4125_v29  ;;  %v4128_v22 = vpop.f32.mrb[18].mxu1 }
 0x193   : > { %v4087_v14 = vadd.f32 %v4086_v5, %v4085_v15  ;;  %v4088_v34 = vpop.f32.mrb[18].mxu0  ;;  %v4129_v53 = vpop.f32.mrb[19].mxu1 }
 0x194   : > { %v4089_v6 = vpop.f32.mrb[19].mxu0  ;;  %v4130_v31 = vadd.f32 %v4129_v53, %v4128_v22 }
 0x195   : > { %v1688_v25 = vadd.f32 %v4087_v14, %v1623_v0  ;;  %v4090_v16 = vadd.f32 %v4089_v6, %v4088_v34 }
 0x197   : > { %v1691_v36 = vadd.f32 %v4090_v16, %v1626_v40  ;;  %v1753_v51 = vadd.f32 %v4127_v21, %v1688_v25 }
 0x198   : > { %v4131_v8 = vpop.f32.mrb[20].mxu1 }
 0x199   : > { %v4091_v41 = vpop.f32.mrb[20].mxu0  ;;  %v1756_v33 = vadd.f32 %v4130_v31, %v1691_v36  ;;  %v4132_v4 = vpop.f32.mrb[21].mxu1 }
 0x19a   : > { %v4092_v42 = vpop.f32.mrb[21].mxu0  ;;  %v4133_v7 = vadd.f32 %v4132_v4, %v4131_v8  ;;  %v4134_v43 = vpop.f32.mrb[22].mxu1 }
 0x19b   : > { %v4093_v35 = vadd.f32 %v4092_v42, %v4091_v41  ;;  %v4094_v48 = vpop.f32.mrb[22].mxu0  ;;  %v4135_v57 = vpop.f32.mrb[23].mxu1 }
 0x19c   : > { %v4095_v55 = vpop.f32.mrb[23].mxu0  ;;  %v4136_v20 = vadd.f32 %v4135_v57, %v4134_v43 }
 0x19d   : > { %v1696_v61 = vadd.f32 %v4093_v35, %v1631_v26  ;;  %v4096_v28 = vadd.f32 %v4095_v55, %v4094_v48 }
 0x19f   : > { %v1699_v56 = vadd.f32 %v4096_v28, %v1634_v23  ;;  %v1761_v0 = vadd.f32 %v4133_v7, %v1696_v61 }
 0x1a0   : > { %v4137_v47 = vpop.f32.mrb[24].mxu1 }
 0x1a1   : > { %v4097_v19 = vpop.f32.mrb[24].mxu0  ;;  %v1764_v40 = vadd.f32 %v4136_v20, %v1699_v56  ;;  %v4138_v1 = vpop.f32.mrb[25].mxu1 }
 0x1a2   : > { %v4098_v32 = vpop.f32.mrb[25].mxu0  ;;  %v4139_v44 = vadd.f32 %v4138_v1, %v4137_v47  ;;  %v4140_v60 = vpop.f32.mrb[26].mxu1 }
 0x1a3   : > { %v4099_v18 = vadd.f32 %v4098_v32, %v4097_v19  ;;  %v4100_v54 = vpop.f32.mrb[26].mxu0  ;;  %v4141_v10 = vpop.f32.mrb[27].mxu1 }
 0x1a4   : > { %v4101_v46 = vpop.f32.mrb[27].mxu0  ;;  %v4142_v12 = vadd.f32 %v4141_v10, %v4140_v60 }
 0x1a5   : > { %v1704_v63 = vadd.f32 %v4099_v18, %v1639_v38  ;;  %v4102_v2 = vadd.f32 %v4101_v46, %v4100_v54 }
 0x1a7   : > { %v1707_v30 = vadd.f32 %v4102_v2, %v1642_v59  ;;  %v1769_v26 = vadd.f32 %v4139_v44, %v1704_v63 }
 0x1a9   : > { %v4103_v3 = vpop.f32.mrb[28].mxu0  ;;  %v1772_v9 = vadd.f32 %v4142_v12, %v1707_v30 }
 0x1aa   : > { %v4104_v23 = vpop.f32.mrb[29].mxu0 }
 0x1ab   : > { %v4105_v45 = vadd.f32 %v4104_v23, %v4103_v3  ;;  %v4106_v13 = vpop.f32.mrb[30].mxu0 }
 0x1ac   : > { %v4107_v62 = vpop.f32.mrb[31].mxu0 }
 0x1ad   : > { %v1712_v49 = vadd.f32 %v4105_v45, %v1647_v24  ;;  %v4108_v17 = vadd.f32 %v4107_v62, %v4106_v13 }
 0x1af   : > { %v1715_v37 = vadd.f32 %v4108_v17, %v1650_v58 }
 0x1b1   : > { %v4351_v52 = vpop.f32.mrb[32].mxu0 }
 0x1b2   : > { %v5545_v27 = vadd.f32 %v4351_v52, %v1761_v0  ;;  %v1817_v11 = vpop.f32.mrb[33].mxu0 }
 0x1b3   : > { %v5547_v15 = vadd.f32 %v1817_v11, %v1753_v51  ;;  %v4352_v38 = vpop.f32.mrb[34].mxu0  ;;  %v4143_v39 = vpop.f32.mrb[28].mxu1 }
 0x1b4   : > { %v5549_v29 = vadd.f32 %v4352_v38, %v1764_v40  ;;  %v1820_v59 = vpop.f32.mrb[35].mxu0  ;;  %v4144_v14 = vpop.f32.mrb[29].mxu1 }
 0x1b5   : > { %v5551_v5 = vadd.f32 %v1820_v59, %v1756_v33  ;;  %v4145_v34 = vadd.f32 %v4144_v14, %v4143_v39  ;;  %v4146_v21 = vpop.f32.mrb[30].mxu1 }
 0x1b6   : > { %v4147_v24 = vpop.f32.mrb[31].mxu1 }
 0x1b7   : > { %v4148_v58 = vadd.f32 %v4147_v24, %v4146_v21  ;;  %v1777_v25 = vadd.f32 %v4145_v34, %v1712_v49 }
 0x1b9   : > { %v4355_v22 = vpop.f32.mrb[36].mxu0  ;;  %v1780_v36 = vadd.f32 %v4148_v58, %v1715_v37 }
 0x1ba   : > { %v1833_v6 = vpop.f32.mrb[37].mxu0  ;;  %v5555_v51 = vadd.f32 %v4355_v22, %v1777_v25 }
 0x1bb   : > { %v4356_v53 = vpop.f32.mrb[38].mxu0  ;;  %v5553_v31 = vadd.f32 %v1833_v6, %v1769_v26  ;;  %v4177_v33 = vpop.f32.mrb[32].mxu1 }
 0x1bc   : > { %v1836_v16 = vpop.f32.mrb[39].mxu0  ;;  %v5559_v8 = vadd.f32 %v4356_v53, %v1780_v36  ;;  %v4178_v42 = vpop.f32.mrb[33].mxu1  ;;  %v1850_v53 = vsub.s32 1, %v4912_v50 }
 0x1bd   : > { %v5557_v41 = vadd.f32 %v1836_v16, %v1772_v9  ;;  %v4179_v4 = vadd.f32 %v4178_v42, %v4177_v33  ;;  %v4180_v35 = vpop.f32.mrb[34].mxu1 }
 0x1be   : > { %v4181_v48 = vpop.f32.mrb[35].mxu1 }
 0x1bf   : > { %v4182_v7 = vadd.f32 %v4181_v48, %v4180_v35  ;;  %v4625_v35 = vld [vmem:[%s5872_s1] sm:$0x1f] }
 0x1c0   : > { %v5573_v48 = vrot.slane %v4625_v35, %v1850_v53 }
 0x1c3   : > { %v4183_v43 = vpop.f32.mrb[36].mxu1 }
 0x1c4   : > { %v4184_v55 = vpop.f32.mrb[37].mxu1 }
 0x1c5   : > { %v4185_v57 = vadd.f32 %v4184_v55, %v4183_v43  ;;  %v4186_v61 = vpop.f32.mrb[38].mxu1 }
 0x1c6   : > { %v4187_v28 = vpop.f32.mrb[39].mxu1 }
 0x1c7   : > { %v4188_v20 = vadd.f32 %v4187_v28, %v4186_v61  ;;  %v1882_v28 = vsub.s32 3, %v4912_v50 }
 0x1cb   : > { %v4189_v56 = vpop.f32.mrb[40].mxu1 }
 0x1cc   : > { %v4190_v0 = vpop.f32.mrb[41].mxu1 }
 0x1cd   : > { %v4191_v19 = vadd.f32 %v4190_v0, %v4189_v56  ;;  %v4192_v47 = vpop.f32.mrb[42].mxu1 }
 0x1ce   : > { %v4193_v32 = vpop.f32.mrb[43].mxu1 }
 0x1cf   : > { %v4194_v18 = vadd.f32 %v4193_v32, %v4192_v47 }
 0x1d1   : > { %v4217_v40 = vpop.f32.mrb[40].mxu0 }
 0x1d2   : > { %v4218_v1 = vpop.f32.mrb[41].mxu0 }
 0x1d3   : > { %v4219_v54 = vadd.f32 %v4218_v1, %v4217_v40  ;;  %v4220_v44 = vpop.f32.mrb[42].mxu0  ;;  %v4195_v63 = vpop.f32.mrb[44].mxu1 }
 0x1d4   : > { %v4221_v60 = vpop.f32.mrb[43].mxu0  ;;  %v4196_v12 = vpop.f32.mrb[45].mxu1 }
 0x1d5   : > { %v3131_v46 = vadd.f32 %v4219_v54, %v4179_v4  ;;  %v4222_v10 = vadd.f32 %v4221_v60, %v4220_v44  ;;  %v4197_v30 = vadd.f32 %v4196_v12, %v4195_v63  ;;  %v4198_v26 = vpop.f32.mrb[46].mxu1  ;;  %v1854_v54 = vmul.f32 %v5573_v48, %v5545_v27  ;;  %v4627_v60 = vld [vmem:[#allocation2 + $0x38] sm:$0x3] }
 0x1d6   : > { %v4199_v9 = vpop.f32.mrb[47].mxu1  ;;  %v1853_v27 = vmul.f32 %v5573_v48, %v5551_v5 }
 0x1d7   : > { %v3134_v2 = vadd.f32 %v4222_v10, %v4182_v7  ;;  %v4200_v45 = vadd.f32 %v4199_v9, %v4198_v26  ;;  %v1862_v7 = vsub.s32 2, %v4912_v50  ;;  %v1852_v10 = vmul.f32 %v5573_v48, %v5547_v15 }
 0x1d8   : > { %v5598_v9 = vrot.slane %v4625_v35, %v1882_v28 }
 0x1d9   : > { %v4223_v3 = vpop.f32.mrb[44].mxu0  ;;  %v5584_v44 = vrot.slane %v4625_v35, %v1862_v7 }
 0x1da   : > { %v4224_v23 = vpop.f32.mrb[45].mxu0 }
 0x1db   : > { %v4225_v13 = vadd.f32 %v4224_v23, %v4223_v3  ;;  %v4226_v62 = vpop.f32.mrb[46].mxu0  ;;  %v4257_v52 = vpop.f32.mrb[48].mxu1  ;;  %v1866_v15 = vadd.f32 %v5584_v44, %v1854_v54 }
 0x1dc   : > { %v4227_v49 = vpop.f32.mrb[47].mxu0  ;;  %v4258_v38 = vpop.f32.mrb[49].mxu1 }
 0x1dd   : > { %v3139_v17 = vadd.f32 %v4225_v13, %v4185_v57  ;;  %v4228_v37 = vadd.f32 %v4227_v49, %v4226_v62  ;;  %v4259_v59 = vadd.f32 %v4258_v38, %v4257_v52  ;;  %v4260_v39 = vpop.f32.mrb[50].mxu1  ;;  %v4628_v62 = vld [vmem:[#allocation2 + $0x10] sm:$0xff]  ;;  %vm1874_vm4 = vcmp.ge.f32.partialorder %v1866_v15, 0.0 }
 0x1de   : > { %v4261_v34 = vpop.f32.mrb[51].mxu1  ;;  %v1929_v49 = vrot.slane %v4628_v62, 1 }
 0x1df   : > { %v3142_v11 = vadd.f32 %v4228_v37, %v4188_v20  ;;  %v5561_v22 = vadd.f32 %v4259_v59, %v3131_v46  ;;  %v4262_v24 = vadd.f32 %v4261_v34, %v4260_v39  ;;  %v1902_v20 = vsub.s32 4, %v4912_v50  ;;  %v4630_v39 = vld [vmem:[#allocation2 + $0x40] sm:$0xff]  ;;  %v4631_v34 = vld [vmem:[#allocation2 + $0x48] sm:$0x3] }
 0x1e0   : > { %v1936_v46 = vrot.slane %v4627_v60, 1 }
 0x1e1   : > { %v4229_v14 = vpop.f32.mrb[48].mxu0  ;;  %v5564_v16 = vadd.f32 %v4262_v24, %v3134_v2  ;;  %v1855_v2 = vmul.f32 %v5573_v48, %v5549_v29  ;;  %v1864_v29 = vadd.f32 %v5584_v44, %v1852_v10  ;;  %v5606_v52 = vrot.slane %v4625_v35, %v1902_v20  ;;  %v5634_v10 = vld [vmem:[#allocation2 + $0x70] sm:$0xff] }
 0x1e2   : > { %v4230_v21 = vpop.f32.mrb[49].mxu0  ;;  %v1865_v24 = vadd.f32 %v5584_v44, %v1853_v27 }
 0x1e3   : > { %v4231_v6 = vadd.f32 %v4230_v21, %v4229_v14  ;;  %v4232_v58 = vpop.f32.mrb[50].mxu0  ;;  %v4263_v42 = vpop.f32.mrb[52].mxu1  ;;  %v1938_v14 = vrot.slane %v4630_v39, 1  ;;  %v1939_v21 = vrot.slane %v4631_v34, 1  ;;  %vm1872_vm14 = vcmp.ge.f32.partialorder %v1864_v29, 0.0 }
 0x1e4   : > { %v4233_v25 = vpop.f32.mrb[51].mxu0  ;;  %v4264_v43 = vpop.f32.mrb[53].mxu1  ;;  %v1885_v60 = vmul.f32 %v5598_v9, %v1865_v24  ;;  %vm1873_vm0 = vcmp.ge.f32.partialorder %v1865_v24, 0.0  ;;  %v1856_v34 = vmul.f32 %v5573_v48, %v5553_v31 }
 0x1e5   : > { %v3147_v36 = vadd.f32 %v4231_v6, %v4191_v19  ;;  %v4234_v33 = vadd.f32 %v4233_v25, %v4232_v58  ;;  %v4265_v55 = vadd.f32 %v4264_v43, %v4263_v42  ;;  %v4266_v57 = vpop.f32.mrb[54].mxu1  ;;  %v4626_v19 = vld [vmem:[#allocation2 + $0x30] sm:$0xff]  ;;  %v4632_v6 = vld [vmem:[#allocation2 + $0x20] sm:$0xff]  ;;  %v4633_v42 = vld [vmem:[#allocation2 + $0x28] sm:$0x3]  ;;  %v5628_v54 = vsel %vm1928_vm10, %v1938_v14, %v1939_v21 }
 0x1e6   : > { %v4267_v56 = vpop.f32.mrb[55].mxu1  ;;  %v1935_v47 = vrot.slane %v4626_v19, 1  ;;  %v1932_v58 = vrot.slane %v4632_v6, 1  ;;  %v1933_v35 = vrot.slane %v4633_v42, 1  ;;  %v1893_v14 = vsel %vm1873_vm0, %v1865_v24, %v1885_v60  ;;  %v5652_v21 = vld [vmem:[#allocation2 + $0x60] sm:$0xff] }
 0x1e7   : > { %v5566_v4 = vadd.f32 %v4234_v33, %v4194_v18  ;;  %v5578_v40 = vadd.f32 %v4265_v55, %v3139_v17  ;;  %v4268_v32 = vadd.f32 %v4267_v56, %v4266_v57  ;;  %v1886_v56 = vmul.f32 %v5598_v9, %v1866_v15 }
 0x1e8   : > { %v5609_v5 = vsel %vm1928_vm10, %v1935_v47, %v1936_v46  ;;  %v5632_v46 = vsel %vm1928_vm10, %v1932_v58, %v1933_v35  ;;  %v1944_v6 = vrot.slane %v5652_v21, 1  ;;  %v5655_v58 = vld [vmem:[#allocation2 + $0x68] sm:$0x3]  ;;  %v1868_v60 = vadd.f32 %v5584_v44, %v1856_v34 }
 0x1e9   : > { %v4235_v61 = vpop.f32.mrb[52].mxu0  ;;  %v5590_v12 = vadd.f32 %v4268_v32, %v3142_v11  ;;  %v1867_v11 = vadd.f32 %v5584_v44, %v1855_v2 }
 0x1ea   : > { %v4236_v0 = vpop.f32.mrb[53].mxu0  ;;  %vm1876_vm1 = vcmp.ge.f32.partialorder %v1868_v60, 0.0 }
 0x1eb   : > { %v4237_v1 = vadd.f32 %v4236_v0, %v4235_v61  ;;  %v4238_v18 = vpop.f32.mrb[54].mxu0  ;;  %v4269_v23 = vpop.f32.mrb[56].mxu1  ;;  %v1884_v0 = vmul.f32 %v5598_v9, %v1864_v29  ;;  %v1887_v32 = vmul.f32 %v5598_v9, %v1867_v11  ;;  %vm1875_vm15 = vcmp.ge.f32.partialorder %v1867_v11, 0.0 }
 0x1ec   : > { %v4239_v63 = vpop.f32.mrb[55].mxu0  ;;  %v4270_v37 = vpop.f32.mrb[57].mxu1 }
 0x1ed   : > { %v5592_v26 = vadd.f32 %v4237_v1, %v4197_v30  ;;  %v4240_v3 = vadd.f32 %v4239_v63, %v4238_v18  ;;  %v4629_v30 = vld [vmem:[#allocation2 + $0x18] sm:$0x3]  ;;  %v4272_v38 = vpop.f32.mrb[58].mxu1 }
 0x1ee   : > { %v1930_v17 = vrot.slane %v4629_v30, 1  ;;  %v4273_v25 = vpop.f32.mrb[59].mxu1 }
 0x1ef   : > { %v5600_v13 = vadd.f32 %v4240_v3, %v4200_v45  ;;  %v4271_v45 = vadd.f32 %v4270_v37, %v4269_v23  ;;  %v4274_v55 = vadd.f32 %v4273_v25, %v4272_v38  ;;  %v5641_v3 = vld [vmem:[#allocation2 + $0x78] sm:$0x3]  ;;  %v4636_v23 = vld [vmem:[#allocation2 + $0x50] sm:$0xff]  ;;  %v1892_v37 = vsel %vm1872_vm14, %v1864_v29, %v1884_v0  ;;  %v5646_v38 = vld [vmem:[#allocation2 + $0x80] sm:$0xff] }
 0x1f0   : > { %v5618_v19 = vsel %vm1928_vm10, %v1929_v49, %v1930_v17  ;;  %v1948_v27 = vrot.slane %v5641_v3, 1  ;;  %v1941_v62 = vrot.slane %v4636_v23, 1  ;;  %v4637_v49 = vld [vmem:[#allocation2 + $0x58] sm:$0x3]  ;;  %v1945_v29 = vrot.slane %v5655_v58, 1 }
 0x1f1   : > { %v4297_v59 = vpop.f32.mrb[56].mxu0  ;;  %v5613_v43 = vadd.f32 %v4271_v45, %v3147_v36  ;;  %v5622_v1 = vadd.f32 %v4274_v55, %v5566_v4  ;;  %v1947_v4 = vrot.slane %v5634_v10, 1  ;;  %v1942_v30 = vrot.slane %v4637_v49, 1 }
 0x1f2   : > { %v4298_v33 = vpop.f32.mrb[57].mxu0  ;;  %v1895_v45 = vsel %vm1875_vm15, %v1867_v11, %v1887_v32  ;;  %v1904_v31 = vadd.f32 %v5606_v52, %v1892_v37 }
 0x1f3   : > { %v4299_v57 = vadd.f32 %v4298_v33, %v4297_v59  ;;  %v4300_v61 = vpop.f32.mrb[58].mxu0  ;;  %v4275_v63 = vpop.f32.mrb[60].mxu1 }
 0x1f4   : > { %v4301_v47 = vpop.f32.mrb[59].mxu0  ;;  %v4276_v17 = vpop.f32.mrb[61].mxu1 }
 0x1f5   : > { %v4302_v18 = vadd.f32 %v4301_v47, %v4300_v61  ;;  %v5625_v36 = vadd.f32 %v4299_v57, %v5561_v22  ;;  %v1894_v22 = vsel %vm1874_vm4, %v1866_v15, %v1886_v56  ;;  %v4277_v59 = vadd.f32 %v4276_v17, %v4275_v63  ;;  %v4278_v39 = vpop.f32.mrb[62].mxu1 }
 0x1f6   : > { %v4279_v11 = vpop.f32.mrb[63].mxu1  ;;  %v1906_v33 = vadd.f32 %v5606_v52, %v1894_v22  ;;  %v1907_v57 = vadd.f32 %v5606_v52, %v1895_v45  ;;  %v1858_v61 = vmul.f32 %v5573_v48, %v5555_v51  ;;  %v1857_v56 = vmul.f32 %v5573_v48, %v5557_v41  ;;  %v4641_v51 = vld [vmem:[%s5872_s1 + $0x8] sm:$0x1f] }
 0x1f7   : > { %v5638_v2 = vadd.f32 %v4302_v18, %v5564_v16  ;;  %v1950_v16 = vrot.slane %v5646_v38, 1  ;;  %v5660_v42 = vadd.f32 %v4277_v59, %v5592_v26  ;;  %v4280_v35 = vadd.f32 %v4279_v11, %v4278_v39 }
 0x1f8   : > { %v1905_v47 = vadd.f32 %v5606_v52, %v1893_v14  ;;  %v5675_v63 = vsel %vm1928_vm10, %v1941_v62, %v1942_v30  ;;  %v5682_v41 = vrot.slane %v4641_v51, %v1850_v53  ;;  %v5692_v23 = vrot.slane %v4641_v51, %v1882_v28 }
 0x1f9   : > { %v4303_v15 = vpop.f32.mrb[60].mxu0  ;;  %v5670_v32 = vadd.f32 %v4280_v35, %v5600_v13  ;;  %v5686_v13 = vrot.slane %v4641_v51, %v1862_v7  ;;  %v5696_v62 = vrot.slane %v4641_v51, %v1902_v20  ;;  %v5700_v53 = vadd.f32 %v5609_v5, %v1906_v33 }
 0x1fa   : > { %v4304_v25 = vpop.f32.mrb[61].mxu0  ;;  %v5703_v7 = vadd.f32 %v5584_v44, %v1858_v61  ;;  %v5706_v30 = vadd.f32 %v5584_v44, %v1857_v56  ;;  %v5709_v28 = vadd.f32 %v5618_v19, %v1904_v31  ;;  %v5712_v50 = vadd.f32 %v5628_v54, %v1907_v57 }
 0x1fb   : > { %v4305_v24 = vadd.f32 %v4304_v25, %v4303_v15  ;;  %v4306_v55 = vpop.f32.mrb[62].mxu0  ;;  %v4375_v22 = vpop.f32.mrb[64].mxu1  ;;  %v5715_v20 = vadd.f32 %v5632_v46, %v1905_v47  ;;  %v1888_v45 = vmul.f32 %v5598_v9, %v1868_v60 }
 0x1fc   : > { %v4307_v0 = vpop.f32.mrb[63].mxu0  ;;  %vm1877_vm2 = vcmp.ge.f32.partialorder %v5706_v30, 0.0  ;;  %v1889_v56 = vmul.f32 %v5598_v9, %v5706_v30  ;;  %vm1878_vm7 = vcmp.ge.f32.partialorder %v5703_v7, 0.0 }
 0x1fd   : > { %v3269_v26 = vadd.f32 %v4305_v24, %v5578_v40  ;;  %v4308_v18 = vadd.f32 %v4307_v0, %v4306_v55  ;;  %v1859_v40 = vmul.f32 %v5573_v48, %v5559_v8  ;;  %v3325_v8 = vpop.f32.mrb[65].mxu1 }
 0x1fe   : > { %v4376_v17 = vpop.f32.mrb[66].mxu1 }
 0x1ff   : > { %v3272_v49 = vadd.f32 %v4308_v18, %v5590_v12  ;;  %v3334_v48 = vadd.f32 %v4375_v22, %v3269_v26  ;;  %v3326_v12 = vadd.f32 %v3325_v8, %v5625_v36  ;;  %v3328_v59 = vpop.f32.mrb[67].mxu1  ;;  %v5721_v34 = vadd.f32 %v5584_v44, %v1859_v40 }
 0x200   : > { %v3329_v25 = vadd.f32 %v3328_v59, %v5638_v2  ;;  %v5727_v36 = vmul.f32 %v5598_v9, %v5703_v7  ;;  %v1896_v22 = vsel %vm1876_vm1, %v1868_v60, %v1888_v45 }
 0x201   : > { %v4309_v37 = vpop.f32.mrb[64].mxu0  ;;  %v3362_v39 = vmul.f32 %v5682_v41, %v3334_v48  ;;  %v3337_v15 = vadd.f32 %v4376_v17, %v3272_v49  ;;  %v3360_v11 = vmul.f32 %v5682_v41, %v3326_v12  ;;  %vm1879_vm12 = vcmp.ge.f32.partialorder %v5721_v34, 0.0 }
 0x202   : > { %v4310_v14 = vpop.f32.mrb[65].mxu0  ;;  %v3361_v57 = vmul.f32 %v5682_v41, %v3329_v25 }
 0x203   : > { %v4311_v33 = vadd.f32 %v4310_v14, %v4309_v37  ;;  %v4312_v35 = vpop.f32.mrb[66].mxu0  ;;  %v3374_v24 = vadd.f32 %v5686_v13, %v3362_v39  ;;  %v3363_v55 = vmul.f32 %v5682_v41, %v3337_v15  ;;  %v3372_v44 = vadd.f32 %v5686_v13, %v3360_v11  ;;  %v4379_v51 = vpop.f32.mrb[68].mxu1 }
 0x204   : > { %v4313_v31 = vpop.f32.mrb[67].mxu0  ;;  %v3373_v18 = vadd.f32 %v5686_v13, %v3361_v57  ;;  %v3341_v8 = vpop.f32.mrb[69].mxu1 }
 0x205   : > { %v4314_v61 = vadd.f32 %v4313_v31, %v4312_v35  ;;  %v3277_v2 = vadd.f32 %v4311_v33, %v5613_v43  ;;  %vm3382_vm3 = vcmp.ge.f32.partialorder %v3374_v24, 0.0  ;;  %v3394_v0 = vmul.f32 %v5692_v23, %v3374_v24  ;;  %v4380_v37 = vpop.f32.mrb[70].mxu1 }
 0x206   : > { %v3375_v47 = vadd.f32 %v5686_v13, %v3363_v55  ;;  %vm3380_vm5 = vcmp.ge.f32.partialorder %v3372_v44, 0.0  ;;  %v3392_v26 = vmul.f32 %v5692_v23, %v3372_v44  ;;  %vm3381_vm8 = vcmp.ge.f32.partialorder %v3373_v18, 0.0  ;;  %v3344_v15 = vpop.f32.mrb[71].mxu1 }
 0x207   : > { %v3280_v40 = vadd.f32 %v4314_v61, %v5622_v1  ;;  %v3402_v49 = vsel %vm3382_vm3, %v3374_v24, %v3394_v0  ;;  %v3393_v12 = vmul.f32 %v5692_v23, %v3373_v18  ;;  %v1891_v1 = vmul.f32 %v5598_v9, %v5721_v34 }
 0x208   : > { %vm3383_vm6 = vcmp.ge.f32.partialorder %v3375_v47, 0.0  ;;  %v3395_v43 = vmul.f32 %v5692_v23, %v3375_v47  ;;  %v3400_v48 = vsel %vm3380_vm5, %v3372_v44, %v3392_v26  ;;  %v3414_v17 = vadd.f32 %v5696_v62, %v3402_v49 }
 0x209   : > { %v4315_v59 = vpop.f32.mrb[68].mxu0  ;;  %v3412_v60 = vadd.f32 %v5696_v62, %v3400_v48  ;;  %v3342_v39 = vadd.f32 %v3341_v8, %v3277_v2  ;;  %v3401_v11 = vsel %vm3381_vm8, %v3373_v18, %v3393_v12  ;;  %v3345_v35 = vadd.f32 %v3344_v15, %v3280_v40 }
 0x20a   : > { %v3403_v45 = vsel %vm3383_vm6, %v3375_v47, %v3395_v43  ;;  %v4316_v14 = vpop.f32.mrb[69].mxu0  ;;  %v3422_v25 = vadd.f32 %v3414_v17, %v5609_v5  ;;  %v3413_v31 = vadd.f32 %v5696_v62, %v3401_v11  ;;  %v1897_v40 = vsel %vm1877_vm2, %v5706_v30, %v1889_v56  ;;  %v4642_v17 = vld [vmem:[#allocation2 + $0x88] sm:$0x3] }
 0x20b   : > { %v3415_v33 = vadd.f32 %v5696_v62, %v3403_v45  ;;  %v4318_v24 = vpop.f32.mrb[70].mxu0  ;;  %v3420_v55 = vadd.f32 %v3412_v60, %v5618_v19  ;;  %v3364_v9 = vmul.f32 %v5682_v41, %v3342_v39  ;;  %v4317_v44 = vadd.f32 %v4316_v14, %v4315_v59 }
 0x20c   : > { %v4319_v57 = vpop.f32.mrb[71].mxu0  ;;  %v3430_v61 = vadd.f32 %v3422_v25, %v5700_v53  ;;  %v3365_v5 = vmul.f32 %v5682_v41, %v3345_v35  ;;  %v3421_v26 = vadd.f32 %v3413_v31, %v5632_v46  ;;  %v1898_v12 = vsel %vm1878_vm7, %v5703_v7, %v5727_v36 }
 0x20d   : > { %v3423_v2 = vadd.f32 %v3415_v33, %v5628_v54  ;;  %v4320_v0 = vadd.f32 %v4319_v57, %v4318_v24  ;;  %v3428_v47 = vadd.f32 %v3420_v55, %v5709_v28  ;;  %v3376_v19 = vadd.f32 %v5686_v13, %v3364_v9 }
 0x20e   : > { %v3285_v18 = vadd.f32 %v4317_v44, %v5660_v42  ;;  %3438 = vst [vmem:[%s4910_s5 + $0x10] sm:$0xff] %v3430_v61  ;;  %v3377_v53 = vadd.f32 %v5686_v13, %v3365_v5  ;;  %v3429_v28 = vadd.f32 %v3421_v26, %v5715_v20  ;;  %v1908_v42 = vadd.f32 %v5606_v52, %v1896_v22 }
 0x20f   : > { %v3431_v54 = vadd.f32 %v3423_v2, %v5712_v50  ;;  %v3288_v49 = vadd.f32 %v4320_v0, %v5670_v32  ;;  %3436 = vst [vmem:[%s4910_s5] sm:$0xff] %v3428_v47  ;;  %vm3384_vm9 = vcmp.ge.f32.partialorder %v3376_v19, 0.0  ;;  %v3396_v46 = vmul.f32 %v5692_v23, %v3376_v19 }
 0x210   : > { %v3350_v43 = vadd.f32 %v4379_v51, %v3285_v18  ;;  %vm3385_vm11 = vcmp.ge.f32.partialorder %v3377_v53, 0.0  ;;  %v3397_v30 = vmul.f32 %v5692_v23, %v3377_v53  ;;  %v1909_v50 = vadd.f32 %v5606_v52, %v1897_v40  ;;  %3437 = vst [vmem:[%s4910_s5 + $0x8] sm:$0xff] %v3429_v28 }
 0x211   : > { %3439 = vst [vmem:[%s4910_s5 + $0x18] sm:$0xff] %v3431_v54  ;;  %v3353_v56 = vadd.f32 %v4380_v37, %v3288_v49  ;;  %v3404_v32 = vsel %vm3384_vm9, %v3376_v19, %v3396_v46  ;;  %v1946_v20 = vsel %vm1928_vm10, %v1944_v6, %v1945_v29  ;;  %v1951_v37 = vrot.slane %v4642_v17, 1 }
 0x212   : > { %v3366_v8 = vmul.f32 %v5682_v41, %v3350_v43  ;;  %v3416_v51 = vadd.f32 %v5696_v62, %v3404_v32  ;;  %v3405_v22 = vsel %vm3385_vm11, %v3377_v53, %v3397_v30  ;;  %v1965_v21 = vadd.f32 %v5675_v63, %v1908_v42 }
 0x213   : > { %v3367_v48 = vmul.f32 %v5682_v41, %v3353_v56  ;;  %v3417_v59 = vadd.f32 %v5696_v62, %v3405_v22  ;;  %v1899_v6 = vsel %vm1879_vm12, %v5721_v34, %v1891_v1  ;;  %v1966_v60 = vadd.f32 %v1946_v20, %v1909_v50 }
 0x214   : > { %v3378_v58 = vadd.f32 %v5686_v13, %v3366_v8  ;;  %v3424_v29 = vadd.f32 %v3416_v51, %v5675_v63  ;;  %v1910_v36 = vadd.f32 %v5606_v52, %v1898_v12  ;;  %v1949_v63 = vsel %vm1928_vm10, %v1947_v4, %v1948_v27 }
 0x215   : > { %v3379_v41 = vadd.f32 %v5686_v13, %v3367_v48  ;;  %v3425_v45 = vadd.f32 %v3417_v59, %v1946_v20  ;;  %v1911_v13 = vadd.f32 %v5606_v52, %v1899_v6  ;;  %v1952_v14 = vsel %vm1928_vm10, %v1950_v16, %v1951_v37 }
 0x216   : > { %vm3386_vm13 = vcmp.ge.f32.partialorder %v3378_v58, 0.0  ;;  %v3398_v7 = vmul.f32 %v5692_v23, %v3378_v58  ;;  %v3432_v39 = vadd.f32 %v3424_v29, %v1965_v21  ;;  %v1967_v52 = vadd.f32 %v1949_v63, %v1910_v36 }
 0x217   : > { %vm3387_vm4 = vcmp.ge.f32.partialorder %v3379_v41, 0.0  ;;  %v3399_v15 = vmul.f32 %v5692_v23, %v3379_v41  ;;  %v3433_v34 = vadd.f32 %v3425_v45, %v1966_v60  ;;  %v1968_v3 = vadd.f32 %v1952_v14, %v1911_v13 }
 0x218   : > { %v3406_v1 = vsel %vm3386_vm13, %v3378_v58, %v3398_v7  ;;  %3440 = vst [vmem:[%s4910_s5 + $0x20] sm:$0xff] %v3432_v39 }
 0x219   : > { %v3418_v11 = vadd.f32 %v5696_v62, %v3406_v1  ;;  %v3407_v23 = vsel %vm3387_vm4, %v3379_v41, %v3399_v15  ;;  %3441 = vst [vmem:[%s4910_s5 + $0x28] sm:$0xff] %v3433_v34 }
 0x21a   : > { %v3419_v10 = vadd.f32 %v5696_v62, %v3407_v23 }
 0x21b   : > { %v3426_v4 = vadd.f32 %v3418_v11, %v1949_v63 }
 0x21c   : > { %v3427_v27 = vadd.f32 %v3419_v10, %v1952_v14 }
 0x21d   : > { %v3434_v38 = vadd.f32 %v3426_v4, %v1967_v52 }
 0x21e   : > { %v3435_v16 = vadd.f32 %v3427_v27, %v1968_v3 }
 0x21f   : > { %3442 = vst [vmem:[%s4910_s5 + $0x30] sm:$0xff] %v3434_v38 }
 0x220   : > { %3443 = vst [vmem:[%s4910_s5 + $0x38] sm:$0xff] %v3435_v16 }
 0x221   : > { %4684 = shalt.err (!%p4681_p5)
}
 0x222   : > { %s4685_s28 = scalar_lea.hbm %s5817_s26, 1024  ;;  %s4689_s9 = scalar_lea.hbm %s5874_s3, 2048 }
 0x223   : > { %p4686_p6 = scmp.ne.s32.totalorder %s5817_s26, %s4685_s28  ;;  %p4690_p12 = scmp.lt.u32.totalorder %s5817_s26, %s5874_s3 }
 0x224   : > { %p4691_p0 = scmp.lt.u32.totalorder %s4689_s9, %s4685_s28  ;;  %p4693_p4 = scmp.lt.u32.totalorder %s4685_s28, %s5817_s26 }
 0x225   : > { %p4687_p7 = pnand %p4686_p6, %p5890_p8 }
 0x226   : > { %p4692_p2 = por %p4691_p0, %p4690_p12 }
 0x227   : > { %p4688_p9 = pneg %p4687_p7 }
 0x228   : > { %p4694_p10 = por %p4693_p4, %p4692_p2 }
 0x22a   : > { %p4695_p11 = pnand %p4694_p10, %p4688_p9 }
 0x22c   : > { %4698 = shalt.err (!%p4695_p11)
}
 0x22d   : > { %s4763_s18 = smov 128   ;;  %s4764_s19 = smov 8  }
 0x22e   : > { %4385 = dma.vmem_to_hbm [thread:$0]  (%p5890_p8), %s5819_s23, 1024, %s5817_s26, %s5825_s15, %s4763_s18, %s4763_s18, %s4764_s19  }
 0x22f PF: > { %p4397_p13 = scmp.ge.s32.totalorder %s4755_s17, 2  ;;  %s3475_s21 = sand.u32 1, %s4735_s12  }
 0x230   : > { %p5891_p1 = scmp.ne.s32.totalorder %s5880_s24, 0  ;;  %s3476_s4 = scalar_lea.sflag [#allocation7], %s3475_s21 }
 0x232   : > { %p4392_p3 = pnand %p4397_p13, %p5891_p1 }
 0x234   : > { %4730 = dma.done.wait (!%p4392_p3), %s3476_s4, 1024  }
 0x235   : > { %4732 = vsyncadd (!%p4392_p3), %s3476_s4, 4294966272  ;;  %s17_s17 = sadd.s32 1, %s4755_s17   ;;  %s5892_s12 = smov %s4739_s13 }
 0x236   : > { %p14_p5 = scmp.ge.s32.totalorder %s17_s17, 4   ;;  %s5893_s13 = smov %s4743_s14 }
 0x237   : > { %s5894_s14 = smov %s4838_s25  ;;  %s5895_s15 = smov %s4751_s16 }
 0x238   : > { %s5896_s16 = smov %s5898_s20  ;;  %16 = sbr.rel (!%p14_p5) target bundleno = 5 (0x5), region = 196 }
 0x23f   :  { %3481 = vsyncpa [#allocation6], 1 }
 0x240   :  { %3483 = vsyncpa [#allocation6 + $0x1], 1 }
 0x241   :  { %3484 = vsyncpa [#allocation7], 1 }
 0x242   :  { %3486 = vsyncpa [#allocation7 + $0x1], 1 }
 0x243   :  { %3487 = vsyncmov [#allocation4] }
 0x246   :  { %s3488_s22 = vpop.sfrf %3487 }
 0x247   :  { %p3946_p8 = scmp.ne.s32.totalorder %s3488_s22, 0 }
 0x249   :  { %3492 = shalt.err (%p3946_p8)  }
 0x24a   :  { %3494 = vsyncmov [#allocation4 + $0x1] }
 0x24d   :  { %s3495_s24 = vpop.sfrf %3494 }
 0x24e   :  { %p3947_p6 = scmp.ne.s32.totalorder %s3495_s24, 0 }
 0x250   :  { %3499 = shalt.err (%p3947_p6)  }

</bundles_post_ra>
